<compile_context>
chip_gen: v7x
topology: tpu7x:2x2x1
jax: 0.10.0
libtpu: 0.0.40
codegen_flags: <defaults>
</compile_context>

<pallas_src>
import functools
import math

import jax
import jax.numpy as jnp
from jax.experimental import pallas as pl
from jax.experimental.pallas import tpu as pltpu


# ----------------------------------------------------------------------------
# Fused BERT layer kernel: one grid step = one batch element, everything in VMEM
# ----------------------------------------------------------------------------
def _bert_layer_kernel(x_ref, mask_ref, wqkv_ref, bqkv_ref, wo_ref, bo_ref,
                       g1_ref, b1_ref, wi_ref, bi_ref, wo2_ref, bo2_ref,
                       g2_ref, b2_ref, o_ref, *, num_heads, eps, scale):
    f32 = jnp.float32
    x = x_ref[0]                                   # (S, H)
    S, H = x.shape
    dH = H // num_heads
    mask = mask_ref[0]                             # (1, S) additive, bcast rows

    # ---- fused QKV projection: single MXU pass over x -----------------------
    qkv = jnp.dot(x, wqkv_ref[...], preferred_element_type=f32) + bqkv_ref[...]

    # ---- multi-head self-attention + output projection (accumulated) --------
    attn_out = jnp.zeros((S, H), f32) + bo_ref[...]
    for h in range(num_heads):                     # static unroll, nh small
        qh = qkv[:, h * dH:(h + 1) * dH]           # (S, dH)
        kh = qkv[:, H + h * dH: H + (h + 1) * dH]
        vh = qkv[:, 2 * H + h * dH: 2 * H + (h + 1) * dH]
        # Q @ K^T via dot_general contracting last dims (no explicit transpose)
        s = jax.lax.dot_general(qh, kh, (((1,), (1,)), ((), ())),
                                preferred_element_type=f32) * scale + mask
        s = s - jnp.max(s, axis=-1, keepdims=True)
        p = jnp.exp(s)
        p = p * pl.reciprocal(jnp.sum(p, axis=-1, keepdims=True), approx=True)
        ctx = jnp.dot(p, vh, preferred_element_type=f32)           # (S, dH)
        attn_out = attn_out + jnp.dot(ctx, wo_ref[h * dH:(h + 1) * dH, :],
                                      preferred_element_type=f32)

    # ---- add & LayerNorm (fused epilogue) ------------------------------------
    h1 = attn_out + x
    mu = jnp.mean(h1, axis=-1, keepdims=True)
    var = jnp.mean((h1 - mu) ** 2, axis=-1, keepdims=True)
    attn1 = (h1 - mu) * jax.lax.rsqrt(var + eps) * g1_ref[...] + b1_ref[...]

    # ---- FFN: Linear -> GELU(erf) -> Linear -> add & LayerNorm ---------------
    inter = jnp.dot(attn1, wi_ref[...], preferred_element_type=f32) + bi_ref[...]
    inter = inter * 0.5 * (1.0 + jax.lax.erf(inter * (1.0 / math.sqrt(2.0))))
    ffn = jnp.dot(inter, wo2_ref[...], preferred_element_type=f32) + bo2_ref[...]
    h2 = ffn + attn1
    mu2 = jnp.mean(h2, axis=-1, keepdims=True)
    var2 = jnp.mean((h2 - mu2) ** 2, axis=-1, keepdims=True)
    out = (h2 - mu2) * jax.lax.rsqrt(var2 + eps) * g2_ref[...] + b2_ref[...]
    o_ref[0] = out.astype(o_ref.dtype)


def bert_layer(h, ext_mask, p, *, num_heads, eps):
    """h: (B, S, H); ext_mask: (B, 1, S) additive; one pallas_call per layer."""
    B, S, H = h.shape
    I = p["Wi"].shape[1]
    w2d = lambda shape: pl.BlockSpec(shape, lambda b: (0, 0))
    return pl.pallas_call(
        functools.partial(_bert_layer_kernel, num_heads=num_heads, eps=eps,
                          scale=1.0 / math.sqrt(H // num_heads)),
        out_shape=jax.ShapeDtypeStruct((B, S, H), jnp.float32),
        grid=(B,),
        in_specs=[
            pl.BlockSpec((1, S, H), lambda b: (b, 0, 0)),     # x
            pl.BlockSpec((1, 1, S), lambda b: (b, 0, 0)),     # additive mask row
            w2d((H, 3 * H)), w2d((1, 3 * H)),                 # fused Wqkv, bqkv
            w2d((H, H)), w2d((1, H)),                         # Wo, bo
            w2d((1, H)), w2d((1, H)),                         # ln1 gamma, beta
            w2d((H, I)), w2d((1, I)),                         # Wi, bi
            w2d((I, H)), w2d((1, H)),                         # Wo2, bo2
            w2d((1, H)), w2d((1, H)),                         # ln2 gamma, beta
        ],
        out_specs=pl.BlockSpec((1, S, H), lambda b: (b, 0, 0)),
        compiler_params=pltpu.CompilerParams(
            dimension_semantics=("parallel",)),
    )(h, ext_mask, p["Wqkv"], p["bqkv"], p["Wo"], p["bo"],
      p["ln1_g"], p["ln1_b"], p["Wi"], p["bi"], p["Wo2"], p["bo2"],
      p["ln2_g"], p["ln2_b"])


# ----------------------------------------------------------------------------
# Fused CE kernel: modality MLPs + two cross attentions + cat_connect + residual
# ----------------------------------------------------------------------------
def _ce_kernel(t_ref, v_ref, a_ref,
               vW1_ref, vb1_ref, vW2_ref, vb2_ref,
               aW1_ref, ab1_ref, aW2_ref, ab2_ref,
               hvWq_ref, hvbq_ref, hvWkv_ref, hvbkv_ref,
               haWq_ref, habq_ref, haWkv_ref, habkv_ref,
               wc_ref, bc_ref, o_ref):
    f32 = jnp.float32
    t = t_ref[0]                                   # (St, H)
    H = t.shape[-1]

    # modality MLPs: Linear -> ReLU -> Linear (fused, stays in VMEM)
    v1 = jnp.maximum(
        jnp.dot(v_ref[0], vW1_ref[...], preferred_element_type=f32)
        + vb1_ref[...], 0.0)
    v_ = jnp.dot(v1, vW2_ref[...], preferred_element_type=f32) + vb2_ref[...]
    a1 = jnp.maximum(
        jnp.dot(a_ref[0], aW1_ref[...], preferred_element_type=f32)
        + ab1_ref[...], 0.0)
    a_ = jnp.dot(a1, aW2_ref[...], preferred_element_type=f32) + ab2_ref[...]

    def cross_attn(kv, wq_ref, bq_ref, wkv_ref, bkv_ref):
        # head_num = 1; reference applies softmax(score * 8) with no mask.
        q = jnp.dot(t, wq_ref[...], preferred_element_type=f32) + bq_ref[...]
        kvp = jnp.dot(kv, wkv_ref[...], preferred_element_type=f32) + bkv_ref[...]
        k = kvp[:, :H]
        v = kvp[:, H:]
        s = jax.lax.dot_general(q, k, (((1,), (1,)), ((), ())),
                                preferred_element_type=f32) * 8.0
        s = s - jnp.max(s, axis=-1, keepdims=True)
        p = jnp.exp(s)
        p = p * pl.reciprocal(jnp.sum(p, axis=-1, keepdims=True), approx=True)
        return jnp.dot(p, v, preferred_element_type=f32)           # (St, H)

    v_ctx = cross_attn(v_, hvWq_ref, hvbq_ref, hvWkv_ref, hvbkv_ref)
    a_ctx = cross_attn(a_, haWq_ref, habq_ref, haWkv_ref, habkv_ref)

    # cat_connect without materialising the concat: split Wc by rows.
    shift = (jnp.dot(v_ctx, wc_ref[:H, :], preferred_element_type=f32)
             + jnp.dot(a_ctx, wc_ref[H:, :], preferred_element_type=f32)
             + bc_ref[...])
    o_ref[0] = (shift + t).astype(o_ref.dtype)


def ce_forward(text, visual, acoustic, p):
    B, St, H = text.shape
    _, Sv, VD = visual.shape
    _, Sa, AD = acoustic.shape
    w2d = lambda shape: pl.BlockSpec(shape, lambda b: (0, 0))
    return pl.pallas_call(
        _ce_kernel,
        out_shape=jax.ShapeDtypeStruct((B, St, H), jnp.float32),
        grid=(B,),
        in_specs=[
            pl.BlockSpec((1, St, H), lambda b: (b, 0, 0)),    # text
            pl.BlockSpec((1, Sv, VD), lambda b: (b, 0, 0)),   # visual
            pl.BlockSpec((1, Sa, AD), lambda b: (b, 0, 0)),   # acoustic
            w2d((VD, H)), w2d((1, H)), w2d((H, H)), w2d((1, H)),     # visual MLP
            w2d((AD, H)), w2d((1, H)), w2d((H, H)), w2d((1, H)),     # acoustic MLP
            w2d((H, H)), w2d((1, H)), w2d((H, 2 * H)), w2d((1, 2 * H)),  # hv q,kv
            w2d((H, H)), w2d((1, H)), w2d((H, 2 * H)), w2d((1, 2 * H)),  # ha q,kv
            w2d((2 * H, H)), w2d((1, H)),                             # cat_connect
        ],
        out_specs=pl.BlockSpec((1, St, H), lambda b: (b, 0, 0)),
        compiler_params=pltpu.CompilerParams(
            dimension_semantics=("parallel",)),
    )(text, visual, acoustic,
      p["v_W1"], p["v_b1"], p["v_W2"], p["v_b2"],
      p["a_W1"], p["a_b1"], p["a_W2"], p["a_b2"],
      p["hv_Wq"], p["hv_bq"], p["hv_Wkv"], p["hv_bkv"],
      p["ha_Wq"], p["ha_bq"], p["ha_Wkv"], p["ha_bkv"],
      p["Wc"], p["bc"])


# ----------------------------------------------------------------------------
# Encoder composition
# ----------------------------------------------------------------------------
def bert_encoder_forward(hidden_states, visual, acoustic, attention_mask,
                         params, *, num_heads, eps, injection_index=1):
    # output_hidden_states=False, output_attentions=False, head_mask=None
    # Additive mask kept as (B, 1, S); broadcast per head/query inside kernel.
    ext_mask = ((1.0 - attention_mask) * -10000.0)[:, None, :]
    for i, layer_p in enumerate(params["layers"]):
        if i == injection_index:
            hidden_states = ce_forward(hidden_states, visual, acoustic,
                                       params["ce"])
        hidden_states = bert_layer(hidden_states, ext_mask, layer_p,
                                   num_heads=num_heads, eps=eps)
    return (hidden_states,)


# ----------------------------------------------------------------------------
# Deterministic parameter init (weights stored pre-fused / bias rows pre-shaped)
# ----------------------------------------------------------------------------
def init_linear_params(key, in_dim, out_dim):
    kw, kb = jax.random.split(key)
    W = jax.random.normal(kw, (in_dim, out_dim), jnp.float32) * 0.02
    b = jax.random.normal(kb, (out_dim,), jnp.float32) * 0.02
    return W, b


def init_params(key, H, I, num_layers, VIS_DIM, AUDIO_DIM):
    keys = iter(jax.random.split(key, 128))
    row = lambda b: b.reshape(1, -1)
    layers = []
    for _ in range(num_layers):
        Wq, bq = init_linear_params(next(keys), H, H)
        Wk, bk = init_linear_params(next(keys), H, H)
        Wv, bv = init_linear_params(next(keys), H, H)
        Wo, bo = init_linear_params(next(keys), H, H)
        Wi, bi = init_linear_params(next(keys), H, I)
        Wo2, bo2 = init_linear_params(next(keys), I, H)
        p = {
            "Wqkv": jnp.concatenate([Wq, Wk, Wv], axis=1),          # (H, 3H)
            "bqkv": row(jnp.concatenate([bq, bk, bv])),             # (1, 3H)
            "Wo": Wo, "bo": row(bo),
            "ln1_g": jnp.ones((1, H), jnp.float32),
            "ln1_b": jnp.zeros((1, H), jnp.float32),
            "Wi": Wi, "bi": row(bi),
            "Wo2": Wo2, "bo2": row(bo2),
            "ln2_g": jnp.ones((1, H), jnp.float32),
            "ln2_b": jnp.zeros((1, H), jnp.float32),
        }
        layers.append(p)

    ce = {}
    ce["v_W1"], vb1 = init_linear_params(next(keys), VIS_DIM, H)
    ce["v_W2"], vb2 = init_linear_params(next(keys), H, H)
    ce["a_W1"], ab1 = init_linear_params(next(keys), AUDIO_DIM, H)
    ce["a_W2"], ab2 = init_linear_params(next(keys), H, H)
    ce["v_b1"], ce["v_b2"] = row(vb1), row(vb2)
    ce["a_b1"], ce["a_b2"] = row(ab1), row(ab2)
    for pref in ("hv", "ha"):
        Wq, bq = init_linear_params(next(keys), H, H)
        Wk, bk = init_linear_params(next(keys), H, H)
        Wv, bv = init_linear_params(next(keys), H, H)
        ce[f"{pref}_Wq"] = Wq
        ce[f"{pref}_bq"] = row(bq)
        ce[f"{pref}_Wkv"] = jnp.concatenate([Wk, Wv], axis=1)       # (H, 2H)
        ce[f"{pref}_bkv"] = row(jnp.concatenate([bk, bv]))          # (1, 2H)
    Wc, bc = init_linear_params(next(keys), 2 * H, H)
    ce["Wc"], ce["bc"] = Wc, row(bc)

    return {"layers": layers, "ce": ce}


# ----------------------------------------------------------------------------
if __name__ == "__main__":
    # Small config consistent with the module:
    # hidden_size=32, num_attention_heads=4, intermediate_size=64,
    # num_hidden_layers=2 (CE injected before layer index 1), layer_norm_eps=1e-12
    # feature_dims = (TEXT_DIM=32, AUDIO_DIM=12, VIS_DIM=20)
    B, S, H = 2, 8, 32
    NUM_HEADS, I, NUM_LAYERS = 4, 64, 2
    VIS_DIM, AUDIO_DIM = 20, 12
    EPS = 1e-12

    key = jax.random.PRNGKey(0)
    k_param, k_text, k_vis, k_aud = jax.random.split(key, 4)

    params = init_params(k_param, H, I, NUM_LAYERS, VIS_DIM, AUDIO_DIM)

    hidden_states = jax.random.normal(k_text, (B, S, H), jnp.float32)
    visual = jax.random.normal(k_vis, (B, S, VIS_DIM), jnp.float32)
    acoustic = jax.random.normal(k_aud, (B, S, AUDIO_DIM), jnp.float32)

    # attention_mask: 1 = attend, 0 = masked; batch 1 masks its last 2 tokens.
    attention_mask = jnp.ones((B, S), jnp.float32)
    attention_mask = attention_mask.at[1, -2:].set(0.0)

    # TODO(synk): dropout layers are identity (inference mode); training-mode
    # stochastic dropout is not reproduced.
    fwd = jax.jit(
        functools.partial(
            bert_encoder_forward,
            num_heads=NUM_HEADS,
            eps=EPS,
            injection_index=1,
        )
    )
    outputs = fwd(hidden_states, visual, acoustic, attention_mask, params)
    out = jax.block_until_ready(outputs[0])
    assert out.shape == (B, S, H)
    assert bool(jnp.all(jnp.isfinite(out)))
    print("KERNEL_OK")
</pallas_src>

<mosaic_0001>
module attributes {stable_mosaic.version = 11 : i64} {
  func.func @_ce_kernel(%arg0: i32, %arg1: memref<1x8x32xf32, #tpu.memory_space<vmem>>, %arg2: memref<1x8x20xf32, #tpu.memory_space<vmem>>, %arg3: memref<1x8x12xf32, #tpu.memory_space<vmem>>, %arg4: memref<20x32xf32, #tpu.memory_space<vmem>>, %arg5: memref<1x32xf32, #tpu.memory_space<vmem>>, %arg6: memref<32x32xf32, #tpu.memory_space<vmem>>, %arg7: memref<1x32xf32, #tpu.memory_space<vmem>>, %arg8: memref<12x32xf32, #tpu.memory_space<vmem>>, %arg9: memref<1x32xf32, #tpu.memory_space<vmem>>, %arg10: memref<32x32xf32, #tpu.memory_space<vmem>>, %arg11: memref<1x32xf32, #tpu.memory_space<vmem>>, %arg12: memref<32x32xf32, #tpu.memory_space<vmem>>, %arg13: memref<1x32xf32, #tpu.memory_space<vmem>>, %arg14: memref<32x64xf32, #tpu.memory_space<vmem>>, %arg15: memref<1x64xf32, #tpu.memory_space<vmem>>, %arg16: memref<32x32xf32, #tpu.memory_space<vmem>>, %arg17: memref<1x32xf32, #tpu.memory_space<vmem>>, %arg18: memref<32x64xf32, #tpu.memory_space<vmem>>, %arg19: memref<1x64xf32, #tpu.memory_space<vmem>>, %arg20: memref<64x32xf32, #tpu.memory_space<vmem>>, %arg21: memref<1x32xf32, #tpu.memory_space<vmem>>, %arg22: memref<1x8x32xf32, #tpu.memory_space<vmem>>) attributes {dimension_semantics = [#tpu.dimension_semantics<parallel>], iteration_bounds = array<i64: 2>, scalar_prefetch = 0 : i64, scratch_operands = 0 : i64, tpu.core_type = #tpu.core_type<tc>, window_params = [{transform_indices = @transform_0, window_bounds = array<i64: 1, 8, 32>}, {transform_indices = @transform_1, window_bounds = array<i64: 1, 8, 20>}, {transform_indices = @transform_2, window_bounds = array<i64: 1, 8, 12>}, {pipeline_mode = #tpu.pipeline_mode<synchronous>, transform_indices = @transform_3, window_bounds = array<i64: 20, 32>}, {pipeline_mode = #tpu.pipeline_mode<synchronous>, transform_indices = @transform_4, window_bounds = array<i64: 1, 32>}, {pipeline_mode = #tpu.pipeline_mode<synchronous>, transform_indices = @transform_5, window_bounds = array<i64: 32, 32>}, {pipeline_mode = #tpu.pipeline_mode<synchronous>, transform_indices = @transform_6, window_bounds = array<i64: 1, 32>}, {pipeline_mode = #tpu.pipeline_mode<synchronous>, transform_indices = @transform_7, window_bounds = array<i64: 12, 32>}, {pipeline_mode = #tpu.pipeline_mode<synchronous>, transform_indices = @transform_8, window_bounds = array<i64: 1, 32>}, {pipeline_mode = #tpu.pipeline_mode<synchronous>, transform_indices = @transform_9, window_bounds = array<i64: 32, 32>}, {pipeline_mode = #tpu.pipeline_mode<synchronous>, transform_indices = @transform_10, window_bounds = array<i64: 1, 32>}, {pipeline_mode = #tpu.pipeline_mode<synchronous>, transform_indices = @transform_11, window_bounds = array<i64: 32, 32>}, {pipeline_mode = #tpu.pipeline_mode<synchronous>, transform_indices = @transform_12, window_bounds = array<i64: 1, 32>}, {pipeline_mode = #tpu.pipeline_mode<synchronous>, transform_indices = @transform_13, window_bounds = array<i64: 32, 64>}, {pipeline_mode = #tpu.pipeline_mode<synchronous>, transform_indices = @transform_14, window_bounds = array<i64: 1, 64>}, {pipeline_mode = #tpu.pipeline_mode<synchronous>, transform_indices = @transform_15, window_bounds = array<i64: 32, 32>}, {pipeline_mode = #tpu.pipeline_mode<synchronous>, transform_indices = @transform_16, window_bounds = array<i64: 1, 32>}, {pipeline_mode = #tpu.pipeline_mode<synchronous>, transform_indices = @transform_17, window_bounds = array<i64: 32, 64>}, {pipeline_mode = #tpu.pipeline_mode<synchronous>, transform_indices = @transform_18, window_bounds = array<i64: 1, 64>}, {pipeline_mode = #tpu.pipeline_mode<synchronous>, transform_indices = @transform_19, window_bounds = array<i64: 64, 32>}, {pipeline_mode = #tpu.pipeline_mode<synchronous>, transform_indices = @transform_20, window_bounds = array<i64: 1, 32>}, {transform_indices = @transform_21, window_bounds = array<i64: 1, 8, 32>}]} {
    %c0 = arith.constant 0 : index
    %c0_0 = arith.constant 0 : index
    %c0_1 = arith.constant 0 : index
    %0 = vector.load %arg1[%c0, %c0_0, %c0_1] : memref<1x8x32xf32, #tpu.memory_space<vmem>>, vector<1x8x32xf32>
    %1 = vector.shape_cast %0 : vector<1x8x32xf32> to vector<8x32xf32>
    %c0_2 = arith.constant 0 : index
    %c0_3 = arith.constant 0 : index
    %c0_4 = arith.constant 0 : index
    %2 = vector.load %arg2[%c0_2, %c0_3, %c0_4] : memref<1x8x20xf32, #tpu.memory_space<vmem>>, vector<1x8x20xf32>
    %3 = vector.shape_cast %2 : vector<1x8x20xf32> to vector<8x20xf32>
    %c0_5 = arith.constant 0 : index
    %c0_6 = arith.constant 0 : index
    %4 = vector.load %arg4[%c0_5, %c0_6] : memref<20x32xf32, #tpu.memory_space<vmem>>, vector<20x32xf32>
    %cst = arith.constant dense<0.000000e+00> : vector<8x32xf32>
    %5 = tpu.matmul %3, %4, %cst {dimension_numbers = #tpu.dot_dimension_numbers<[1], [0], [0], [1], [0, 0, 1, 1], [], []>} : vector<8x20xf32>, vector<20x32xf32>, vector<8x32xf32> -> vector<8x32xf32>
    %c0_7 = arith.constant 0 : index
    %c0_8 = arith.constant 0 : index
    %6 = vector.load %arg5[%c0_7, %c0_8] : memref<1x32xf32, #tpu.memory_space<vmem>>, vector<1x32xf32>
    %7 = vector.broadcast %6 : vector<1x32xf32> to vector<8x32xf32>
    %8 = arith.addf %5, %7 : vector<8x32xf32>
    %cst_9 = arith.constant 0.000000e+00 : f32
    %9 = vector.broadcast %cst_9 : f32 to vector<8x32xf32>
    %10 = arith.maximumf %8, %9 : vector<8x32xf32>
    %c0_10 = arith.constant 0 : index
    %c0_11 = arith.constant 0 : index
    %11 = vector.load %arg6[%c0_10, %c0_11] : memref<32x32xf32, #tpu.memory_space<vmem>>, vector<32x32xf32>
    %cst_12 = arith.constant dense<0.000000e+00> : vector<8x32xf32>
    %12 = tpu.matmul %10, %11, %cst_12 {dimension_numbers = #tpu.dot_dimension_numbers<[1], [0], [0], [1], [0, 0, 1, 1], [], []>} : vector<8x32xf32>, vector<32x32xf32>, vector<8x32xf32> -> vector<8x32xf32>
    %c0_13 = arith.constant 0 : index
    %c0_14 = arith.constant 0 : index
    %13 = vector.load %arg7[%c0_13, %c0_14] : memref<1x32xf32, #tpu.memory_space<vmem>>, vector<1x32xf32>
    %14 = vector.broadcast %13 : vector<1x32xf32> to vector<8x32xf32>
    %15 = arith.addf %12, %14 : vector<8x32xf32>
    %c0_15 = arith.constant 0 : index
    %c0_16 = arith.constant 0 : index
    %c0_17 = arith.constant 0 : index
    %16 = vector.load %arg3[%c0_15, %c0_16, %c0_17] : memref<1x8x12xf32, #tpu.memory_space<vmem>>, vector<1x8x12xf32>
    %17 = vector.shape_cast %16 : vector<1x8x12xf32> to vector<8x12xf32>
    %c0_18 = arith.constant 0 : index
    %c0_19 = arith.constant 0 : index
    %18 = vector.load %arg8[%c0_18, %c0_19] : memref<12x32xf32, #tpu.memory_space<vmem>>, vector<12x32xf32>
    %cst_20 = arith.constant dense<0.000000e+00> : vector<8x32xf32>
    %19 = tpu.matmul %17, %18, %cst_20 {dimension_numbers = #tpu.dot_dimension_numbers<[1], [0], [0], [1], [0, 0, 1, 1], [], []>} : vector<8x12xf32>, vector<12x32xf32>, vector<8x32xf32> -> vector<8x32xf32>
    %c0_21 = arith.constant 0 : index
    %c0_22 = arith.constant 0 : index
    %20 = vector.load %arg9[%c0_21, %c0_22] : memref<1x32xf32, #tpu.memory_space<vmem>>, vector<1x32xf32>
    %21 = vector.broadcast %20 : vector<1x32xf32> to vector<8x32xf32>
    %22 = arith.addf %19, %21 : vector<8x32xf32>
    %cst_23 = arith.constant 0.000000e+00 : f32
    %23 = vector.broadcast %cst_23 : f32 to vector<8x32xf32>
    %24 = arith.maximumf %22, %23 : vector<8x32xf32>
    %c0_24 = arith.constant 0 : index
    %c0_25 = arith.constant 0 : index
    %25 = vector.load %arg10[%c0_24, %c0_25] : memref<32x32xf32, #tpu.memory_space<vmem>>, vector<32x32xf32>
    %cst_26 = arith.constant dense<0.000000e+00> : vector<8x32xf32>
    %26 = tpu.matmul %24, %25, %cst_26 {dimension_numbers = #tpu.dot_dimension_numbers<[1], [0], [0], [1], [0, 0, 1, 1], [], []>} : vector<8x32xf32>, vector<32x32xf32>, vector<8x32xf32> -> vector<8x32xf32>
    %c0_27 = arith.constant 0 : index
    %c0_28 = arith.constant 0 : index
    %27 = vector.load %arg11[%c0_27, %c0_28] : memref<1x32xf32, #tpu.memory_space<vmem>>, vector<1x32xf32>
    %28 = vector.broadcast %27 : vector<1x32xf32> to vector<8x32xf32>
    %29 = arith.addf %26, %28 : vector<8x32xf32>
    %c0_29 = arith.constant 0 : index
    %c0_30 = arith.constant 0 : index
    %30 = vector.load %arg12[%c0_29, %c0_30] : memref<32x32xf32, #tpu.memory_space<vmem>>, vector<32x32xf32>
    %cst_31 = arith.constant dense<0.000000e+00> : vector<8x32xf32>
    %31 = tpu.matmul %1, %30, %cst_31 {dimension_numbers = #tpu.dot_dimension_numbers<[1], [0], [0], [1], [0, 0, 1, 1], [], []>} : vector<8x32xf32>, vector<32x32xf32>, vector<8x32xf32> -> vector<8x32xf32>
    %c0_32 = arith.constant 0 : index
    %c0_33 = arith.constant 0 : index
    %32 = vector.load %arg13[%c0_32, %c0_33] : memref<1x32xf32, #tpu.memory_space<vmem>>, vector<1x32xf32>
    %33 = vector.broadcast %32 : vector<1x32xf32> to vector<8x32xf32>
    %34 = arith.addf %31, %33 : vector<8x32xf32>
    %c0_34 = arith.constant 0 : index
    %c0_35 = arith.constant 0 : index
    %35 = vector.load %arg14[%c0_34, %c0_35] : memref<32x64xf32, #tpu.memory_space<vmem>>, vector<32x64xf32>
    %cst_36 = arith.constant dense<0.000000e+00> : vector<8x64xf32>
    %36 = tpu.matmul %15, %35, %cst_36 {dimension_numbers = #tpu.dot_dimension_numbers<[1], [0], [0], [1], [0, 0, 1, 1], [], []>} : vector<8x32xf32>, vector<32x64xf32>, vector<8x64xf32> -> vector<8x64xf32>
    %c0_37 = arith.constant 0 : index
    %c0_38 = arith.constant 0 : index
    %37 = vector.load %arg15[%c0_37, %c0_38] : memref<1x64xf32, #tpu.memory_space<vmem>>, vector<1x64xf32>
    %38 = vector.broadcast %37 : vector<1x64xf32> to vector<8x64xf32>
    %39 = arith.addf %36, %38 : vector<8x64xf32>
    %40 = vector.extract_strided_slice %39 {offsets = [0, 0], sizes = [8, 32], strides = [1, 1]} : vector<8x64xf32> to vector<8x32xf32>
    %41 = vector.extract_strided_slice %39 {offsets = [0, 32], sizes = [8, 32], strides = [1, 1]} : vector<8x64xf32> to vector<8x32xf32>
    %cst_39 = arith.constant dense<0.000000e+00> : vector<8x8xf32>
    %42 = tpu.matmul %34, %40, %cst_39 {dimension_numbers = #tpu.dot_dimension_numbers<[1], [1], [0], [0], [0, 0, 1, 0], [], []>} : vector<8x32xf32>, vector<8x32xf32>, vector<8x8xf32> -> vector<8x8xf32>
    %cst_40 = arith.constant 8.000000e+00 : f32
    %43 = vector.broadcast %cst_40 : f32 to vector<8x8xf32>
    %44 = arith.mulf %42, %43 : vector<8x8xf32>
    %cst_41 = arith.constant dense<0xFF800000> : vector<8xf32>
    %45 = vector.multi_reduction <maximumf>, %44, %cst_41 [1] : vector<8x8xf32> to vector<8xf32>
    %46 = vector.shape_cast %45 : vector<8xf32> to vector<8x1xf32>
    %47 = vector.broadcast %46 : vector<8x1xf32> to vector<8x8xf32>
    %48 = arith.subf %44, %47 : vector<8x8xf32>
    %49 = math.exp %48 : vector<8x8xf32>
    %cst_42 = arith.constant dense<0.000000e+00> : vector<8xf32>
    %50 = vector.multi_reduction <add>, %49, %cst_42 [1] : vector<8x8xf32> to vector<8xf32>
    %51 = vector.shape_cast %50 : vector<8xf32> to vector<8x1xf32>
    %52 = tpu.reciprocal %51 {approx = true} : vector<8x1xf32> -> vector<8x1xf32>
    %53 = vector.broadcast %52 : vector<8x1xf32> to vector<8x8xf32>
    %54 = arith.mulf %49, %53 : vector<8x8xf32>
    %cst_43 = arith.constant dense<0.000000e+00> : vector<8x32xf32>
    %55 = tpu.matmul %54, %41, %cst_43 {dimension_numbers = #tpu.dot_dimension_numbers<[1], [0], [0], [1], [0, 0, 1, 1], [], []>} : vector<8x8xf32>, vector<8x32xf32>, vector<8x32xf32> -> vector<8x32xf32>
    %c0_44 = arith.constant 0 : index
    %c0_45 = arith.constant 0 : index
    %56 = vector.load %arg16[%c0_44, %c0_45] : memref<32x32xf32, #tpu.memory_space<vmem>>, vector<32x32xf32>
    %cst_46 = arith.constant dense<0.000000e+00> : vector<8x32xf32>
    %57 = tpu.matmul %1, %56, %cst_46 {dimension_numbers = #tpu.dot_dimension_numbers<[1], [0], [0], [1], [0, 0, 1, 1], [], []>} : vector<8x32xf32>, vector<32x32xf32>, vector<8x32xf32> -> vector<8x32xf32>
    %c0_47 = arith.constant 0 : index
    %c0_48 = arith.constant 0 : index
    %58 = vector.load %arg17[%c0_47, %c0_48] : memref<1x32xf32, #tpu.memory_space<vmem>>, vector<1x32xf32>
    %59 = vector.broadcast %58 : vector<1x32xf32> to vector<8x32xf32>
    %60 = arith.addf %57, %59 : vector<8x32xf32>
    %c0_49 = arith.constant 0 : index
    %c0_50 = arith.constant 0 : index
    %61 = vector.load %arg18[%c0_49, %c0_50] : memref<32x64xf32, #tpu.memory_space<vmem>>, vector<32x64xf32>
    %cst_51 = arith.constant dense<0.000000e+00> : vector<8x64xf32>
    %62 = tpu.matmul %29, %61, %cst_51 {dimension_numbers = #tpu.dot_dimension_numbers<[1], [0], [0], [1], [0, 0, 1, 1], [], []>} : vector<8x32xf32>, vector<32x64xf32>, vector<8x64xf32> -> vector<8x64xf32>
    %c0_52 = arith.constant 0 : index
    %c0_53 = arith.constant 0 : index
    %63 = vector.load %arg19[%c0_52, %c0_53] : memref<1x64xf32, #tpu.memory_space<vmem>>, vector<1x64xf32>
    %64 = vector.broadcast %63 : vector<1x64xf32> to vector<8x64xf32>
    %65 = arith.addf %62, %64 : vector<8x64xf32>
    %66 = vector.extract_strided_slice %65 {offsets = [0, 0], sizes = [8, 32], strides = [1, 1]} : vector<8x64xf32> to vector<8x32xf32>
    %67 = vector.extract_strided_slice %65 {offsets = [0, 32], sizes = [8, 32], strides = [1, 1]} : vector<8x64xf32> to vector<8x32xf32>
    %cst_54 = arith.constant dense<0.000000e+00> : vector<8x8xf32>
    %68 = tpu.matmul %60, %66, %cst_54 {dimension_numbers = #tpu.dot_dimension_numbers<[1], [1], [0], [0], [0, 0, 1, 0], [], []>} : vector<8x32xf32>, vector<8x32xf32>, vector<8x8xf32> -> vector<8x8xf32>
    %cst_55 = arith.constant 8.000000e+00 : f32
    %69 = vector.broadcast %cst_55 : f32 to vector<8x8xf32>
    %70 = arith.mulf %68, %69 : vector<8x8xf32>
    %cst_56 = arith.constant dense<0xFF800000> : vector<8xf32>
    %71 = vector.multi_reduction <maximumf>, %70, %cst_56 [1] : vector<8x8xf32> to vector<8xf32>
    %72 = vector.shape_cast %71 : vector<8xf32> to vector<8x1xf32>
    %73 = vector.broadcast %72 : vector<8x1xf32> to vector<8x8xf32>
    %74 = arith.subf %70, %73 : vector<8x8xf32>
    %75 = math.exp %74 : vector<8x8xf32>
    %cst_57 = arith.constant dense<0.000000e+00> : vector<8xf32>
    %76 = vector.multi_reduction <add>, %75, %cst_57 [1] : vector<8x8xf32> to vector<8xf32>
    %77 = vector.shape_cast %76 : vector<8xf32> to vector<8x1xf32>
    %78 = tpu.reciprocal %77 {approx = true} : vector<8x1xf32> -> vector<8x1xf32>
    %79 = vector.broadcast %78 : vector<8x1xf32> to vector<8x8xf32>
    %80 = arith.mulf %75, %79 : vector<8x8xf32>
    %cst_58 = arith.constant dense<0.000000e+00> : vector<8x32xf32>
    %81 = tpu.matmul %80, %67, %cst_58 {dimension_numbers = #tpu.dot_dimension_numbers<[1], [0], [0], [1], [0, 0, 1, 1], [], []>} : vector<8x8xf32>, vector<8x32xf32>, vector<8x32xf32> -> vector<8x32xf32>
    %c0_59 = arith.constant 0 : index
    %c0_60 = arith.constant 0 : index
    %82 = vector.load %arg20[%c0_59, %c0_60] : memref<64x32xf32, #tpu.memory_space<vmem>>, vector<32x32xf32>
    %cst_61 = arith.constant dense<0.000000e+00> : vector<8x32xf32>
    %83 = tpu.matmul %55, %82, %cst_61 {dimension_numbers = #tpu.dot_dimension_numbers<[1], [0], [0], [1], [0, 0, 1, 1], [], []>} : vector<8x32xf32>, vector<32x32xf32>, vector<8x32xf32> -> vector<8x32xf32>
    %c32 = arith.constant 32 : index
    %c0_62 = arith.constant 0 : index
    %84 = vector.load %arg20[%c32, %c0_62] : memref<64x32xf32, #tpu.memory_space<vmem>>, vector<32x32xf32>
    %cst_63 = arith.constant dense<0.000000e+00> : vector<8x32xf32>
    %85 = tpu.matmul %81, %84, %cst_63 {dimension_numbers = #tpu.dot_dimension_numbers<[1], [0], [0], [1], [0, 0, 1, 1], [], []>} : vector<8x32xf32>, vector<32x32xf32>, vector<8x32xf32> -> vector<8x32xf32>
    %86 = arith.addf %83, %85 : vector<8x32xf32>
    %c0_64 = arith.constant 0 : index
    %c0_65 = arith.constant 0 : index
    %87 = vector.load %arg21[%c0_64, %c0_65] : memref<1x32xf32, #tpu.memory_space<vmem>>, vector<1x32xf32>
    %88 = vector.broadcast %87 : vector<1x32xf32> to vector<8x32xf32>
    %89 = arith.addf %86, %88 : vector<8x32xf32>
    %90 = arith.addf %89, %1 : vector<8x32xf32>
    %c0_66 = arith.constant 0 : index
    %c0_67 = arith.constant 0 : index
    %c0_68 = arith.constant 0 : index
    %91 = vector.load %arg22[%c0_66, %c0_67, %c0_68] : memref<1x8x32xf32, #tpu.memory_space<vmem>>, vector<1x8x32xf32>
    %92 = vector.shape_cast %91 : vector<1x8x32xf32> to vector<8x32xf32>
    %93 = vector.shape_cast %90 : vector<8x32xf32> to vector<1x8x32xf32>
    tpu.vector_store %arg22[%c0_66, %c0_67, %c0_68], %93 {strides = array<i32>} : memref<1x8x32xf32, #tpu.memory_space<vmem>>, vector<1x8x32xf32>,
    return
  }
  func.func @transform_0(%arg0: i32) -> (i32, i32, i32) {
    %c0_i32 = arith.constant 0 : i32
    %c0_i32_0 = arith.constant 0 : i32
    %c0_i32_1 = arith.constant 0 : i32
    return %arg0, %c0_i32, %c0_i32_0 : i32, i32, i32
  }
  func.func @transform_1(%arg0: i32) -> (i32, i32, i32) {
    %c0_i32 = arith.constant 0 : i32
    %c0_i32_0 = arith.constant 0 : i32
    %c0_i32_1 = arith.constant 0 : i32
    return %arg0, %c0_i32, %c0_i32_0 : i32, i32, i32
  }
  func.func @transform_2(%arg0: i32) -> (i32, i32, i32) {
    %c0_i32 = arith.constant 0 : i32
    %c0_i32_0 = arith.constant 0 : i32
    %c0_i32_1 = arith.constant 0 : i32
    return %arg0, %c0_i32, %c0_i32_0 : i32, i32, i32
  }
  func.func @transform_3(%arg0: i32) -> (i32, i32) {
    %c0_i32 = arith.constant 0 : i32
    %c0_i32_0 = arith.constant 0 : i32
    %c0_i32_1 = arith.constant 0 : i32
    return %c0_i32, %c0_i32_0 : i32, i32
  }
  func.func @transform_4(%arg0: i32) -> (i32, i32) {
    %c0_i32 = arith.constant 0 : i32
    %c0_i32_0 = arith.constant 0 : i32
    %c0_i32_1 = arith.constant 0 : i32
    return %c0_i32, %c0_i32_0 : i32, i32
  }
  func.func @transform_5(%arg0: i32) -> (i32, i32) {
    %c0_i32 = arith.constant 0 : i32
    %c0_i32_0 = arith.constant 0 : i32
    %c0_i32_1 = arith.constant 0 : i32
    return %c0_i32, %c0_i32_0 : i32, i32
  }
  func.func @transform_6(%arg0: i32) -> (i32, i32) {
    %c0_i32 = arith.constant 0 : i32
    %c0_i32_0 = arith.constant 0 : i32
    %c0_i32_1 = arith.constant 0 : i32
    return %c0_i32, %c0_i32_0 : i32, i32
  }
  func.func @transform_7(%arg0: i32) -> (i32, i32) {
    %c0_i32 = arith.constant 0 : i32
    %c0_i32_0 = arith.constant 0 : i32
    %c0_i32_1 = arith.constant 0 : i32
    return %c0_i32, %c0_i32_0 : i32, i32
  }
  func.func @transform_8(%arg0: i32) -> (i32, i32) {
    %c0_i32 = arith.constant 0 : i32
    %c0_i32_0 = arith.constant 0 : i32
    %c0_i32_1 = arith.constant 0 : i32
    return %c0_i32, %c0_i32_0 : i32, i32
  }
  func.func @transform_9(%arg0: i32) -> (i32, i32) {
    %c0_i32 = arith.constant 0 : i32
    %c0_i32_0 = arith.constant 0 : i32
    %c0_i32_1 = arith.constant 0 : i32
    return %c0_i32, %c0_i32_0 : i32, i32
  }
  func.func @transform_10(%arg0: i32) -> (i32, i32) {
    %c0_i32 = arith.constant 0 : i32
    %c0_i32_0 = arith.constant 0 : i32
    %c0_i32_1 = arith.constant 0 : i32
    return %c0_i32, %c0_i32_0 : i32, i32
  }
  func.func @transform_11(%arg0: i32) -> (i32, i32) {
    %c0_i32 = arith.constant 0 : i32
    %c0_i32_0 = arith.constant 0 : i32
    %c0_i32_1 = arith.constant 0 : i32
    return %c0_i32, %c0_i32_0 : i32, i32
  }
  func.func @transform_12(%arg0: i32) -> (i32, i32) {
    %c0_i32 = arith.constant 0 : i32
    %c0_i32_0 = arith.constant 0 : i32
    %c0_i32_1 = arith.constant 0 : i32
    return %c0_i32, %c0_i32_0 : i32, i32
  }
  func.func @transform_13(%arg0: i32) -> (i32, i32) {
    %c0_i32 = arith.constant 0 : i32
    %c0_i32_0 = arith.constant 0 : i32
    %c0_i32_1 = arith.constant 0 : i32
    return %c0_i32, %c0_i32_0 : i32, i32
  }
  func.func @transform_14(%arg0: i32) -> (i32, i32) {
    %c0_i32 = arith.constant 0 : i32
    %c0_i32_0 = arith.constant 0 : i32
    %c0_i32_1 = arith.constant 0 : i32
    return %c0_i32, %c0_i32_0 : i32, i32
  }
  func.func @transform_15(%arg0: i32) -> (i32, i32) {
    %c0_i32 = arith.constant 0 : i32
    %c0_i32_0 = arith.constant 0 : i32
    %c0_i32_1 = arith.constant 0 : i32
    return %c0_i32, %c0_i32_0 : i32, i32
  }
  func.func @transform_16(%arg0: i32) -> (i32, i32) {
    %c0_i32 = arith.constant 0 : i32
    %c0_i32_0 = arith.constant 0 : i32
    %c0_i32_1 = arith.constant 0 : i32
    return %c0_i32, %c0_i32_0 : i32, i32
  }
  func.func @transform_17(%arg0: i32) -> (i32, i32) {
    %c0_i32 = arith.constant 0 : i32
    %c0_i32_0 = arith.constant 0 : i32
    %c0_i32_1 = arith.constant 0 : i32
    return %c0_i32, %c0_i32_0 : i32, i32
  }
  func.func @transform_18(%arg0: i32) -> (i32, i32) {
    %c0_i32 = arith.constant 0 : i32
    %c0_i32_0 = arith.constant 0 : i32
    %c0_i32_1 = arith.constant 0 : i32
    return %c0_i32, %c0_i32_0 : i32, i32
  }
  func.func @transform_19(%arg0: i32) -> (i32, i32) {
    %c0_i32 = arith.constant 0 : i32
    %c0_i32_0 = arith.constant 0 : i32
    %c0_i32_1 = arith.constant 0 : i32
    return %c0_i32, %c0_i32_0 : i32, i32
  }
  func.func @transform_20(%arg0: i32) -> (i32, i32) {
    %c0_i32 = arith.constant 0 : i32
    %c0_i32_0 = arith.constant 0 : i32
    %c0_i32_1 = arith.constant 0 : i32
    return %c0_i32, %c0_i32_0 : i32, i32
  }
  func.func @transform_21(%arg0: i32) -> (i32, i32, i32) {
    %c0_i32 = arith.constant 0 : i32
    %c0_i32_0 = arith.constant 0 : i32
    %c0_i32_1 = arith.constant 0 : i32
    return %arg0, %c0_i32, %c0_i32_0 : i32, i32, i32
  }
}

module attributes {stable_mosaic.version = 11 : i64} {
  func.func @_bert_layer_kernel(%arg0: i32, %arg1: memref<1x8x32xf32, #tpu.memory_space<vmem>>, %arg2: memref<1x1x8xf32, #tpu.memory_space<vmem>>, %arg3: memref<32x96xf32, #tpu.memory_space<vmem>>, %arg4: memref<1x96xf32, #tpu.memory_space<vmem>>, %arg5: memref<32x32xf32, #tpu.memory_space<vmem>>, %arg6: memref<1x32xf32, #tpu.memory_space<vmem>>, %arg7: memref<1x32xf32, #tpu.memory_space<vmem>>, %arg8: memref<1x32xf32, #tpu.memory_space<vmem>>, %arg9: memref<32x64xf32, #tpu.memory_space<vmem>>, %arg10: memref<1x64xf32, #tpu.memory_space<vmem>>, %arg11: memref<64x32xf32, #tpu.memory_space<vmem>>, %arg12: memref<1x32xf32, #tpu.memory_space<vmem>>, %arg13: memref<1x32xf32, #tpu.memory_space<vmem>>, %arg14: memref<1x32xf32, #tpu.memory_space<vmem>>, %arg15: memref<1x8x32xf32, #tpu.memory_space<vmem>>) attributes {dimension_semantics = [#tpu.dimension_semantics<parallel>], iteration_bounds = array<i64: 2>, scalar_prefetch = 0 : i64, scratch_operands = 0 : i64, tpu.core_type = #tpu.core_type<tc>, window_params = [{transform_indices = @transform_0, window_bounds = array<i64: 1, 8, 32>}, {transform_indices = @transform_1, window_bounds = array<i64: 1, 1, 8>}, {pipeline_mode = #tpu.pipeline_mode<synchronous>, transform_indices = @transform_2, window_bounds = array<i64: 32, 96>}, {pipeline_mode = #tpu.pipeline_mode<synchronous>, transform_indices = @transform_3, window_bounds = array<i64: 1, 96>}, {pipeline_mode = #tpu.pipeline_mode<synchronous>, transform_indices = @transform_4, window_bounds = array<i64: 32, 32>}, {pipeline_mode = #tpu.pipeline_mode<synchronous>, transform_indices = @transform_5, window_bounds = array<i64: 1, 32>}, {pipeline_mode = #tpu.pipeline_mode<synchronous>, transform_indices = @transform_6, window_bounds = array<i64: 1, 32>}, {pipeline_mode = #tpu.pipeline_mode<synchronous>, transform_indices = @transform_7, window_bounds = array<i64: 1, 32>}, {pipeline_mode = #tpu.pipeline_mode<synchronous>, transform_indices = @transform_8, window_bounds = array<i64: 32, 64>}, {pipeline_mode = #tpu.pipeline_mode<synchronous>, transform_indices = @transform_9, window_bounds = array<i64: 1, 64>}, {pipeline_mode = #tpu.pipeline_mode<synchronous>, transform_indices = @transform_10, window_bounds = array<i64: 64, 32>}, {pipeline_mode = #tpu.pipeline_mode<synchronous>, transform_indices = @transform_11, window_bounds = array<i64: 1, 32>}, {pipeline_mode = #tpu.pipeline_mode<synchronous>, transform_indices = @transform_12, window_bounds = array<i64: 1, 32>}, {pipeline_mode = #tpu.pipeline_mode<synchronous>, transform_indices = @transform_13, window_bounds = array<i64: 1, 32>}, {transform_indices = @transform_14, window_bounds = array<i64: 1, 8, 32>}]} {
    %c0 = arith.constant 0 : index
    %c0_0 = arith.constant 0 : index
    %c0_1 = arith.constant 0 : index
    %0 = vector.load %arg1[%c0, %c0_0, %c0_1] : memref<1x8x32xf32, #tpu.memory_space<vmem>>, vector<1x8x32xf32>
    %1 = vector.shape_cast %0 : vector<1x8x32xf32> to vector<8x32xf32>
    %c0_2 = arith.constant 0 : index
    %c0_3 = arith.constant 0 : index
    %c0_4 = arith.constant 0 : index
    %2 = vector.load %arg2[%c0_2, %c0_3, %c0_4] : memref<1x1x8xf32, #tpu.memory_space<vmem>>, vector<1x1x8xf32>
    %3 = vector.shape_cast %2 : vector<1x1x8xf32> to vector<1x8xf32>
    %c0_5 = arith.constant 0 : index
    %c0_6 = arith.constant 0 : index
    %4 = vector.load %arg3[%c0_5, %c0_6] : memref<32x96xf32, #tpu.memory_space<vmem>>, vector<32x96xf32>
    %cst = arith.constant dense<0.000000e+00> : vector<8x96xf32>
    %5 = tpu.matmul %1, %4, %cst {dimension_numbers = #tpu.dot_dimension_numbers<[1], [0], [0], [1], [0, 0, 1, 1], [], []>} : vector<8x32xf32>, vector<32x96xf32>, vector<8x96xf32> -> vector<8x96xf32>
    %c0_7 = arith.constant 0 : index
    %c0_8 = arith.constant 0 : index
    %6 = vector.load %arg4[%c0_7, %c0_8] : memref<1x96xf32, #tpu.memory_space<vmem>>, vector<1x96xf32>
    %7 = vector.broadcast %6 : vector<1x96xf32> to vector<8x96xf32>
    %8 = arith.addf %5, %7 : vector<8x96xf32>
    %cst_9 = arith.constant 0.000000e+00 : f32
    %9 = vector.broadcast %cst_9 : f32 to vector<8x32xf32>
    %c0_10 = arith.constant 0 : index
    %c0_11 = arith.constant 0 : index
    %10 = vector.load %arg6[%c0_10, %c0_11] : memref<1x32xf32, #tpu.memory_space<vmem>>, vector<1x32xf32>
    %11 = vector.broadcast %10 : vector<1x32xf32> to vector<8x32xf32>
    %12 = arith.addf %9, %11 : vector<8x32xf32>
    %13 = vector.extract_strided_slice %8 {offsets = [0, 0], sizes = [8, 8], strides = [1, 1]} : vector<8x96xf32> to vector<8x8xf32>
    %14 = vector.extract_strided_slice %8 {offsets = [0, 32], sizes = [8, 8], strides = [1, 1]} : vector<8x96xf32> to vector<8x8xf32>
    %15 = vector.extract_strided_slice %8 {offsets = [0, 64], sizes = [8, 8], strides = [1, 1]} : vector<8x96xf32> to vector<8x8xf32>
    %cst_12 = arith.constant dense<0.000000e+00> : vector<8x8xf32>
    %16 = tpu.matmul %13, %14, %cst_12 {dimension_numbers = #tpu.dot_dimension_numbers<[1], [1], [0], [0], [0, 0, 1, 0], [], []>} : vector<8x8xf32>, vector<8x8xf32>, vector<8x8xf32> -> vector<8x8xf32>
    %cst_13 = arith.constant 0.353553385 : f32
    %17 = vector.broadcast %cst_13 : f32 to vector<8x8xf32>
    %18 = arith.mulf %16, %17 : vector<8x8xf32>
    %19 = vector.broadcast %3 : vector<1x8xf32> to vector<8x8xf32>
    %20 = arith.addf %18, %19 : vector<8x8xf32>
    %cst_14 = arith.constant dense<0xFF800000> : vector<8xf32>
    %21 = vector.multi_reduction <maximumf>, %20, %cst_14 [1] : vector<8x8xf32> to vector<8xf32>
    %22 = vector.shape_cast %21 : vector<8xf32> to vector<8x1xf32>
    %23 = vector.broadcast %22 : vector<8x1xf32> to vector<8x8xf32>
    %24 = arith.subf %20, %23 : vector<8x8xf32>
    %25 = math.exp %24 : vector<8x8xf32>
    %cst_15 = arith.constant dense<0.000000e+00> : vector<8xf32>
    %26 = vector.multi_reduction <add>, %25, %cst_15 [1] : vector<8x8xf32> to vector<8xf32>
    %27 = vector.shape_cast %26 : vector<8xf32> to vector<8x1xf32>
    %28 = tpu.reciprocal %27 {approx = true} : vector<8x1xf32> -> vector<8x1xf32>
    %29 = vector.broadcast %28 : vector<8x1xf32> to vector<8x8xf32>
    %30 = arith.mulf %25, %29 : vector<8x8xf32>
    %cst_16 = arith.constant dense<0.000000e+00> : vector<8x8xf32>
    %31 = tpu.matmul %30, %15, %cst_16 {dimension_numbers = #tpu.dot_dimension_numbers<[1], [0], [0], [1], [0, 0, 1, 1], [], []>} : vector<8x8xf32>, vector<8x8xf32>, vector<8x8xf32> -> vector<8x8xf32>
    %c0_17 = arith.constant 0 : index
    %c0_18 = arith.constant 0 : index
    %32 = vector.load %arg5[%c0_17, %c0_18] : memref<32x32xf32, #tpu.memory_space<vmem>>, vector<8x32xf32>
    %cst_19 = arith.constant dense<0.000000e+00> : vector<8x32xf32>
    %33 = tpu.matmul %31, %32, %cst_19 {dimension_numbers = #tpu.dot_dimension_numbers<[1], [0], [0], [1], [0, 0, 1, 1], [], []>} : vector<8x8xf32>, vector<8x32xf32>, vector<8x32xf32> -> vector<8x32xf32>
    %34 = arith.addf %12, %33 : vector<8x32xf32>
    %35 = vector.extract_strided_slice %8 {offsets = [0, 8], sizes = [8, 8], strides = [1, 1]} : vector<8x96xf32> to vector<8x8xf32>
    %36 = vector.extract_strided_slice %8 {offsets = [0, 40], sizes = [8, 8], strides = [1, 1]} : vector<8x96xf32> to vector<8x8xf32>
    %37 = vector.extract_strided_slice %8 {offsets = [0, 72], sizes = [8, 8], strides = [1, 1]} : vector<8x96xf32> to vector<8x8xf32>
    %cst_20 = arith.constant dense<0.000000e+00> : vector<8x8xf32>
    %38 = tpu.matmul %35, %36, %cst_20 {dimension_numbers = #tpu.dot_dimension_numbers<[1], [1], [0], [0], [0, 0, 1, 0], [], []>} : vector<8x8xf32>, vector<8x8xf32>, vector<8x8xf32> -> vector<8x8xf32>
    %cst_21 = arith.constant 0.353553385 : f32
    %39 = vector.broadcast %cst_21 : f32 to vector<8x8xf32>
    %40 = arith.mulf %38, %39 : vector<8x8xf32>
    %41 = vector.broadcast %3 : vector<1x8xf32> to vector<8x8xf32>
    %42 = arith.addf %40, %41 : vector<8x8xf32>
    %cst_22 = arith.constant dense<0xFF800000> : vector<8xf32>
    %43 = vector.multi_reduction <maximumf>, %42, %cst_22 [1] : vector<8x8xf32> to vector<8xf32>
    %44 = vector.shape_cast %43 : vector<8xf32> to vector<8x1xf32>
    %45 = vector.broadcast %44 : vector<8x1xf32> to vector<8x8xf32>
    %46 = arith.subf %42, %45 : vector<8x8xf32>
    %47 = math.exp %46 : vector<8x8xf32>
    %cst_23 = arith.constant dense<0.000000e+00> : vector<8xf32>
    %48 = vector.multi_reduction <add>, %47, %cst_23 [1] : vector<8x8xf32> to vector<8xf32>
    %49 = vector.shape_cast %48 : vector<8xf32> to vector<8x1xf32>
    %50 = tpu.reciprocal %49 {approx = true} : vector<8x1xf32> -> vector<8x1xf32>
    %51 = vector.broadcast %50 : vector<8x1xf32> to vector<8x8xf32>
    %52 = arith.mulf %47, %51 : vector<8x8xf32>
    %cst_24 = arith.constant dense<0.000000e+00> : vector<8x8xf32>
    %53 = tpu.matmul %52, %37, %cst_24 {dimension_numbers = #tpu.dot_dimension_numbers<[1], [0], [0], [1], [0, 0, 1, 1], [], []>} : vector<8x8xf32>, vector<8x8xf32>, vector<8x8xf32> -> vector<8x8xf32>
    %c8 = arith.constant 8 : index
    %c0_25 = arith.constant 0 : index
    %54 = vector.load %arg5[%c8, %c0_25] : memref<32x32xf32, #tpu.memory_space<vmem>>, vector<8x32xf32>
    %cst_26 = arith.constant dense<0.000000e+00> : vector<8x32xf32>
    %55 = tpu.matmul %53, %54, %cst_26 {dimension_numbers = #tpu.dot_dimension_numbers<[1], [0], [0], [1], [0, 0, 1, 1], [], []>} : vector<8x8xf32>, vector<8x32xf32>, vector<8x32xf32> -> vector<8x32xf32>
    %56 = arith.addf %34, %55 : vector<8x32xf32>
    %57 = vector.extract_strided_slice %8 {offsets = [0, 16], sizes = [8, 8], strides = [1, 1]} : vector<8x96xf32> to vector<8x8xf32>
    %58 = vector.extract_strided_slice %8 {offsets = [0, 48], sizes = [8, 8], strides = [1, 1]} : vector<8x96xf32> to vector<8x8xf32>
    %59 = vector.extract_strided_slice %8 {offsets = [0, 80], sizes = [8, 8], strides = [1, 1]} : vector<8x96xf32> to vector<8x8xf32>
    %cst_27 = arith.constant dense<0.000000e+00> : vector<8x8xf32>
    %60 = tpu.matmul %57, %58, %cst_27 {dimension_numbers = #tpu.dot_dimension_numbers<[1], [1], [0], [0], [0, 0, 1, 0], [], []>} : vector<8x8xf32>, vector<8x8xf32>, vector<8x8xf32> -> vector<8x8xf32>
    %cst_28 = arith.constant 0.353553385 : f32
    %61 = vector.broadcast %cst_28 : f32 to vector<8x8xf32>
    %62 = arith.mulf %60, %61 : vector<8x8xf32>
    %63 = vector.broadcast %3 : vector<1x8xf32> to vector<8x8xf32>
    %64 = arith.addf %62, %63 : vector<8x8xf32>
    %cst_29 = arith.constant dense<0xFF800000> : vector<8xf32>
    %65 = vector.multi_reduction <maximumf>, %64, %cst_29 [1] : vector<8x8xf32> to vector<8xf32>
    %66 = vector.shape_cast %65 : vector<8xf32> to vector<8x1xf32>
    %67 = vector.broadcast %66 : vector<8x1xf32> to vector<8x8xf32>
    %68 = arith.subf %64, %67 : vector<8x8xf32>
    %69 = math.exp %68 : vector<8x8xf32>
    %cst_30 = arith.constant dense<0.000000e+00> : vector<8xf32>
    %70 = vector.multi_reduction <add>, %69, %cst_30 [1] : vector<8x8xf32> to vector<8xf32>
    %71 = vector.shape_cast %70 : vector<8xf32> to vector<8x1xf32>
    %72 = tpu.reciprocal %71 {approx = true} : vector<8x1xf32> -> vector<8x1xf32>
    %73 = vector.broadcast %72 : vector<8x1xf32> to vector<8x8xf32>
    %74 = arith.mulf %69, %73 : vector<8x8xf32>
    %cst_31 = arith.constant dense<0.000000e+00> : vector<8x8xf32>
    %75 = tpu.matmul %74, %59, %cst_31 {dimension_numbers = #tpu.dot_dimension_numbers<[1], [0], [0], [1], [0, 0, 1, 1], [], []>} : vector<8x8xf32>, vector<8x8xf32>, vector<8x8xf32> -> vector<8x8xf32>
    %c16 = arith.constant 16 : index
    %c0_32 = arith.constant 0 : index
    %76 = vector.load %arg5[%c16, %c0_32] : memref<32x32xf32, #tpu.memory_space<vmem>>, vector<8x32xf32>
    %cst_33 = arith.constant dense<0.000000e+00> : vector<8x32xf32>
    %77 = tpu.matmul %75, %76, %cst_33 {dimension_numbers = #tpu.dot_dimension_numbers<[1], [0], [0], [1], [0, 0, 1, 1], [], []>} : vector<8x8xf32>, vector<8x32xf32>, vector<8x32xf32> -> vector<8x32xf32>
    %78 = arith.addf %56, %77 : vector<8x32xf32>
    %79 = vector.extract_strided_slice %8 {offsets = [0, 24], sizes = [8, 8], strides = [1, 1]} : vector<8x96xf32> to vector<8x8xf32>
    %80 = vector.extract_strided_slice %8 {offsets = [0, 56], sizes = [8, 8], strides = [1, 1]} : vector<8x96xf32> to vector<8x8xf32>
    %81 = vector.extract_strided_slice %8 {offsets = [0, 88], sizes = [8, 8], strides = [1, 1]} : vector<8x96xf32> to vector<8x8xf32>
    %cst_34 = arith.constant dense<0.000000e+00> : vector<8x8xf32>
    %82 = tpu.matmul %79, %80, %cst_34 {dimension_numbers = #tpu.dot_dimension_numbers<[1], [1], [0], [0], [0, 0, 1, 0], [], []>} : vector<8x8xf32>, vector<8x8xf32>, vector<8x8xf32> -> vector<8x8xf32>
    %cst_35 = arith.constant 0.353553385 : f32
    %83 = vector.broadcast %cst_35 : f32 to vector<8x8xf32>
    %84 = arith.mulf %82, %83 : vector<8x8xf32>
    %85 = vector.broadcast %3 : vector<1x8xf32> to vector<8x8xf32>
    %86 = arith.addf %84, %85 : vector<8x8xf32>
    %cst_36 = arith.constant dense<0xFF800000> : vector<8xf32>
    %87 = vector.multi_reduction <maximumf>, %86, %cst_36 [1] : vector<8x8xf32> to vector<8xf32>
    %88 = vector.shape_cast %87 : vector<8xf32> to vector<8x1xf32>
    %89 = vector.broadcast %88 : vector<8x1xf32> to vector<8x8xf32>
    %90 = arith.subf %86, %89 : vector<8x8xf32>
    %91 = math.exp %90 : vector<8x8xf32>
    %cst_37 = arith.constant dense<0.000000e+00> : vector<8xf32>
    %92 = vector.multi_reduction <add>, %91, %cst_37 [1] : vector<8x8xf32> to vector<8xf32>
    %93 = vector.shape_cast %92 : vector<8xf32> to vector<8x1xf32>
    %94 = tpu.reciprocal %93 {approx = true} : vector<8x1xf32> -> vector<8x1xf32>
    %95 = vector.broadcast %94 : vector<8x1xf32> to vector<8x8xf32>
    %96 = arith.mulf %91, %95 : vector<8x8xf32>
    %cst_38 = arith.constant dense<0.000000e+00> : vector<8x8xf32>
    %97 = tpu.matmul %96, %81, %cst_38 {dimension_numbers = #tpu.dot_dimension_numbers<[1], [0], [0], [1], [0, 0, 1, 1], [], []>} : vector<8x8xf32>, vector<8x8xf32>, vector<8x8xf32> -> vector<8x8xf32>
    %c24 = arith.constant 24 : index
    %c0_39 = arith.constant 0 : index
    %98 = vector.load %arg5[%c24, %c0_39] : memref<32x32xf32, #tpu.memory_space<vmem>>, vector<8x32xf32>
    %cst_40 = arith.constant dense<0.000000e+00> : vector<8x32xf32>
    %99 = tpu.matmul %97, %98, %cst_40 {dimension_numbers = #tpu.dot_dimension_numbers<[1], [0], [0], [1], [0, 0, 1, 1], [], []>} : vector<8x8xf32>, vector<8x32xf32>, vector<8x32xf32> -> vector<8x32xf32>
    %100 = arith.addf %78, %99 : vector<8x32xf32>
    %101 = arith.addf %100, %1 : vector<8x32xf32>
    %cst_41 = arith.constant dense<0.000000e+00> : vector<8xf32>
    %102 = vector.multi_reduction <add>, %101, %cst_41 [1] : vector<8x32xf32> to vector<8xf32>
    %103 = vector.shape_cast %102 : vector<8xf32> to vector<8x1xf32>
    %cst_42 = arith.constant 3.200000e+01 : f32
    %104 = vector.broadcast %cst_42 : f32 to vector<8x1xf32>
    %105 = arith.divf %103, %104 : vector<8x1xf32>
    %106 = vector.broadcast %105 : vector<8x1xf32> to vector<8x32xf32>
    %107 = arith.subf %101, %106 : vector<8x32xf32>
    %108 = arith.mulf %107, %107 : vector<8x32xf32>
    %cst_43 = arith.constant dense<0.000000e+00> : vector<8xf32>
    %109 = vector.multi_reduction <add>, %108, %cst_43 [1] : vector<8x32xf32> to vector<8xf32>
    %110 = vector.shape_cast %109 : vector<8xf32> to vector<8x1xf32>
    %cst_44 = arith.constant 3.200000e+01 : f32
    %111 = vector.broadcast %cst_44 : f32 to vector<8x1xf32>
    %112 = arith.divf %110, %111 : vector<8x1xf32>
    %113 = vector.broadcast %105 : vector<8x1xf32> to vector<8x32xf32>
    %114 = arith.subf %101, %113 : vector<8x32xf32>
    %cst_45 = arith.constant 9.99999996E-13 : f32
    %115 = vector.broadcast %cst_45 : f32 to vector<8x1xf32>
    %116 = arith.addf %112, %115 : vector<8x1xf32>
    %117 = math.rsqrt %116 : vector<8x1xf32>
    %118 = vector.broadcast %117 : vector<8x1xf32> to vector<8x32xf32>
    %119 = arith.mulf %114, %118 : vector<8x32xf32>
    %c0_46 = arith.constant 0 : index
    %c0_47 = arith.constant 0 : index
    %120 = vector.load %arg7[%c0_46, %c0_47] : memref<1x32xf32, #tpu.memory_space<vmem>>, vector<1x32xf32>
    %121 = vector.broadcast %120 : vector<1x32xf32> to vector<8x32xf32>
    %122 = arith.mulf %119, %121 : vector<8x32xf32>
    %c0_48 = arith.constant 0 : index
    %c0_49 = arith.constant 0 : index
    %123 = vector.load %arg8[%c0_48, %c0_49] : memref<1x32xf32, #tpu.memory_space<vmem>>, vector<1x32xf32>
    %124 = vector.broadcast %123 : vector<1x32xf32> to vector<8x32xf32>
    %125 = arith.addf %122, %124 : vector<8x32xf32>
    %c0_50 = arith.constant 0 : index
    %c0_51 = arith.constant 0 : index
    %126 = vector.load %arg9[%c0_50, %c0_51] : memref<32x64xf32, #tpu.memory_space<vmem>>, vector<32x64xf32>
    %cst_52 = arith.constant dense<0.000000e+00> : vector<8x64xf32>
    %127 = tpu.matmul %125, %126, %cst_52 {dimension_numbers = #tpu.dot_dimension_numbers<[1], [0], [0], [1], [0, 0, 1, 1], [], []>} : vector<8x32xf32>, vector<32x64xf32>, vector<8x64xf32> -> vector<8x64xf32>
    %c0_53 = arith.constant 0 : index
    %c0_54 = arith.constant 0 : index
    %128 = vector.load %arg10[%c0_53, %c0_54] : memref<1x64xf32, #tpu.memory_space<vmem>>, vector<1x64xf32>
    %129 = vector.broadcast %128 : vector<1x64xf32> to vector<8x64xf32>
    %130 = arith.addf %127, %129 : vector<8x64xf32>
    %cst_55 = arith.constant 5.000000e-01 : f32
    %131 = vector.broadcast %cst_55 : f32 to vector<8x64xf32>
    %132 = arith.mulf %130, %131 : vector<8x64xf32>
    %cst_56 = arith.constant 0.707106769 : f32
    %133 = vector.broadcast %cst_56 : f32 to vector<8x64xf32>
    %134 = arith.mulf %130, %133 : vector<8x64xf32>
    %135 = math.erf %134 : vector<8x64xf32>
    %cst_57 = arith.constant 1.000000e+00 : f32
    %136 = vector.broadcast %cst_57 : f32 to vector<8x64xf32>
    %137 = arith.addf %136, %135 : vector<8x64xf32>
    %138 = arith.mulf %132, %137 : vector<8x64xf32>
    %c0_58 = arith.constant 0 : index
    %c0_59 = arith.constant 0 : index
    %139 = vector.load %arg11[%c0_58, %c0_59] : memref<64x32xf32, #tpu.memory_space<vmem>>, vector<64x32xf32>
    %cst_60 = arith.constant dense<0.000000e+00> : vector<8x32xf32>
    %140 = tpu.matmul %138, %139, %cst_60 {dimension_numbers = #tpu.dot_dimension_numbers<[1], [0], [0], [1], [0, 0, 1, 1], [], []>} : vector<8x64xf32>, vector<64x32xf32>, vector<8x32xf32> -> vector<8x32xf32>
    %c0_61 = arith.constant 0 : index
    %c0_62 = arith.constant 0 : index
    %141 = vector.load %arg12[%c0_61, %c0_62] : memref<1x32xf32, #tpu.memory_space<vmem>>, vector<1x32xf32>
    %142 = vector.broadcast %141 : vector<1x32xf32> to vector<8x32xf32>
    %143 = arith.addf %140, %142 : vector<8x32xf32>
    %144 = arith.addf %143, %125 : vector<8x32xf32>
    %cst_63 = arith.constant dense<0.000000e+00> : vector<8xf32>
    %145 = vector.multi_reduction <add>, %144, %cst_63 [1] : vector<8x32xf32> to vector<8xf32>
    %146 = vector.shape_cast %145 : vector<8xf32> to vector<8x1xf32>
    %cst_64 = arith.constant 3.200000e+01 : f32
    %147 = vector.broadcast %cst_64 : f32 to vector<8x1xf32>
    %148 = arith.divf %146, %147 : vector<8x1xf32>
    %149 = vector.broadcast %148 : vector<8x1xf32> to vector<8x32xf32>
    %150 = arith.subf %144, %149 : vector<8x32xf32>
    %151 = arith.mulf %150, %150 : vector<8x32xf32>
    %cst_65 = arith.constant dense<0.000000e+00> : vector<8xf32>
    %152 = vector.multi_reduction <add>, %151, %cst_65 [1] : vector<8x32xf32> to vector<8xf32>
    %153 = vector.shape_cast %152 : vector<8xf32> to vector<8x1xf32>
    %cst_66 = arith.constant 3.200000e+01 : f32
    %154 = vector.broadcast %cst_66 : f32 to vector<8x1xf32>
    %155 = arith.divf %153, %154 : vector<8x1xf32>
    %156 = vector.broadcast %148 : vector<8x1xf32> to vector<8x32xf32>
    %157 = arith.subf %144, %156 : vector<8x32xf32>
    %cst_67 = arith.constant 9.99999996E-13 : f32
    %158 = vector.broadcast %cst_67 : f32 to vector<8x1xf32>
    %159 = arith.addf %155, %158 : vector<8x1xf32>
    %160 = math.rsqrt %159 : vector<8x1xf32>
    %161 = vector.broadcast %160 : vector<8x1xf32> to vector<8x32xf32>
    %162 = arith.mulf %157, %161 : vector<8x32xf32>
    %c0_68 = arith.constant 0 : index
    %c0_69 = arith.constant 0 : index
    %163 = vector.load %arg13[%c0_68, %c0_69] : memref<1x32xf32, #tpu.memory_space<vmem>>, vector<1x32xf32>
    %164 = vector.broadcast %163 : vector<1x32xf32> to vector<8x32xf32>
    %165 = arith.mulf %162, %164 : vector<8x32xf32>
    %c0_70 = arith.constant 0 : index
    %c0_71 = arith.constant 0 : index
    %166 = vector.load %arg14[%c0_70, %c0_71] : memref<1x32xf32, #tpu.memory_space<vmem>>, vector<1x32xf32>
    %167 = vector.broadcast %166 : vector<1x32xf32> to vector<8x32xf32>
    %168 = arith.addf %165, %167 : vector<8x32xf32>
    %c0_72 = arith.constant 0 : index
    %c0_73 = arith.constant 0 : index
    %c0_74 = arith.constant 0 : index
    %169 = vector.load %arg15[%c0_72, %c0_73, %c0_74] : memref<1x8x32xf32, #tpu.memory_space<vmem>>, vector<1x8x32xf32>
    %170 = vector.shape_cast %169 : vector<1x8x32xf32> to vector<8x32xf32>
    %171 = vector.shape_cast %168 : vector<8x32xf32> to vector<1x8x32xf32>
    tpu.vector_store %arg15[%c0_72, %c0_73, %c0_74], %171 {strides = array<i32>} : memref<1x8x32xf32, #tpu.memory_space<vmem>>, vector<1x8x32xf32>,
    return
  }
  func.func @transform_0(%arg0: i32) -> (i32, i32, i32) {
    %c0_i32 = arith.constant 0 : i32
    %c0_i32_0 = arith.constant 0 : i32
    %c0_i32_1 = arith.constant 0 : i32
    return %arg0, %c0_i32, %c0_i32_0 : i32, i32, i32
  }
  func.func @transform_1(%arg0: i32) -> (i32, i32, i32) {
    %c0_i32 = arith.constant 0 : i32
    %c0_i32_0 = arith.constant 0 : i32
    %c0_i32_1 = arith.constant 0 : i32
    return %arg0, %c0_i32, %c0_i32_0 : i32, i32, i32
  }
  func.func @transform_2(%arg0: i32) -> (i32, i32) {
    %c0_i32 = arith.constant 0 : i32
    %c0_i32_0 = arith.constant 0 : i32
    %c0_i32_1 = arith.constant 0 : i32
    return %c0_i32, %c0_i32_0 : i32, i32
  }
  func.func @transform_3(%arg0: i32) -> (i32, i32) {
    %c0_i32 = arith.constant 0 : i32
    %c0_i32_0 = arith.constant 0 : i32
    %c0_i32_1 = arith.constant 0 : i32
    return %c0_i32, %c0_i32_0 : i32, i32
  }
  func.func @transform_4(%arg0: i32) -> (i32, i32) {
    %c0_i32 = arith.constant 0 : i32
    %c0_i32_0 = arith.constant 0 : i32
    %c0_i32_1 = arith.constant 0 : i32
    return %c0_i32, %c0_i32_0 : i32, i32
  }
  func.func @transform_5(%arg0: i32) -> (i32, i32) {
    %c0_i32 = arith.constant 0 : i32
    %c0_i32_0 = arith.constant 0 : i32
    %c0_i32_1 = arith.constant 0 : i32
    return %c0_i32, %c0_i32_0 : i32, i32
  }
  func.func @transform_6(%arg0: i32) -> (i32, i32) {
    %c0_i32 = arith.constant 0 : i32
    %c0_i32_0 = arith.constant 0 : i32
    %c0_i32_1 = arith.constant 0 : i32
    return %c0_i32, %c0_i32_0 : i32, i32
  }
  func.func @transform_7(%arg0: i32) -> (i32, i32) {
    %c0_i32 = arith.constant 0 : i32
    %c0_i32_0 = arith.constant 0 : i32
    %c0_i32_1 = arith.constant 0 : i32
    return %c0_i32, %c0_i32_0 : i32, i32
  }
  func.func @transform_8(%arg0: i32) -> (i32, i32) {
    %c0_i32 = arith.constant 0 : i32
    %c0_i32_0 = arith.constant 0 : i32
    %c0_i32_1 = arith.constant 0 : i32
    return %c0_i32, %c0_i32_0 : i32, i32
  }
  func.func @transform_9(%arg0: i32) -> (i32, i32) {
    %c0_i32 = arith.constant 0 : i32
    %c0_i32_0 = arith.constant 0 : i32
    %c0_i32_1 = arith.constant 0 : i32
    return %c0_i32, %c0_i32_0 : i32, i32
  }
  func.func @transform_10(%arg0: i32) -> (i32, i32) {
    %c0_i32 = arith.constant 0 : i32
    %c0_i32_0 = arith.constant 0 : i32
    %c0_i32_1 = arith.constant 0 : i32
    return %c0_i32, %c0_i32_0 : i32, i32
  }
  func.func @transform_11(%arg0: i32) -> (i32, i32) {
    %c0_i32 = arith.constant 0 : i32
    %c0_i32_0 = arith.constant 0 : i32
    %c0_i32_1 = arith.constant 0 : i32
    return %c0_i32, %c0_i32_0 : i32, i32
  }
  func.func @transform_12(%arg0: i32) -> (i32, i32) {
    %c0_i32 = arith.constant 0 : i32
    %c0_i32_0 = arith.constant 0 : i32
    %c0_i32_1 = arith.constant 0 : i32
    return %c0_i32, %c0_i32_0 : i32, i32
  }
  func.func @transform_13(%arg0: i32) -> (i32, i32) {
    %c0_i32 = arith.constant 0 : i32
    %c0_i32_0 = arith.constant 0 : i32
    %c0_i32_1 = arith.constant 0 : i32
    return %c0_i32, %c0_i32_0 : i32, i32
  }
  func.func @transform_14(%arg0: i32) -> (i32, i32, i32) {
    %c0_i32 = arith.constant 0 : i32
    %c0_i32_0 = arith.constant 0 : i32
    %c0_i32_1 = arith.constant 0 : i32
    return %arg0, %c0_i32, %c0_i32_0 : i32, i32, i32
  }
}

module attributes {stable_mosaic.version = 11 : i64} {
  func.func @_bert_layer_kernel(%arg0: i32, %arg1: memref<1x8x32xf32, #tpu.memory_space<vmem>>, %arg2: memref<1x1x8xf32, #tpu.memory_space<vmem>>, %arg3: memref<32x96xf32, #tpu.memory_space<vmem>>, %arg4: memref<1x96xf32, #tpu.memory_space<vmem>>, %arg5: memref<32x32xf32, #tpu.memory_space<vmem>>, %arg6: memref<1x32xf32, #tpu.memory_space<vmem>>, %arg7: memref<1x32xf32, #tpu.memory_space<vmem>>, %arg8: memref<1x32xf32, #tpu.memory_space<vmem>>, %arg9: memref<32x64xf32, #tpu.memory_space<vmem>>, %arg10: memref<1x64xf32, #tpu.memory_space<vmem>>, %arg11: memref<64x32xf32, #tpu.memory_space<vmem>>, %arg12: memref<1x32xf32, #tpu.memory_space<vmem>>, %arg13: memref<1x32xf32, #tpu.memory_space<vmem>>, %arg14: memref<1x32xf32, #tpu.memory_space<vmem>>, %arg15: memref<1x8x32xf32, #tpu.memory_space<vmem>>) attributes {dimension_semantics = [#tpu.dimension_semantics<parallel>], iteration_bounds = array<i64: 2>, scalar_prefetch = 0 : i64, scratch_operands = 0 : i64, tpu.core_type = #tpu.core_type<tc>, window_params = [{transform_indices = @transform_0, window_bounds = array<i64: 1, 8, 32>}, {transform_indices = @transform_1, window_bounds = array<i64: 1, 1, 8>}, {pipeline_mode = #tpu.pipeline_mode<synchronous>, transform_indices = @transform_2, window_bounds = array<i64: 32, 96>}, {pipeline_mode = #tpu.pipeline_mode<synchronous>, transform_indices = @transform_3, window_bounds = array<i64: 1, 96>}, {pipeline_mode = #tpu.pipeline_mode<synchronous>, transform_indices = @transform_4, window_bounds = array<i64: 32, 32>}, {pipeline_mode = #tpu.pipeline_mode<synchronous>, transform_indices = @transform_5, window_bounds = array<i64: 1, 32>}, {pipeline_mode = #tpu.pipeline_mode<synchronous>, transform_indices = @transform_6, window_bounds = array<i64: 1, 32>}, {pipeline_mode = #tpu.pipeline_mode<synchronous>, transform_indices = @transform_7, window_bounds = array<i64: 1, 32>}, {pipeline_mode = #tpu.pipeline_mode<synchronous>, transform_indices = @transform_8, window_bounds = array<i64: 32, 64>}, {pipeline_mode = #tpu.pipeline_mode<synchronous>, transform_indices = @transform_9, window_bounds = array<i64: 1, 64>}, {pipeline_mode = #tpu.pipeline_mode<synchronous>, transform_indices = @transform_10, window_bounds = array<i64: 64, 32>}, {pipeline_mode = #tpu.pipeline_mode<synchronous>, transform_indices = @transform_11, window_bounds = array<i64: 1, 32>}, {pipeline_mode = #tpu.pipeline_mode<synchronous>, transform_indices = @transform_12, window_bounds = array<i64: 1, 32>}, {pipeline_mode = #tpu.pipeline_mode<synchronous>, transform_indices = @transform_13, window_bounds = array<i64: 1, 32>}, {transform_indices = @transform_14, window_bounds = array<i64: 1, 8, 32>}]} {
    %c0 = arith.constant 0 : index
    %c0_0 = arith.constant 0 : index
    %c0_1 = arith.constant 0 : index
    %0 = vector.load %arg1[%c0, %c0_0, %c0_1] : memref<1x8x32xf32, #tpu.memory_space<vmem>>, vector<1x8x32xf32>
    %1 = vector.shape_cast %0 : vector<1x8x32xf32> to vector<8x32xf32>
    %c0_2 = arith.constant 0 : index
    %c0_3 = arith.constant 0 : index
    %c0_4 = arith.constant 0 : index
    %2 = vector.load %arg2[%c0_2, %c0_3, %c0_4] : memref<1x1x8xf32, #tpu.memory_space<vmem>>, vector<1x1x8xf32>
    %3 = vector.shape_cast %2 : vector<1x1x8xf32> to vector<1x8xf32>
    %c0_5 = arith.constant 0 : index
    %c0_6 = arith.constant 0 : index
    %4 = vector.load %arg3[%c0_5, %c0_6] : memref<32x96xf32, #tpu.memory_space<vmem>>, vector<32x96xf32>
    %cst = arith.constant dense<0.000000e+00> : vector<8x96xf32>
    %5 = tpu.matmul %1, %4, %cst {dimension_numbers = #tpu.dot_dimension_numbers<[1], [0], [0], [1], [0, 0, 1, 1], [], []>} : vector<8x32xf32>, vector<32x96xf32>, vector<8x96xf32> -> vector<8x96xf32>
    %c0_7 = arith.constant 0 : index
    %c0_8 = arith.constant 0 : index
    %6 = vector.load %arg4[%c0_7, %c0_8] : memref<1x96xf32, #tpu.memory_space<vmem>>, vector<1x96xf32>
    %7 = vector.broadcast %6 : vector<1x96xf32> to vector<8x96xf32>
    %8 = arith.addf %5, %7 : vector<8x96xf32>
    %cst_9 = arith.constant 0.000000e+00 : f32
    %9 = vector.broadcast %cst_9 : f32 to vector<8x32xf32>
    %c0_10 = arith.constant 0 : index
    %c0_11 = arith.constant 0 : index
    %10 = vector.load %arg6[%c0_10, %c0_11] : memref<1x32xf32, #tpu.memory_space<vmem>>, vector<1x32xf32>
    %11 = vector.broadcast %10 : vector<1x32xf32> to vector<8x32xf32>
    %12 = arith.addf %9, %11 : vector<8x32xf32>
    %13 = vector.extract_strided_slice %8 {offsets = [0, 0], sizes = [8, 8], strides = [1, 1]} : vector<8x96xf32> to vector<8x8xf32>
    %14 = vector.extract_strided_slice %8 {offsets = [0, 32], sizes = [8, 8], strides = [1, 1]} : vector<8x96xf32> to vector<8x8xf32>
    %15 = vector.extract_strided_slice %8 {offsets = [0, 64], sizes = [8, 8], strides = [1, 1]} : vector<8x96xf32> to vector<8x8xf32>
    %cst_12 = arith.constant dense<0.000000e+00> : vector<8x8xf32>
    %16 = tpu.matmul %13, %14, %cst_12 {dimension_numbers = #tpu.dot_dimension_numbers<[1], [1], [0], [0], [0, 0, 1, 0], [], []>} : vector<8x8xf32>, vector<8x8xf32>, vector<8x8xf32> -> vector<8x8xf32>
    %cst_13 = arith.constant 0.353553385 : f32
    %17 = vector.broadcast %cst_13 : f32 to vector<8x8xf32>
    %18 = arith.mulf %16, %17 : vector<8x8xf32>
    %19 = vector.broadcast %3 : vector<1x8xf32> to vector<8x8xf32>
    %20 = arith.addf %18, %19 : vector<8x8xf32>
    %cst_14 = arith.constant dense<0xFF800000> : vector<8xf32>
    %21 = vector.multi_reduction <maximumf>, %20, %cst_14 [1] : vector<8x8xf32> to vector<8xf32>
    %22 = vector.shape_cast %21 : vector<8xf32> to vector<8x1xf32>
    %23 = vector.broadcast %22 : vector<8x1xf32> to vector<8x8xf32>
    %24 = arith.subf %20, %23 : vector<8x8xf32>
    %25 = math.exp %24 : vector<8x8xf32>
    %cst_15 = arith.constant dense<0.000000e+00> : vector<8xf32>
    %26 = vector.multi_reduction <add>, %25, %cst_15 [1] : vector<8x8xf32> to vector<8xf32>
    %27 = vector.shape_cast %26 : vector<8xf32> to vector<8x1xf32>
    %28 = tpu.reciprocal %27 {approx = true} : vector<8x1xf32> -> vector<8x1xf32>
    %29 = vector.broadcast %28 : vector<8x1xf32> to vector<8x8xf32>
    %30 = arith.mulf %25, %29 : vector<8x8xf32>
    %cst_16 = arith.constant dense<0.000000e+00> : vector<8x8xf32>
    %31 = tpu.matmul %30, %15, %cst_16 {dimension_numbers = #tpu.dot_dimension_numbers<[1], [0], [0], [1], [0, 0, 1, 1], [], []>} : vector<8x8xf32>, vector<8x8xf32>, vector<8x8xf32> -> vector<8x8xf32>
    %c0_17 = arith.constant 0 : index
    %c0_18 = arith.constant 0 : index
    %32 = vector.load %arg5[%c0_17, %c0_18] : memref<32x32xf32, #tpu.memory_space<vmem>>, vector<8x32xf32>
    %cst_19 = arith.constant dense<0.000000e+00> : vector<8x32xf32>
    %33 = tpu.matmul %31, %32, %cst_19 {dimension_numbers = #tpu.dot_dimension_numbers<[1], [0], [0], [1], [0, 0, 1, 1], [], []>} : vector<8x8xf32>, vector<8x32xf32>, vector<8x32xf32> -> vector<8x32xf32>
    %34 = arith.addf %12, %33 : vector<8x32xf32>
    %35 = vector.extract_strided_slice %8 {offsets = [0, 8], sizes = [8, 8], strides = [1, 1]} : vector<8x96xf32> to vector<8x8xf32>
    %36 = vector.extract_strided_slice %8 {offsets = [0, 40], sizes = [8, 8], strides = [1, 1]} : vector<8x96xf32> to vector<8x8xf32>
    %37 = vector.extract_strided_slice %8 {offsets = [0, 72], sizes = [8, 8], strides = [1, 1]} : vector<8x96xf32> to vector<8x8xf32>
    %cst_20 = arith.constant dense<0.000000e+00> : vector<8x8xf32>
    %38 = tpu.matmul %35, %36, %cst_20 {dimension_numbers = #tpu.dot_dimension_numbers<[1], [1], [0], [0], [0, 0, 1, 0], [], []>} : vector<8x8xf32>, vector<8x8xf32>, vector<8x8xf32> -> vector<8x8xf32>
    %cst_21 = arith.constant 0.353553385 : f32
    %39 = vector.broadcast %cst_21 : f32 to vector<8x8xf32>
    %40 = arith.mulf %38, %39 : vector<8x8xf32>
    %41 = vector.broadcast %3 : vector<1x8xf32> to vector<8x8xf32>
    %42 = arith.addf %40, %41 : vector<8x8xf32>
    %cst_22 = arith.constant dense<0xFF800000> : vector<8xf32>
    %43 = vector.multi_reduction <maximumf>, %42, %cst_22 [1] : vector<8x8xf32> to vector<8xf32>
    %44 = vector.shape_cast %43 : vector<8xf32> to vector<8x1xf32>
    %45 = vector.broadcast %44 : vector<8x1xf32> to vector<8x8xf32>
    %46 = arith.subf %42, %45 : vector<8x8xf32>
    %47 = math.exp %46 : vector<8x8xf32>
    %cst_23 = arith.constant dense<0.000000e+00> : vector<8xf32>
    %48 = vector.multi_reduction <add>, %47, %cst_23 [1] : vector<8x8xf32> to vector<8xf32>
    %49 = vector.shape_cast %48 : vector<8xf32> to vector<8x1xf32>
    %50 = tpu.reciprocal %49 {approx = true} : vector<8x1xf32> -> vector<8x1xf32>
    %51 = vector.broadcast %50 : vector<8x1xf32> to vector<8x8xf32>
    %52 = arith.mulf %47, %51 : vector<8x8xf32>
    %cst_24 = arith.constant dense<0.000000e+00> : vector<8x8xf32>
    %53 = tpu.matmul %52, %37, %cst_24 {dimension_numbers = #tpu.dot_dimension_numbers<[1], [0], [0], [1], [0, 0, 1, 1], [], []>} : vector<8x8xf32>, vector<8x8xf32>, vector<8x8xf32> -> vector<8x8xf32>
    %c8 = arith.constant 8 : index
    %c0_25 = arith.constant 0 : index
    %54 = vector.load %arg5[%c8, %c0_25] : memref<32x32xf32, #tpu.memory_space<vmem>>, vector<8x32xf32>
    %cst_26 = arith.constant dense<0.000000e+00> : vector<8x32xf32>
    %55 = tpu.matmul %53, %54, %cst_26 {dimension_numbers = #tpu.dot_dimension_numbers<[1], [0], [0], [1], [0, 0, 1, 1], [], []>} : vector<8x8xf32>, vector<8x32xf32>, vector<8x32xf32> -> vector<8x32xf32>
    %56 = arith.addf %34, %55 : vector<8x32xf32>
    %57 = vector.extract_strided_slice %8 {offsets = [0, 16], sizes = [8, 8], strides = [1, 1]} : vector<8x96xf32> to vector<8x8xf32>
    %58 = vector.extract_strided_slice %8 {offsets = [0, 48], sizes = [8, 8], strides = [1, 1]} : vector<8x96xf32> to vector<8x8xf32>
    %59 = vector.extract_strided_slice %8 {offsets = [0, 80], sizes = [8, 8], strides = [1, 1]} : vector<8x96xf32> to vector<8x8xf32>
    %cst_27 = arith.constant dense<0.000000e+00> : vector<8x8xf32>
    %60 = tpu.matmul %57, %58, %cst_27 {dimension_numbers = #tpu.dot_dimension_numbers<[1], [1], [0], [0], [0, 0, 1, 0], [], []>} : vector<8x8xf32>, vector<8x8xf32>, vector<8x8xf32> -> vector<8x8xf32>
    %cst_28 = arith.constant 0.353553385 : f32
    %61 = vector.broadcast %cst_28 : f32 to vector<8x8xf32>
    %62 = arith.mulf %60, %61 : vector<8x8xf32>
    %63 = vector.broadcast %3 : vector<1x8xf32> to vector<8x8xf32>
    %64 = arith.addf %62, %63 : vector<8x8xf32>
    %cst_29 = arith.constant dense<0xFF800000> : vector<8xf32>
    %65 = vector.multi_reduction <maximumf>, %64, %cst_29 [1] : vector<8x8xf32> to vector<8xf32>
    %66 = vector.shape_cast %65 : vector<8xf32> to vector<8x1xf32>
    %67 = vector.broadcast %66 : vector<8x1xf32> to vector<8x8xf32>
    %68 = arith.subf %64, %67 : vector<8x8xf32>
    %69 = math.exp %68 : vector<8x8xf32>
    %cst_30 = arith.constant dense<0.000000e+00> : vector<8xf32>
    %70 = vector.multi_reduction <add>, %69, %cst_30 [1] : vector<8x8xf32> to vector<8xf32>
    %71 = vector.shape_cast %70 : vector<8xf32> to vector<8x1xf32>
    %72 = tpu.reciprocal %71 {approx = true} : vector<8x1xf32> -> vector<8x1xf32>
    %73 = vector.broadcast %72 : vector<8x1xf32> to vector<8x8xf32>
    %74 = arith.mulf %69, %73 : vector<8x8xf32>
    %cst_31 = arith.constant dense<0.000000e+00> : vector<8x8xf32>
    %75 = tpu.matmul %74, %59, %cst_31 {dimension_numbers = #tpu.dot_dimension_numbers<[1], [0], [0], [1], [0, 0, 1, 1], [], []>} : vector<8x8xf32>, vector<8x8xf32>, vector<8x8xf32> -> vector<8x8xf32>
    %c16 = arith.constant 16 : index
    %c0_32 = arith.constant 0 : index
    %76 = vector.load %arg5[%c16, %c0_32] : memref<32x32xf32, #tpu.memory_space<vmem>>, vector<8x32xf32>
    %cst_33 = arith.constant dense<0.000000e+00> : vector<8x32xf32>
    %77 = tpu.matmul %75, %76, %cst_33 {dimension_numbers = #tpu.dot_dimension_numbers<[1], [0], [0], [1], [0, 0, 1, 1], [], []>} : vector<8x8xf32>, vector<8x32xf32>, vector<8x32xf32> -> vector<8x32xf32>
    %78 = arith.addf %56, %77 : vector<8x32xf32>
    %79 = vector.extract_strided_slice %8 {offsets = [0, 24], sizes = [8, 8], strides = [1, 1]} : vector<8x96xf32> to vector<8x8xf32>
    %80 = vector.extract_strided_slice %8 {offsets = [0, 56], sizes = [8, 8], strides = [1, 1]} : vector<8x96xf32> to vector<8x8xf32>
    %81 = vector.extract_strided_slice %8 {offsets = [0, 88], sizes = [8, 8], strides = [1, 1]} : vector<8x96xf32> to vector<8x8xf32>
    %cst_34 = arith.constant dense<0.000000e+00> : vector<8x8xf32>
    %82 = tpu.matmul %79, %80, %cst_34 {dimension_numbers = #tpu.dot_dimension_numbers<[1], [1], [0], [0], [0, 0, 1, 0], [], []>} : vector<8x8xf32>, vector<8x8xf32>, vector<8x8xf32> -> vector<8x8xf32>
    %cst_35 = arith.constant 0.353553385 : f32
    %83 = vector.broadcast %cst_35 : f32 to vector<8x8xf32>
    %84 = arith.mulf %82, %83 : vector<8x8xf32>
    %85 = vector.broadcast %3 : vector<1x8xf32> to vector<8x8xf32>
    %86 = arith.addf %84, %85 : vector<8x8xf32>
    %cst_36 = arith.constant dense<0xFF800000> : vector<8xf32>
    %87 = vector.multi_reduction <maximumf>, %86, %cst_36 [1] : vector<8x8xf32> to vector<8xf32>
    %88 = vector.shape_cast %87 : vector<8xf32> to vector<8x1xf32>
    %89 = vector.broadcast %88 : vector<8x1xf32> to vector<8x8xf32>
    %90 = arith.subf %86, %89 : vector<8x8xf32>
    %91 = math.exp %90 : vector<8x8xf32>
    %cst_37 = arith.constant dense<0.000000e+00> : vector<8xf32>
    %92 = vector.multi_reduction <add>, %91, %cst_37 [1] : vector<8x8xf32> to vector<8xf32>
    %93 = vector.shape_cast %92 : vector<8xf32> to vector<8x1xf32>
    %94 = tpu.reciprocal %93 {approx = true} : vector<8x1xf32> -> vector<8x1xf32>
    %95 = vector.broadcast %94 : vector<8x1xf32> to vector<8x8xf32>
    %96 = arith.mulf %91, %95 : vector<8x8xf32>
    %cst_38 = arith.constant dense<0.000000e+00> : vector<8x8xf32>
    %97 = tpu.matmul %96, %81, %cst_38 {dimension_numbers = #tpu.dot_dimension_numbers<[1], [0], [0], [1], [0, 0, 1, 1], [], []>} : vector<8x8xf32>, vector<8x8xf32>, vector<8x8xf32> -> vector<8x8xf32>
    %c24 = arith.constant 24 : index
    %c0_39 = arith.constant 0 : index
    %98 = vector.load %arg5[%c24, %c0_39] : memref<32x32xf32, #tpu.memory_space<vmem>>, vector<8x32xf32>
    %cst_40 = arith.constant dense<0.000000e+00> : vector<8x32xf32>
    %99 = tpu.matmul %97, %98, %cst_40 {dimension_numbers = #tpu.dot_dimension_numbers<[1], [0], [0], [1], [0, 0, 1, 1], [], []>} : vector<8x8xf32>, vector<8x32xf32>, vector<8x32xf32> -> vector<8x32xf32>
    %100 = arith.addf %78, %99 : vector<8x32xf32>
    %101 = arith.addf %100, %1 : vector<8x32xf32>
    %cst_41 = arith.constant dense<0.000000e+00> : vector<8xf32>
    %102 = vector.multi_reduction <add>, %101, %cst_41 [1] : vector<8x32xf32> to vector<8xf32>
    %103 = vector.shape_cast %102 : vector<8xf32> to vector<8x1xf32>
    %cst_42 = arith.constant 3.200000e+01 : f32
    %104 = vector.broadcast %cst_42 : f32 to vector<8x1xf32>
    %105 = arith.divf %103, %104 : vector<8x1xf32>
    %106 = vector.broadcast %105 : vector<8x1xf32> to vector<8x32xf32>
    %107 = arith.subf %101, %106 : vector<8x32xf32>
    %108 = arith.mulf %107, %107 : vector<8x32xf32>
    %cst_43 = arith.constant dense<0.000000e+00> : vector<8xf32>
    %109 = vector.multi_reduction <add>, %108, %cst_43 [1] : vector<8x32xf32> to vector<8xf32>
    %110 = vector.shape_cast %109 : vector<8xf32> to vector<8x1xf32>
    %cst_44 = arith.constant 3.200000e+01 : f32
    %111 = vector.broadcast %cst_44 : f32 to vector<8x1xf32>
    %112 = arith.divf %110, %111 : vector<8x1xf32>
    %113 = vector.broadcast %105 : vector<8x1xf32> to vector<8x32xf32>
    %114 = arith.subf %101, %113 : vector<8x32xf32>
    %cst_45 = arith.constant 9.99999996E-13 : f32
    %115 = vector.broadcast %cst_45 : f32 to vector<8x1xf32>
    %116 = arith.addf %112, %115 : vector<8x1xf32>
    %117 = math.rsqrt %116 : vector<8x1xf32>
    %118 = vector.broadcast %117 : vector<8x1xf32> to vector<8x32xf32>
    %119 = arith.mulf %114, %118 : vector<8x32xf32>
    %c0_46 = arith.constant 0 : index
    %c0_47 = arith.constant 0 : index
    %120 = vector.load %arg7[%c0_46, %c0_47] : memref<1x32xf32, #tpu.memory_space<vmem>>, vector<1x32xf32>
    %121 = vector.broadcast %120 : vector<1x32xf32> to vector<8x32xf32>
    %122 = arith.mulf %119, %121 : vector<8x32xf32>
    %c0_48 = arith.constant 0 : index
    %c0_49 = arith.constant 0 : index
    %123 = vector.load %arg8[%c0_48, %c0_49] : memref<1x32xf32, #tpu.memory_space<vmem>>, vector<1x32xf32>
    %124 = vector.broadcast %123 : vector<1x32xf32> to vector<8x32xf32>
    %125 = arith.addf %122, %124 : vector<8x32xf32>
    %c0_50 = arith.constant 0 : index
    %c0_51 = arith.constant 0 : index
    %126 = vector.load %arg9[%c0_50, %c0_51] : memref<32x64xf32, #tpu.memory_space<vmem>>, vector<32x64xf32>
    %cst_52 = arith.constant dense<0.000000e+00> : vector<8x64xf32>
    %127 = tpu.matmul %125, %126, %cst_52 {dimension_numbers = #tpu.dot_dimension_numbers<[1], [0], [0], [1], [0, 0, 1, 1], [], []>} : vector<8x32xf32>, vector<32x64xf32>, vector<8x64xf32> -> vector<8x64xf32>
    %c0_53 = arith.constant 0 : index
    %c0_54 = arith.constant 0 : index
    %128 = vector.load %arg10[%c0_53, %c0_54] : memref<1x64xf32, #tpu.memory_space<vmem>>, vector<1x64xf32>
    %129 = vector.broadcast %128 : vector<1x64xf32> to vector<8x64xf32>
    %130 = arith.addf %127, %129 : vector<8x64xf32>
    %cst_55 = arith.constant 5.000000e-01 : f32
    %131 = vector.broadcast %cst_55 : f32 to vector<8x64xf32>
    %132 = arith.mulf %130, %131 : vector<8x64xf32>
    %cst_56 = arith.constant 0.707106769 : f32
    %133 = vector.broadcast %cst_56 : f32 to vector<8x64xf32>
    %134 = arith.mulf %130, %133 : vector<8x64xf32>
    %135 = math.erf %134 : vector<8x64xf32>
    %cst_57 = arith.constant 1.000000e+00 : f32
    %136 = vector.broadcast %cst_57 : f32 to vector<8x64xf32>
    %137 = arith.addf %136, %135 : vector<8x64xf32>
    %138 = arith.mulf %132, %137 : vector<8x64xf32>
    %c0_58 = arith.constant 0 : index
    %c0_59 = arith.constant 0 : index
    %139 = vector.load %arg11[%c0_58, %c0_59] : memref<64x32xf32, #tpu.memory_space<vmem>>, vector<64x32xf32>
    %cst_60 = arith.constant dense<0.000000e+00> : vector<8x32xf32>
    %140 = tpu.matmul %138, %139, %cst_60 {dimension_numbers = #tpu.dot_dimension_numbers<[1], [0], [0], [1], [0, 0, 1, 1], [], []>} : vector<8x64xf32>, vector<64x32xf32>, vector<8x32xf32> -> vector<8x32xf32>
    %c0_61 = arith.constant 0 : index
    %c0_62 = arith.constant 0 : index
    %141 = vector.load %arg12[%c0_61, %c0_62] : memref<1x32xf32, #tpu.memory_space<vmem>>, vector<1x32xf32>
    %142 = vector.broadcast %141 : vector<1x32xf32> to vector<8x32xf32>
    %143 = arith.addf %140, %142 : vector<8x32xf32>
    %144 = arith.addf %143, %125 : vector<8x32xf32>
    %cst_63 = arith.constant dense<0.000000e+00> : vector<8xf32>
    %145 = vector.multi_reduction <add>, %144, %cst_63 [1] : vector<8x32xf32> to vector<8xf32>
    %146 = vector.shape_cast %145 : vector<8xf32> to vector<8x1xf32>
    %cst_64 = arith.constant 3.200000e+01 : f32
    %147 = vector.broadcast %cst_64 : f32 to vector<8x1xf32>
    %148 = arith.divf %146, %147 : vector<8x1xf32>
    %149 = vector.broadcast %148 : vector<8x1xf32> to vector<8x32xf32>
    %150 = arith.subf %144, %149 : vector<8x32xf32>
    %151 = arith.mulf %150, %150 : vector<8x32xf32>
    %cst_65 = arith.constant dense<0.000000e+00> : vector<8xf32>
    %152 = vector.multi_reduction <add>, %151, %cst_65 [1] : vector<8x32xf32> to vector<8xf32>
    %153 = vector.shape_cast %152 : vector<8xf32> to vector<8x1xf32>
    %cst_66 = arith.constant 3.200000e+01 : f32
    %154 = vector.broadcast %cst_66 : f32 to vector<8x1xf32>
    %155 = arith.divf %153, %154 : vector<8x1xf32>
    %156 = vector.broadcast %148 : vector<8x1xf32> to vector<8x32xf32>
    %157 = arith.subf %144, %156 : vector<8x32xf32>
    %cst_67 = arith.constant 9.99999996E-13 : f32
    %158 = vector.broadcast %cst_67 : f32 to vector<8x1xf32>
    %159 = arith.addf %155, %158 : vector<8x1xf32>
    %160 = math.rsqrt %159 : vector<8x1xf32>
    %161 = vector.broadcast %160 : vector<8x1xf32> to vector<8x32xf32>
    %162 = arith.mulf %157, %161 : vector<8x32xf32>
    %c0_68 = arith.constant 0 : index
    %c0_69 = arith.constant 0 : index
    %163 = vector.load %arg13[%c0_68, %c0_69] : memref<1x32xf32, #tpu.memory_space<vmem>>, vector<1x32xf32>
    %164 = vector.broadcast %163 : vector<1x32xf32> to vector<8x32xf32>
    %165 = arith.mulf %162, %164 : vector<8x32xf32>
    %c0_70 = arith.constant 0 : index
    %c0_71 = arith.constant 0 : index
    %166 = vector.load %arg14[%c0_70, %c0_71] : memref<1x32xf32, #tpu.memory_space<vmem>>, vector<1x32xf32>
    %167 = vector.broadcast %166 : vector<1x32xf32> to vector<8x32xf32>
    %168 = arith.addf %165, %167 : vector<8x32xf32>
    %c0_72 = arith.constant 0 : index
    %c0_73 = arith.constant 0 : index
    %c0_74 = arith.constant 0 : index
    %169 = vector.load %arg15[%c0_72, %c0_73, %c0_74] : memref<1x8x32xf32, #tpu.memory_space<vmem>>, vector<1x8x32xf32>
    %170 = vector.shape_cast %169 : vector<1x8x32xf32> to vector<8x32xf32>
    %171 = vector.shape_cast %168 : vector<8x32xf32> to vector<1x8x32xf32>
    tpu.vector_store %arg15[%c0_72, %c0_73, %c0_74], %171 {strides = array<i32>} : memref<1x8x32xf32, #tpu.memory_space<vmem>>, vector<1x8x32xf32>,
    return
  }
  func.func @transform_0(%arg0: i32) -> (i32, i32, i32) {
    %c0_i32 = arith.constant 0 : i32
    %c0_i32_0 = arith.constant 0 : i32
    %c0_i32_1 = arith.constant 0 : i32
    return %arg0, %c0_i32, %c0_i32_0 : i32, i32, i32
  }
  func.func @transform_1(%arg0: i32) -> (i32, i32, i32) {
    %c0_i32 = arith.constant 0 : i32
    %c0_i32_0 = arith.constant 0 : i32
    %c0_i32_1 = arith.constant 0 : i32
    return %arg0, %c0_i32, %c0_i32_0 : i32, i32, i32
  }
  func.func @transform_2(%arg0: i32) -> (i32, i32) {
    %c0_i32 = arith.constant 0 : i32
    %c0_i32_0 = arith.constant 0 : i32
    %c0_i32_1 = arith.constant 0 : i32
    return %c0_i32, %c0_i32_0 : i32, i32
  }
  func.func @transform_3(%arg0: i32) -> (i32, i32) {
    %c0_i32 = arith.constant 0 : i32
    %c0_i32_0 = arith.constant 0 : i32
    %c0_i32_1 = arith.constant 0 : i32
    return %c0_i32, %c0_i32_0 : i32, i32
  }
  func.func @transform_4(%arg0: i32) -> (i32, i32) {
    %c0_i32 = arith.constant 0 : i32
    %c0_i32_0 = arith.constant 0 : i32
    %c0_i32_1 = arith.constant 0 : i32
    return %c0_i32, %c0_i32_0 : i32, i32
  }
  func.func @transform_5(%arg0: i32) -> (i32, i32) {
    %c0_i32 = arith.constant 0 : i32
    %c0_i32_0 = arith.constant 0 : i32
    %c0_i32_1 = arith.constant 0 : i32
    return %c0_i32, %c0_i32_0 : i32, i32
  }
  func.func @transform_6(%arg0: i32) -> (i32, i32) {
    %c0_i32 = arith.constant 0 : i32
    %c0_i32_0 = arith.constant 0 : i32
    %c0_i32_1 = arith.constant 0 : i32
    return %c0_i32, %c0_i32_0 : i32, i32
  }
  func.func @transform_7(%arg0: i32) -> (i32, i32) {
    %c0_i32 = arith.constant 0 : i32
    %c0_i32_0 = arith.constant 0 : i32
    %c0_i32_1 = arith.constant 0 : i32
    return %c0_i32, %c0_i32_0 : i32, i32
  }
  func.func @transform_8(%arg0: i32) -> (i32, i32) {
    %c0_i32 = arith.constant 0 : i32
    %c0_i32_0 = arith.constant 0 : i32
    %c0_i32_1 = arith.constant 0 : i32
    return %c0_i32, %c0_i32_0 : i32, i32
  }
  func.func @transform_9(%arg0: i32) -> (i32, i32) {
    %c0_i32 = arith.constant 0 : i32
    %c0_i32_0 = arith.constant 0 : i32
    %c0_i32_1 = arith.constant 0 : i32
    return %c0_i32, %c0_i32_0 : i32, i32
  }
  func.func @transform_10(%arg0: i32) -> (i32, i32) {
    %c0_i32 = arith.constant 0 : i32
    %c0_i32_0 = arith.constant 0 : i32
    %c0_i32_1 = arith.constant 0 : i32
    return %c0_i32, %c0_i32_0 : i32, i32
  }
  func.func @transform_11(%arg0: i32) -> (i32, i32) {
    %c0_i32 = arith.constant 0 : i32
    %c0_i32_0 = arith.constant 0 : i32
    %c0_i32_1 = arith.constant 0 : i32
    return %c0_i32, %c0_i32_0 : i32, i32
  }
  func.func @transform_12(%arg0: i32) -> (i32, i32) {
    %c0_i32 = arith.constant 0 : i32
    %c0_i32_0 = arith.constant 0 : i32
    %c0_i32_1 = arith.constant 0 : i32
    return %c0_i32, %c0_i32_0 : i32, i32
  }
  func.func @transform_13(%arg0: i32) -> (i32, i32) {
    %c0_i32 = arith.constant 0 : i32
    %c0_i32_0 = arith.constant 0 : i32
    %c0_i32_1 = arith.constant 0 : i32
    return %c0_i32, %c0_i32_0 : i32, i32
  }
  func.func @transform_14(%arg0: i32) -> (i32, i32, i32) {
    %c0_i32 = arith.constant 0 : i32
    %c0_i32_0 = arith.constant 0 : i32
    %c0_i32_1 = arith.constant 0 : i32
    return %arg0, %c0_i32, %c0_i32_0 : i32, i32, i32
  }
}

</mosaic_0001>

<bundles_post_ra>
// kernel: bert_encoder_forward.4
= control target key start
LH: loop header
LB: loop body
LE: loop exit
PB: predicated region body
PF: predicated region fallthrough
CT: control target
= control target key end

     0   :  { %s2597_s0 = inlined_call_operand.vmem [shape: f32[2,8,32], index: 0, kind: input, shape index: {}]   ;;  %s2598_s1 = inlined_call_operand.vmem [shape: f32[2,8,20], index: 1, kind: input, shape index: {}]   ;;  %s2599_s2 = inlined_call_operand.vmem [shape: f32[2,8,12], index: 2, kind: input, shape index: {}]   ;;  %s2600_s3 = inlined_call_operand.vmem [shape: f32[20,32], index: 3, kind: input, shape index: {}]   ;;  %s2601_s4 = inlined_call_operand.vmem [shape: f32[1,32], index: 4, kind: input, shape index: {}]   ;;  %s2602_s5 = inlined_call_operand.vmem [shape: f32[32,32], index: 5, kind: input, shape index: {}]   ;;  %s2603_s6 = inlined_call_operand.vmem [shape: f32[1,32], index: 6, kind: input, shape index: {}]   ;;  %s2604_s7 = inlined_call_operand.vmem [shape: f32[12,32], index: 7, kind: input, shape index: {}]   ;;  %s2605_s8 = inlined_call_operand.vmem [shape: f32[1,32], index: 8, kind: input, shape index: {}]   ;;  %s2606_s9 = inlined_call_operand.vmem [shape: f32[32,32], index: 9, kind: input, shape index: {}]   ;;  %s2607_s10 = inlined_call_operand.vmem [shape: f32[1,32], index: 10, kind: input, shape index: {}]   ;;  %s2608_s11 = inlined_call_operand.vmem [shape: f32[32,32], index: 11, kind: input, shape index: {}]   ;;  %s2609_s12 = inlined_call_operand.vmem [shape: f32[1,32], index: 12, kind: input, shape index: {}]   ;;  %s2610_s13 = inlined_call_operand.vmem [shape: f32[32,64], index: 13, kind: input, shape index: {}]   ;;  %s2611_s14 = inlined_call_operand.vmem [shape: f32[1,64], index: 14, kind: input, shape index: {}]   ;;  %s2612_s15 = inlined_call_operand.vmem [shape: f32[32,32], index: 15, kind: input, shape index: {}]   ;;  %s2613_s16 = inlined_call_operand.vmem [shape: f32[1,32], index: 16, kind: input, shape index: {}]   ;;  %s2614_s17 = inlined_call_operand.vmem [shape: f32[32,64], index: 17, kind: input, shape index: {}]   ;;  %s2615_s18 = inlined_call_operand.vmem [shape: f32[1,64], index: 18, kind: input, shape index: {}]   ;;  %s2616_s19 = inlined_call_operand.vmem [shape: f32[64,32], index: 19, kind: input, shape index: {}]   ;;  %s2617_s20 = inlined_call_operand.vmem [shape: f32[1,32], index: 20, kind: input, shape index: {}]   ;;  %s2618_s21 = inlined_call_operand.vmem [shape: f32[2,8,32], index: 21, kind: output, shape index: {}]  }
   0x1   :  { %2621 = sst [smem:[#allocation2_spill]] %s2597_s0 }
   0x2   :  { %2622 = sst [smem:[#allocation3_spill]] %s2598_s1 }
   0x3   :  { %2623 = sst [smem:[#allocation4_spill]] %s2599_s2  ;;  %s2353_s2 = smov 0  }
   0x4   :  { %2624 = sst [smem:[#allocation5_spill]] %s2600_s3 }
   0x5   :  { %2625 = sst [smem:[#allocation6_spill]] %s2601_s4 }
   0x6   :  { %2626 = sst [smem:[#allocation7_spill]] %s2602_s5 }
   0x7 LB: > { %s1937_s25 = sadd.s32 4294967295, %s2236_s2   ;;  %p1941_p0 = scmp.ge.s32.totalorder %s2236_s2, 1  ;;  %s2236_s2 = sphi %s2353_s2, %s31_s2  }
   0x8   : > { %p604_p1 = scmp.lt.s32.totalorder %s2236_s2, 3 }
   0xa   : > { %p605_p2 = pnand %p1941_p0, %p604_p1 }
   0xb   : > { %s2627_s3 = sld [smem:[#allocation5_spill]] (!%p605_p2)  ;;  %v2238_v2 = vmov (!%p605_p2), 0.0|0.0   ;;  %p670_p3 = scmp.lt.s32.totalorder (!%p605_p2), %s1937_s25, 1  ;;  %vm2239_vm0 = vmmov (!%p605_p2), 0   ;;  %v2240_v5 = vmov (!%p605_p2), 0.0   ;;  %v863_v6 = vld [vmem:[%s2604_s7] sm:$0xff] (!%p605_p2) }
   0xc   : > { %608 = sbr.rel (%p605_p2) target bundleno = 2384 (0x950), region = 104  ;;  %2154 = vmatprep.subr.bf16.mxu0 (!%p605_p2), %v2238_v2  ;;  %2157 = vmatprep.subr.bf16.mxu1 (!%p605_p2), %v2238_v2  ;;  %s2628_s30 = sld [smem:[#allocation7_spill]] (!%p605_p2)  ;;  %v864_v7 = vld [vmem:[%s2604_s7 + $0x8] sm:$0xf] (!%p605_p2)  ;;  %vm702_vm1 = vcmask (!%p605_p2), 1043456   ;;  %vm698_vm2 = vcmask (!%p605_p2), 162816  }
   0xd   : > { %2036 = vmatprep.mubr.msk.f32.mxu0 (!%p605_p2), %vm2239_vm0, %v2240_v5  ;;  %2047 = vmatprep.mubr.msk.f32.mxu1 (!%p605_p2), %vm2239_vm0, %v2240_v5  ;;  %v2164_v11 = vpack.c.bf16 (!%p605_p2), %v864_v7, %v863_v6  ;;  %vm2241_vm3 = vmmov (!%p605_p2), 1   ;;  %s2629_s5 = sld [smem:[#allocation3_spill]] (!%p605_p2)  ;;  %s2630_s24 = sld [smem:[#allocation4_spill]] (!%p605_p2)  ;;  %vm872_vm5 = vcmask (!%p605_p2), 97280   ;;  %v1034_v17 = vld [vmem:[%s2608_s11] sm:$0xff] (!%p605_p2)  ;;  %v1035_v18 = vld [vmem:[%s2608_s11 + $0x8] sm:$0xff] (!%p605_p2) }
   0xe   : > { %vm2165_vm4 = vmpackc.low (!%p605_p2), %vm702_vm1, %vm2241_vm3  ;;  %v2174_v19 = vpack.c.bf16 (!%p605_p2), %v1035_v18, %v1034_v17  ;;  %v950_v21 = vld [vmem:[%s2606_s9] sm:$0xff] (!%p605_p2)  ;;  %v951_v22 = vld [vmem:[%s2606_s9 + $0x8] sm:$0xff] (!%p605_p2)  ;;  %vm788_vm6 = vcmask (!%p605_p2), 261120   ;;  %s2632_s28 = sld [smem:[#allocation2_spill]] (!%p605_p2)  ;;  %vm1279_vm7 = vcmask (!%p605_p2), 64512  }
   0xf   : > { %v2168_v26 = vpack.c.bf16 (!%p605_p2), %v951_v22, %v950_v21  ;;  %v1951_v27 = vld [vmem:[%s2605_s8] ss:$0 sm:$0xff] (!%p605_p2)  ;;  %v952_v29 = vld [vmem:[%s2606_s9 + $0x10] sm:$0xff] (!%p605_p2)  ;;  %v953_v30 = vld [vmem:[%s2606_s9 + $0x18] sm:$0xff] (!%p605_p2) }
  0x10   : > { %v2171_v34 = vpack.c.bf16 (!%p605_p2), %v953_v30, %v952_v29  ;;  %v1118_v35 = vld [vmem:[%s2610_s13] sm:$0xff] (!%p605_p2)  ;;  %v1119_v36 = vld [vmem:[%s2610_s13 + $0x8] sm:$0xff] (!%p605_p2)  ;;  %v1120_v39 = vld [vmem:[%s2610_s13 + $0x10] sm:$0xff] (!%p605_p2) }
  0x11   : > { %v688_v0 = vld [vmem:[%s2627_s3] sm:$0xff] (!%p605_p2)  ;;  %v689_v1 = vld [vmem:[%s2627_s3 + $0x8] sm:$0xff] (!%p605_p2)  ;;  %v690_v10 = vld [vmem:[%s2627_s3 + $0x10] sm:$0xf] (!%p605_p2)  ;;  %v2180_v38 = vpack.c.bf16 (!%p605_p2), %v1119_v36, %v1118_v35 }
  0x12   : > { %v2155_v3 = vpack.c.bf16 (!%p605_p2), %v689_v1, %v688_v0  ;;  %v777_v4 = vld [vmem:[%s2628_s30] sm:$0xff] (!%p605_p2)  ;;  %v778_v8 = vld [vmem:[%s2628_s30 + $0x8] sm:$0xff] (!%p605_p2)  ;;  %v779_v14 = vld [vmem:[%s2628_s30 + $0x10] sm:$0xff] (!%p605_p2) }
  0x13   : > { %s2634_s25 = smov (!%p670_p3, %s1937_s25), 1  ;;  %v2158_v9 = vpack.c.bf16 %v778_v8, %v777_v4  ;;  %v780_v15 = vld [vmem:[%s2628_s30 + $0x18] sm:$0xff]  ;;  %v1036_v42 = vld [vmem:[%s2608_s11 + $0x10] sm:$0xff]  ;;  %v1949_v46 = vld [vmem:[%s2603_s6] ss:$0 sm:$0xff] }
  0x14   : > { %2156 = vmatpush3.bf16.msra.mxu0 %v2155_v3  ;;  %s2389_s29 = sshll.u32 %s2634_s25, 3  ;;  %v2161_v16 = vpack.c.bf16 %v780_v15, %v779_v14  ;;  %v1121_v40 = vld [vmem:[%s2610_s13 + $0x18] sm:$0xff]  ;;  %v1958_v54 = vld [vmem:[%s2611_s14] ss:$0 sm:$0xff] }
  0x15   : > { %2034 = vmatprep.subr.mxu0 %v2240_v5  ;;  %2159 = vmatpush3.bf16.msra.mxu1 %v2158_v9  ;;  %s677_s22 = scalar_lea.vmem %s2629_s5, %s2389_s29  ;;  %s681_s26 = scalar_lea.vmem %s2630_s24, %s2389_s29  ;;  %v2183_v41 = vpack.c.bf16 %v1121_v40, %v1120_v39  ;;  %v1037_v43 = vld [vmem:[%s2608_s11 + $0x18] sm:$0xff]  ;;  %v1956_v55 = vld [vmem:[%s2609_s12] ss:$0 sm:$0xff]  ;;  %v1368_v9 = vld [vmem:[%s2612_s15 + $0x8] sm:$0xff] }
  0x16   : > { %2160 = vmatprep.subr.bf16.mxu1 %v2238_v2  ;;  %v687_v12 = vld [vmem:[%s677_s22] sm:$0xff]  ;;  %v2177_v44 = vpack.c.bf16 %v1037_v43, %v1036_v42  ;;  %s673_s0 = scalar_lea.vmem %s2632_s28, %s2389_s29  ;;  %v1451_v21 = vld [vmem:[%s2614_s17 + $0x18] sm:$0xff]  ;;  %s685_s25 = scalar_lea.vmem %s2618_s21, %s2389_s29 }
  0x17   : > { %v862_v13 = vld [vmem:[%s681_s26] sm:$0xff]  ;;  %s2631_s26 = sld [smem:[#allocation6_spill]] }
  0x18   : > { %2035 = vmatpush3.msk.msra.mxu0 %vm702_vm1, %v690_v10  ;;  %v2471_v45 = vld [vmem:[%s673_s0] sm:$0xff] }
  0x19   : > { %2037 = vmatmul.mubr.msk.f32.vlgmr.msra.gmra.mrb[0].mxu0 %vm698_vm2, %v687_v12  ;;  %2163 = vmatprep.subr.bf16.mxu0 %v2238_v2  ;;  %v1367_v8 = vld [vmem:[%s2612_s15] sm:$0xff]  ;;  %v1370_v12 = vld [vmem:[%s2612_s15 + $0x18] sm:$0xff] }
  0x1a   : > { %2166 = vmatpush3.bf16.msk.msra.mxu0 %vm2165_vm4, %v2164_v11  ;;  %2054 = vmatprep.mubr.msk.f32.mxu0 %vm2239_vm0, %v2240_v5  ;;  %v2186_v10 = vpack.c.bf16 %v1368_v9, %v1367_v8  ;;  %v1369_v11 = vld [vmem:[%s2612_s15 + $0x10] sm:$0xff]  ;;  %v1448_v15 = vld [vmem:[%s2614_s17] sm:$0xff] }
  0x1b   : > { %2173 = vmatprep.subr.bf16.mxu0 %v2238_v2  ;;  %2162 = vmatpush3.bf16.msra.mxu1 %v2161_v16  ;;  %v1449_v16 = vld [vmem:[%s2614_s17 + $0x8] sm:$0xff]  ;;  %v1965_v29 = vld [vmem:[%s2615_s18] ss:$0 sm:$0xff] }
  0x1c   : > { %2167 = vmatprep.subr.bf16.mxu1 %v2238_v2  ;;  %v2192_v18 = vpack.c.bf16 %v1449_v16, %v1448_v15  ;;  %v1963_v30 = vld [vmem:[%s2613_s16] ss:$0 sm:$0xff] }
  0x1d   : > { %2055 = vmatmul.mubr.msk.f32.vlgmr.msra.gmra.mrb[2].mxu0 %vm872_vm5, %v862_v13  ;;  %v1946_v20 = vld [vmem:[%s2631_s26] ss:$0 sm:$0xff]  ;;  %s2242_s26 = smov 96   ;;  %v2189_v13 = vpack.c.bf16 %v1370_v12, %v1369_v11 }
  0x1e   : > { %2076 = vmatprep.mubr.msk.f32.mxu0 %vm2239_vm0, %v2240_v5  ;;  %2175 = vmatpush3.bf16.msra.mxu0 %v2174_v19 }
  0x1f   : > { %2176 = vmatprep.subr.bf16.mxu0 %v2238_v2 }
  0x22   : > { %2178 = vmatpush3.bf16.msra.mxu0 %v2177_v44  ;;  %v1700_v44 = vld [vmem:[%s2616_s19 + $0x20] sm:$0xff] }
  0x23   : > { %2090 = vmatprep.subr.mxu0 %v2240_v5 }
  0x25   : > { %2077 = vmatmul.mubr.msk.f32.vlgmr.msra.gmra.mrb[4].mxu0 %vm788_vm6, %v2471_v45 }
  0x26   : > { %2092 = vmatprep.mubr.msk.f32.mxu0 %vm2239_vm0, %v2240_v5 }
  0xec   : > { %v772_v23 = vpop.f32.mrb[0].mxu0 }
  0xed   : > { %v773_v24 = vadd.f32 %v1946_v20, %v772_v23  ;;  %v2038_v25 = vpop.f32.mrb[1].mxu0  ;;  %v1450_v20 = vld [vmem:[%s2614_s17 + $0x10] sm:$0xff]  ;;  %v1954_v23 = vld [vmem:[%s2607_s10] ss:$0 sm:$0xff] }
  0xee   : > { %v2195_v22 = vpack.c.bf16 %v1451_v21, %v1450_v20 }
  0xef   : > { %v776_v28 = vmax.f32 %v773_v24, 0.0 }
  0xf0   : > { %v945_v31 = vpop.f32.mrb[2].mxu0 }
  0xf1   : > { %2048 = vmatmul.mubr.msk.f32.vlgmr.msra.gmra.mrb[0].mxu1 %vm788_vm6, %v776_v28  ;;  %v946_v32 = vadd.f32 %v1951_v27, %v945_v31  ;;  %v2056_v33 = vpop.f32.mrb[3].mxu0 }
  0xf2   : > { %2169 = vmatpush3.bf16.msra.mxu1 %v2168_v26  ;;  %2065 = vmatprep.mubr.msk.f32.mxu1 %vm2239_vm0, %v2240_v5 }
  0xf3   : > { %2170 = vmatprep.subr.bf16.mxu1 %v2238_v2  ;;  %v949_v37 = vmax.f32 %v946_v32, 0.0 }
  0xf6   : > { %2172 = vmatpush3.bf16.msra.mxu1 %v2171_v34 }
  0xf7   : > { %2179 = vmatprep.subr.bf16.mxu1 %v2238_v2 }
  0xf8   : > { %v1114_v52 = vpop.f32.mrb[4].mxu0 }
  0xf9   : > { %2066 = vmatmul.mubr.msk.f32.vlgmr.msra.gmra.mrb[2].mxu1 %vm788_vm6, %v949_v37  ;;  %v2078_v53 = vpop.f32.mrb[5].mxu0  ;;  %v1115_v59 = vadd.f32 %v1956_v55, %v1114_v52 }
  0xfa   : > { %2181 = vmatpush3.bf16.msra.mxu1 %v2180_v38  ;;  %2087 = vmatprep.mubr.msk.f32.mxu1 %vm2239_vm0, %v2240_v5  ;;  %v1696_v53 = vld [vmem:[%s2616_s19] sm:$0xff] }
  0xfb   : > { %2182 = vmatprep.subr.bf16.mxu1 %v2238_v2 }
  0xfe   : > { %2184 = vmatpush3.bf16.msra.mxu1 %v2183_v41 }
  0xff   : > { %2185 = vmatprep.subr.bf16.mxu1 %v2238_v2 }
 0x1c4   : > { %v858_v47 = vpop.f32.mrb[0].mxu1 }
 0x1c5   : > { %v859_v48 = vadd.f32 %v1949_v46, %v858_v47  ;;  %v2049_v49 = vpop.f32.mrb[1].mxu1  ;;  %v1701_v46 = vld [vmem:[%s2616_s19 + $0x28] sm:$0xff]  ;;  %v1702_v47 = vld [vmem:[%s2616_s19 + $0x30] sm:$0xff] }
 0x1c6   : > { %v1703_v49 = vld [vmem:[%s2616_s19 + $0x38] sm:$0xff] }
 0x1c7   : > { %2088 = vmatmul.mubr.msk.f32.vlgmr.msra.gmra.mrb[4].mxu1 %vm788_vm6, %v859_v48  ;;  %v2198_v48 = vpack.c.bf16 %v1701_v46, %v1700_v44 }
 0x1c8   : > { %2108 = vmatprep.mubr.msk.f32.mxu1 %vm2239_vm0, %v2240_v5  ;;  %2187 = vmatpush3.bf16.msra.mxu1 %v2186_v10 }
 0x1c9   : > { %2188 = vmatprep.subr.bf16.mxu1 %v2238_v2 }
 0x1cc   : > { %v1030_v50 = vpop.f32.mrb[2].mxu1  ;;  %2190 = vmatpush3.bf16.msra.mxu1 %v2189_v13 }
 0x1cd   : > { %v2067_v51 = vpop.f32.mrb[3].mxu1  ;;  %2122 = vmatprep.subr.mxu1 %v2240_v5  ;;  %v1031_v24 = vadd.f32 %v1954_v23, %v1030_v50  ;;  %v2201_v50 = vpack.c.bf16 %v1703_v49, %v1702_v47 }
 0x1cf   : > { %2109 = vmatmul.mubr.msk.f32.vlgmr.msra.gmra.mrb[6].mxu1 %vm788_vm6, %v2471_v45 }
 0x1d0   : > { %2124 = vmatprep.mubr.msk.f32.mxu1 %vm2239_vm0, %v2240_v5 }
 0x29a   : > { %v1198_v56 = vpop.f32.mrb[4].mxu1 }
 0x29b   : > { %v1199_v57 = vadd.f32 %v1958_v54, %v1198_v56  ;;  %v2089_v58 = vpop.f32.mrb[5].mxu1  ;;  %v1697_v54 = vld [vmem:[%s2616_s19 + $0x8] sm:$0xff] }
 0x29c   : > { %v2204_v56 = vpack.c.bf16 %v1697_v54, %v1696_v53  ;;  %v1698_v58 = vld [vmem:[%s2616_s19 + $0x10] sm:$0xff] }
 0x29d   : > { %1291 = vrot.lane.b32.xlu1 %v1199_v57, %s2242_s26  ;;  %2091 = vmatpush3.xpose.msk.msra.mxu0 %vm788_vm6, %v1199_v57 }
 0x29e   : > { %2095 = vmatprep.subr.mxu0 %v2240_v5 }
 0x2a0   : > { %2093 = vmatmul.mubr.msk.f32.vlgmr.msra.gmra.mrb[6].mxu0 %vm788_vm6, %v1115_v59  ;;  %v1699_v59 = vld [vmem:[%s2616_s19 + $0x18] sm:$0xff] }
 0x2a1   : > { %2097 = vmatprep.mubr.msk.f32.mxu0 %vm2239_vm0, %v2240_v5 }
 0x2a2   : > { %v1444_v25 = vpop.f32.mrb[6].mxu1 }
 0x2a3   : > { %v2110_v26 = vpop.f32.mrb[7].mxu1  ;;  %v1445_v34 = vadd.f32 %v1963_v30, %v1444_v25 }
 0x30f   : > { %v1292_v60 = vpop.permute.xlu1 %1291 }
 0x310   : > { %2096 = vmatpush3.msra.mxu0 %v1292_v60  ;;  %v2207_v60 = vpack.c.bf16 %v1699_v59, %v1698_v58 }
 0x311   : > { %2191 = vmatprep.subr.bf16.mxu0 %v2238_v2 }
 0x373   : > { %v1274_v61 = vpop.f32.mrb[6].mxu0 }
 0x374   : > { %v1278_v62 = vmul.f32 8.0, %v1274_v61  ;;  %v2094_v63 = vpop.f32.mrb[7].mxu0 }
 0x376   : > { %v1280_v0 = vsel %vm1279_vm7, %v1278_v62, -inf }
 0x377   : > { %1281 = vmax.xlane.f32.xlu0 %v1280_v0 }
 0x404   : > { %v1282_v1 = vpop.xlane.xlu0 %1281 }
 0x405   : > { %v1283_v3 = vsub.f32 %v1278_v62, %v1282_v1 }
 0x407   : > { %v1284_v4 = vmul.f32 1.442695, %v1283_v3  ;;  %v1972_v3 = vld [vmem:[%s2617_s20] ss:$0 sm:$0xff] }
 0x409   : > { %2222 = vpow2.f32 %v1284_v4 }
 0x413   : > { %v2223_v6 = vpop.eup %2222 }
 0x414   : > { %v1286_v7 = vsel %vm1279_vm7, %v2223_v6, 0.0 }
 0x415   : > { %1287 = vadd.xlane.f32.xlu0 %v1286_v7 }
 0x4a2   : > { %v1288_v14 = vpop.xlane.xlu0 %1287 }
 0x4a3   : > { %2224 = vrcp.f32 %v1288_v14 }
 0x4ad   : > { %v2225_v17 = vpop.eup %2224 }
 0x4ae   : > { %v1290_v19 = vmul.f32 %v2225_v17, %v2223_v6 }
 0x4b0   : > { %2098 = vmatmul.mubr.msk.f32.vlgmr.msra.gmra.mrb[8].mxu0 %vm1279_vm7, %v1290_v19 }
 0x4b1   : > { %2193 = vmatpush3.bf16.msra.mxu0 %v2192_v18  ;;  %2119 = vmatprep.mubr.msk.f32.mxu0 %vm2239_vm0, %v2240_v5 }
 0x4b2   : > { %2194 = vmatprep.subr.bf16.mxu0 %v2238_v2 }
 0x4b5   : > { %2196 = vmatpush3.bf16.msra.mxu0 %v2195_v22 }
 0x4b6   : > { %2127 = vmatprep.subr.mxu0 %v2240_v5 }
 0x4b8   : > { %2120 = vmatmul.mubr.msk.f32.vlgmr.msra.gmra.mrb[10].mxu0 %vm788_vm6, %v1031_v24 }
 0x4b9   : > { %2129 = vmatprep.mubr.msk.f32.mxu0 %vm2239_vm0, %v2240_v5 }
 0x583   : > { %v1363_v27 = vpop.f32.mrb[8].mxu0 }
 0x584   : > { %v2099_v28 = vpop.f32.mrb[9].mxu0 }
 0x58b   : > { %v1528_v31 = vpop.f32.mrb[10].mxu0 }
 0x58c   : > { %v1529_v32 = vadd.f32 %v1965_v29, %v1528_v31  ;;  %v2121_v33 = vpop.f32.mrb[11].mxu0 }
 0x58e   : > { %2123 = vmatpush3.xpose.msk.msra.mxu1 %vm788_vm6, %v1529_v32 }
 0x58f   : > { %2197 = vmatprep.subr.bf16.mxu1 %v2238_v2 }
 0x591   : > { %2125 = vmatmul.mubr.msk.f32.vlgmr.msra.gmra.mrb[8].mxu1 %vm788_vm6, %v1445_v34 }
 0x592   : > { %2140 = vmatprep.mubr.msk.f32.mxu1 %vm2239_vm0, %v2240_v5  ;;  %2199 = vmatpush3.bf16.msra.mxu1 %v2198_v48 }
 0x593   : > { %2200 = vmatprep.subr.bf16.mxu1 %v2238_v2 }
 0x596   : > { %2202 = vmatpush3.bf16.msra.mxu1 %v2201_v50 }
 0x664   : > { %v1604_v35 = vpop.f32.mrb[8].mxu1 }
 0x665   : > { %v1608_v36 = vmul.f32 8.0, %v1604_v35  ;;  %v2126_v37 = vpop.f32.mrb[9].mxu1 }
 0x667   : > { %v1609_v38 = vsel %vm1279_vm7, %v1608_v36, -inf }
 0x668   : > { %1610 = vmax.xlane.f32.xlu1 %v1609_v38 }
 0x6f5   : > { %v1611_v39 = vpop.xlane.xlu1 %1610 }
 0x6f6   : > { %v1612_v40 = vsub.f32 %v1608_v36, %v1611_v39 }
 0x6f8   : > { %v1613_v41 = vmul.f32 1.442695, %v1612_v40 }
 0x6fa   : > { %2226 = vpow2.f32 %v1613_v41 }
 0x704   : > { %v2227_v42 = vpop.eup %2226 }
 0x705   : > { %v1615_v43 = vsel %vm1279_vm7, %v2227_v42, 0.0 }
 0x706   : > { %1616 = vadd.xlane.f32.xlu0 %v1615_v43 }
 0x71c   : > { %1620 = vrot.lane.b32.xlu0 %v1529_v32, %s2242_s26 }
 0x793   : > { %v1617_v51 = vpop.xlane.xlu0 %1616 }
 0x794   : > { %2228 = vrcp.f32 %v1617_v51 }
 0x797   : > { %v1621_v52 = vpop.permute.xlu0 %1620 }
 0x798   : > { %2128 = vmatpush3.msra.mxu0 %v1621_v52 }
 0x799   : > { %2203 = vmatprep.subr.bf16.mxu0 %v2238_v2 }
 0x79e   : > { %v2229_v55 = vpop.eup %2228 }
 0x79f   : > { %v1619_v57 = vmul.f32 %v2229_v55, %v2227_v42 }
 0x7a1   : > { %2130 = vmatmul.mubr.msk.f32.vlgmr.msra.gmra.mrb[12].mxu0 %vm1279_vm7, %v1619_v57 }
 0x7a2   : > { %2205 = vmatpush3.bf16.msra.mxu0 %v2204_v56  ;;  %2151 = vmatprep.mubr.msk.f32.mxu0 %vm2239_vm0, %v2240_v5 }
 0x7a3   : > { %2206 = vmatprep.subr.bf16.mxu0 %v2238_v2 }
 0x7a6   : > { %2208 = vmatpush3.bf16.msra.mxu0 %v2207_v60 }
 0x7a9   : > { %2152 = vmatmul.mubr.msk.f32.vlgmr.msra.gmra.mrb[14].mxu0 %vm788_vm6, %v1363_v27 }
 0x874   : > { %v1692_v61 = vpop.f32.mrb[12].mxu0 }
 0x875   : > { %v2131_v62 = vpop.f32.mrb[13].mxu0  ;;  %2141 = vmatmul.mubr.msk.f32.vlgmr.msra.gmra.mrb[10].mxu1 %vm788_vm6, %v1692_v61 }
 0x87c   : > { %v1846_v63 = vpop.f32.mrb[14].mxu0 }
 0x87d   : > { %v2153_v0 = vpop.f32.mrb[15].mxu0 }
 0x948   : > { %v1773_v1 = vpop.f32.mrb[10].mxu1 }
 0x949   : > { %v1847_v4 = vadd.f32 %v1846_v63, %v1773_v1  ;;  %v2142_v6 = vpop.f32.mrb[11].mxu1 }
 0x94b   : > { %v1857_v7 = vadd.f32 %v1972_v3, %v1847_v4 }
 0x94d   : > { %v1858_v2 = vadd.f32 %v1857_v7, %v2471_v45 }
 0x94f   : > { %1859 = vst.msk [vmem:[%s685_s25] sm:$0xff] %vm788_vm6, %v1858_v2 }
 0x950 PF: > { %s31_s2 = sadd.s32 1, %s2236_s2  }
 0x951   : > { %p28_p4 = scmp.ge.s32.totalorder %s31_s2, 4  }
 0x953   :  { %30 = sbr.rel (!%p28_p4) target bundleno = 7 (0x7), region = 140 }

// kernel: bert_encoder_forward.3
= control target key start
LH: loop header
LB: loop body
LE: loop exit
PB: predicated region body
PF: predicated region fallthrough
CT: control target
= control target key end

     0   :  { %s2194_s29 = smov 0   ;;  %s2411_s0 = inlined_call_operand.vmem [shape: f32[2,8,32], index: 0, kind: input, shape index: {}]   ;;  %s2412_s1 = inlined_call_operand.vmem [shape: f32[2,1,8], index: 1, kind: input, shape index: {}]   ;;  %s2413_s2 = inlined_call_operand.vmem [shape: f32[32,96], index: 2, kind: input, shape index: {}]   ;;  %s2414_s3 = inlined_call_operand.vmem [shape: f32[1,96], index: 3, kind: input, shape index: {}]   ;;  %s2415_s4 = inlined_call_operand.vmem [shape: f32[32,32], index: 4, kind: input, shape index: {}]   ;;  %s2416_s5 = inlined_call_operand.vmem [shape: f32[1,32], index: 5, kind: input, shape index: {}]   ;;  %s2417_s6 = inlined_call_operand.vmem [shape: f32[1,32], index: 6, kind: input, shape index: {}]   ;;  %s2418_s7 = inlined_call_operand.vmem [shape: f32[1,32], index: 7, kind: input, shape index: {}]   ;;  %s2419_s8 = inlined_call_operand.vmem [shape: f32[32,64], index: 8, kind: input, shape index: {}]   ;;  %s2420_s9 = inlined_call_operand.vmem [shape: f32[1,64], index: 9, kind: input, shape index: {}]   ;;  %s2421_s10 = inlined_call_operand.vmem [shape: f32[64,32], index: 10, kind: input, shape index: {}]   ;;  %s2422_s11 = inlined_call_operand.vmem [shape: f32[1,32], index: 11, kind: input, shape index: {}]   ;;  %s2423_s12 = inlined_call_operand.vmem [shape: f32[1,32], index: 12, kind: input, shape index: {}]   ;;  %s2424_s13 = inlined_call_operand.vmem [shape: f32[1,32], index: 13, kind: input, shape index: {}]   ;;  %s2425_s14 = inlined_call_operand.vmem [shape: f32[2,8,32], index: 14, kind: output, shape index: {}]  }
   0x1 LB: > { %s1848_s30 = sadd.s32 4294967295, %s2103_s29   ;;  %p1852_p0 = scmp.ge.s32.totalorder %s2103_s29, 1  ;;  %s2103_s29 = sphi %s2194_s29, %s24_s29  }
   0x2   : > { %p419_p1 = scmp.lt.s32.totalorder %s2103_s29, 3 }
   0x4   : > { %p420_p2 = pnand %p1852_p0, %p419_p1 }
   0x5   : > { %v479_v0 = vld [vmem:[%s2413_s2] sm:$0xff] (!%p420_p2)  ;;  %v480_v1 = vld [vmem:[%s2413_s2 + $0x8] sm:$0xff] (!%p420_p2)  ;;  %v481_v2 = vld [vmem:[%s2413_s2 + $0x10] sm:$0xff] (!%p420_p2)  ;;  %v2105_v3 = vmov (!%p420_p2), 0.0|0.0   ;;  %vm2106_vm0 = vmmov (!%p420_p2), 0   ;;  %v2107_v6 = vmov (!%p420_p2), 0.0  }
   0x6   : > { %423 = sbr.rel (%p420_p2) target bundleno = 3983 (0xf8f), region = 76  ;;  %2029 = vmatprep.subr.bf16.mxu0 (!%p420_p2), %v2105_v3  ;;  %v2030_v4 = vpack.c.bf16 (!%p420_p2), %v480_v1, %v479_v0  ;;  %v482_v5 = vld [vmem:[%s2413_s2 + $0x18] sm:$0xff] (!%p420_p2)  ;;  %1936 = vmatprep.mubr.msk.f32.mxu0 (!%p420_p2), %vm2106_vm0, %v2107_v6  ;;  %p466_p3 = scmp.lt.s32.totalorder (!%p420_p2), %s1848_s30, 1  ;;  %vm490_vm1 = vcmask (!%p420_p2), 261120   ;;  %v1855_v9 = vld [vmem:[%s2414_s3] ss:$0 sm:$0xff] (!%p420_p2) }
   0x7   : > { %1944 = vmatprep.subr.mxu1 (!%p420_p2), %v2107_v6  ;;  %1946 = vmatprep.mubr.msk.f32.mxu1 (!%p420_p2), %vm2106_vm0, %v2107_v6  ;;  %v2033_v7 = vpack.c.bf16 (!%p420_p2), %v482_v5, %v481_v2  ;;  %s2108_s15 = smov (!%p420_p2), 64   ;;  %s2109_s16 = smov (!%p420_p2), 96   ;;  %vm575_vm2 = vcmask (!%p420_p2), 64512   ;;  %v745_v26 = vld [vmem:[%s2415_s4] sm:$0xff] (!%p420_p2)  ;;  %v987_v52 = vld [vmem:[%s2415_s4 + $0x8] sm:$0xff] (!%p420_p2)  ;;  %vm1681_vm3 = vcmask (!%p420_p2), 523264  }
   0x8   : > { %2031 = vmatpush3.bf16.msra.mxu0 (!%p420_p2), %v2030_v4  ;;  %s2110_s17 = smov (!%p420_p2), 88   ;;  %s2111_s21 = smov (!%p420_p2), 56   ;;  %v1857_v2 = vld [vmem:[%s2416_s5] ss:$0 sm:$0xff] (!%p420_p2) }
   0x9   : > { %2032 = vmatprep.subr.bf16.mxu0 (!%p420_p2), %v2105_v3  ;;  %s2112_s22 = smov (!%p420_p2), 80   ;;  %s2113_s24 = smov (!%p420_p2), 120  }
   0xa   : > { %s2114_s27 = smov (!%p420_p2), 112   ;;  %s2117_s18 = smov (!%p420_p2), 104  }
   0xc   : > { %2034 = vmatpush3.bf16.msra.mxu0 (!%p420_p2), %v2033_v7 }
   0xd   : > { %s2427_s30 = smov (!%p466_p3, %s1848_s30), 1  ;;  %1939 = vmatprep.subr.mxu0 %v2107_v6 }
   0xe   : > { %s1853_s23 = sshll.u32 %s2427_s30, 3  ;;  %s472_s20 = scalar_lea.vmem %s2412_s1, %s2427_s30 }
   0xf   : > { %s469_s26 = scalar_lea.vmem %s2411_s0, %s1853_s23  ;;  %v2255_v16 = vld [vmem:[%s472_s20] ss:$0 sm:$0xff] }
  0x10   : > { %v2229_v8 = vld [vmem:[%s469_s26] sm:$0xff]  ;;  %s476_s26 = scalar_lea.vmem %s2425_s14, %s1853_s23 }
  0x11   : > { %1937 = vmatmul.mubr.msk.f32.vlgmr.msra.gmra.mrb[0].mxu0 %vm490_vm1, %v2229_v8 }
  0x12   : > { %1941 = vmatprep.mubr.msk.f32.mxu0 %vm2106_vm0, %v2107_v6 }
  0xe4   : > { %v560_v10 = vpop.f32.mrb[0].mxu0 }
  0xe5   : > { %v2239_v11 = vadd.f32 %v1855_v9, %v560_v10  ;;  %v1938_v12 = vpop.f32.mrb[1].mxu0 }
  0xe7   : > { %669 = vrot.lane.b32.xlu1 %v2239_v11, %s2108_s15  ;;  %573 = vrot.lane.b32.xlu0 %v2239_v11, %s2109_s16  ;;  %s2115_s16 = smov 48  }
  0xeb   : > { %822 = vrot.lane.b32.xlu1 %v2239_v11, %s2110_s17  ;;  %s2116_s17 = smov 72  }
 0x159   : > { %v670_v13 = vpop.permute.xlu1 %669  ;;  %v574_v14 = vpop.permute.xlu0 %573 }
 0x15a   : > { %1940 = vmatpush3.xpose.msk.msra.mxu0 %vm575_vm2, %v574_v14  ;;  %1945 = vmatpush3.msra.mxu1 %v670_v13 }
 0x15b   : > { %1954 = vmatprep.subr.mxu1 %v2107_v6  ;;  %1949 = vmatprep.subr.mxu0 %v2107_v6 }
 0x15d   : > { %1942 = vmatmul.mubr.msk.f32.vlgmr.msra.gmra.mrb[2].mxu0 %vm575_vm2, %v2239_v11  ;;  %v823_v27 = vpop.permute.xlu1 %822 }
 0x15e   : > { %1951 = vmatprep.mubr.msk.f32.mxu0 %vm2106_vm0, %v2107_v6  ;;  %1950 = vmatpush3.msra.mxu0 %v745_v26 }
 0x15f   : > { %1959 = vmatprep.subr.mxu0 %v2107_v6 }
 0x230   : > { %v646_v15 = vpop.f32.mrb[2].mxu0 }
 0x231   : > { %v650_v17 = vmul.f32 0.35355338, %v646_v15  ;;  %v1943_v18 = vpop.f32.mrb[3].mxu0 }
 0x233   : > { %v657_v19 = vadd.f32 %v2255_v16, %v650_v17  ;;  %v1229_v17 = vld [vmem:[%s2415_s4 + $0x10] sm:$0xff] }
 0x235   : > { %v658_v20 = vsel %vm575_vm2, %v657_v19, -inf }
 0x236   : > { %659 = vmax.xlane.f32.xlu0 %v658_v20 }
 0x24c   : > { %911 = vrot.lane.b32.xlu0 %v2239_v11, %s2111_s21 }
 0x250   : > { %1064 = vrot.lane.b32.xlu0 %v2239_v11, %s2112_s22 }
 0x2c3   : > { %v660_v21 = vpop.xlane.xlu0 %659 }
 0x2c4   : > { %v661_v22 = vsub.f32 %v657_v19, %v660_v21 }
 0x2c6   : > { %v662_v23 = vmul.f32 1.442695, %v661_v22 }
 0x2c7   : > { %v912_v33 = vpop.permute.xlu0 %911 }
 0x2c8   : > { %2075 = vpow2.f32 %v662_v23 }
 0x2cb   : > { %v1065_v47 = vpop.permute.xlu0 %1064 }
 0x2d2   : > { %v2076_v24 = vpop.eup %2075 }
 0x2d3   : > { %v664_v25 = vsel %vm575_vm2, %v2076_v24, 0.0 }
 0x2d4   : > { %665 = vadd.xlane.f32.xlu1 %v664_v25 }
 0x2e5   : > { %820 = vrot.lane.b32.xlu1 %v2239_v11, %s2113_s24  ;;  %s2118_s24 = smov 40  }
 0x361   : > { %v666_v28 = vpop.xlane.xlu1 %665 }
 0x362   : > { %2077 = vrcp.f32 %v666_v28 }
 0x365   : > { %v821_v31 = vpop.permute.xlu1 %820 }
 0x36c   : > { %v2078_v29 = vpop.eup %2077 }
 0x36d   : > { %v668_v30 = vmul.f32 %v2078_v29, %v2076_v24 }
 0x36f   : > { %1947 = vmatmul.mubr.msk.f32.vlgmr.msra.gmra.mrb[0].mxu1 %vm575_vm2, %v668_v30  ;;  %v1471_v30 = vld [vmem:[%s2415_s4 + $0x18] sm:$0xff] }
 0x370   : > { %1955 = vmatpush3.xpose.msk.msra.mxu1 %vm575_vm2, %v823_v27  ;;  %1956 = vmatprep.mubr.msk.f32.mxu1 %vm2106_vm0, %v2107_v6 }
 0x371   : > { %1964 = vmatprep.subr.mxu1 %v2107_v6 }
 0x373   : > { %1957 = vmatmul.mubr.msk.f32.vlgmr.msra.gmra.mrb[2].mxu1 %vm575_vm2, %v821_v31 }
 0x374   : > { %1966 = vmatprep.mubr.msk.f32.mxu1 %vm2106_vm0, %v2107_v6  ;;  %1965 = vmatpush3.msra.mxu1 %v987_v52 }
 0x375   : > { %1974 = vmatprep.subr.mxu1 %v2107_v6 }
 0x442   : > { %v741_v32 = vpop.f32.mrb[0].mxu1 }
 0x443   : > { %v1948_v34 = vpop.f32.mrb[1].mxu1  ;;  %1952 = vmatmul.mubr.msk.f32.vlgmr.msra.gmra.mrb[4].mxu0 %vm575_vm2, %v741_v32 }
 0x444   : > { %1960 = vmatpush3.msra.mxu0 %v912_v33  ;;  %1961 = vmatprep.mubr.msk.f32.mxu0 %vm2106_vm0, %v2107_v6 }
 0x445   : > { %1969 = vmatprep.subr.mxu0 %v2107_v6 }
 0x446   : > { %v894_v35 = vpop.f32.mrb[2].mxu1 }
 0x447   : > { %v898_v36 = vmul.f32 0.35355338, %v894_v35  ;;  %v1958_v37 = vpop.f32.mrb[3].mxu1 }
 0x449   : > { %v899_v38 = vadd.f32 %v2255_v16, %v898_v36 }
 0x44b   : > { %v900_v39 = vsel %vm575_vm2, %v899_v38, -inf }
 0x44c   : > { %901 = vmax.xlane.f32.xlu1 %v900_v39 }
 0x4d9   : > { %v902_v40 = vpop.xlane.xlu1 %901 }
 0x4da   : > { %v903_v41 = vsub.f32 %v899_v38, %v902_v40 }
 0x4dc   : > { %v904_v42 = vmul.f32 1.442695, %v903_v41 }
 0x4de   : > { %2079 = vpow2.f32 %v904_v42 }
 0x4e8   : > { %v2080_v43 = vpop.eup %2079 }
 0x4e9   : > { %v906_v44 = vsel %vm575_vm2, %v2080_v43, 0.0 }
 0x4ea   : > { %907 = vadd.xlane.f32.xlu0 %v906_v44 }
 0x500   : > { %1062 = vrot.lane.b32.xlu0 %v2239_v11, %s2114_s27 }
 0x516   : > { %v815_v45 = vpop.f32.mrb[4].mxu0 }
 0x517   : > { %v1953_v46 = vpop.f32.mrb[5].mxu0  ;;  %v819_v4 = vadd.f32 %v1857_v2, %v815_v45 }
 0x577   : > { %v908_v48 = vpop.xlane.xlu0 %907 }
 0x578   : > { %2081 = vrcp.f32 %v908_v48  ;;  %v1577_v48 = vld [vmem:[%s2419_s8] sm:$0xff] }
 0x57b   : > { %v1063_v51 = vpop.permute.xlu0 %1062 }
 0x582   : > { %v2082_v49 = vpop.eup %2081 }
 0x583   : > { %v910_v50 = vmul.f32 %v2082_v49, %v2080_v43 }
 0x585   : > { %1962 = vmatmul.mubr.msk.f32.vlgmr.msra.gmra.mrb[6].mxu0 %vm575_vm2, %v910_v50  ;;  %v1580_v50 = vld [vmem:[%s2419_s8 + $0x18] sm:$0xff] }
 0x586   : > { %1970 = vmatpush3.xpose.msk.msra.mxu0 %vm575_vm2, %v1065_v47  ;;  %1971 = vmatprep.mubr.msk.f32.mxu0 %vm2106_vm0, %v2107_v6 }
 0x587   : > { %1979 = vmatprep.subr.mxu0 %v2107_v6 }
 0x589   : > { %1972 = vmatmul.mubr.msk.f32.vlgmr.msra.gmra.mrb[8].mxu0 %vm575_vm2, %v1063_v51 }
 0x58a   : > { %1981 = vmatprep.mubr.msk.f32.mxu0 %vm2106_vm0, %v2107_v6  ;;  %1980 = vmatpush3.msra.mxu0 %v1229_v17 }
 0x58b   : > { %1989 = vmatprep.subr.mxu0 %v2107_v6 }
 0x658   : > { %v983_v53 = vpop.f32.mrb[6].mxu0 }
 0x659   : > { %v1963_v54 = vpop.f32.mrb[7].mxu0  ;;  %1967 = vmatmul.mubr.msk.f32.vlgmr.msra.gmra.mrb[4].mxu1 %vm575_vm2, %v983_v53 }
 0x65a   : > { %1976 = vmatprep.mubr.msk.f32.mxu1 %vm2106_vm0, %v2107_v6 }
 0x65c   : > { %v1136_v55 = vpop.f32.mrb[8].mxu0 }
 0x65d   : > { %v1140_v56 = vmul.f32 0.35355338, %v1136_v55  ;;  %v1973_v57 = vpop.f32.mrb[9].mxu0 }
 0x65f   : > { %v1141_v58 = vadd.f32 %v2255_v16, %v1140_v56  ;;  %v1875_v56 = vld [vmem:[%s2417_s6] ss:$0 sm:$0xff] }
 0x661   : > { %v1142_v59 = vsel %vm575_vm2, %v1141_v58, -inf }
 0x662   : > { %1143 = vmax.xlane.f32.xlu1 %v1142_v59 }
 0x673   : > { %1153 = vrot.lane.b32.xlu1 %v2239_v11, %s2115_s16 }
 0x677   : > { %1306 = vrot.lane.b32.xlu1 %v2239_v11, %s2116_s17 }
 0x67b   : > { %1304 = vrot.lane.b32.xlu1 %v2239_v11, %s2117_s18 }
 0x6ef   : > { %v1144_v60 = vpop.xlane.xlu1 %1143 }
 0x6f0   : > { %v1145_v61 = vsub.f32 %v1141_v58, %v1144_v60  ;;  %v1876_v58 = vld [vmem:[%s2418_s7] ss:$0 sm:$0xff] }
 0x6f2   : > { %v1146_v62 = vmul.f32 1.442695, %v1145_v61  ;;  %v1666_v61 = vld [vmem:[%s2421_s10] sm:$0xff] }
 0x6f3   : > { %v1154_v63 = vpop.permute.xlu1 %1153 }
 0x6f4   : > { %2083 = vpow2.f32 %v1146_v62  ;;  %1975 = vmatpush3.msra.mxu1 %v1154_v63  ;;  %v1667_v62 = vld [vmem:[%s2421_s10 + $0x8] sm:$0xff] }
 0x6f5   : > { %1984 = vmatprep.subr.mxu1 %v2107_v6  ;;  %v2042_v63 = vpack.c.bf16 %v1667_v62, %v1666_v61 }
 0x6f7   : > { %v1307_v13 = vpop.permute.xlu1 %1306 }
 0x6fb   : > { %v1305_v15 = vpop.permute.xlu1 %1304 }
 0x6fe   : > { %v2084_v0 = vpop.eup %2083 }
 0x6ff   : > { %v1148_v1 = vsel %vm575_vm2, %v2084_v0, 0.0 }
 0x700   : > { %1149 = vadd.xlane.f32.xlu0 %v1148_v1  ;;  %v1669_v1 = vld [vmem:[%s2421_s10 + $0x18] sm:$0xff] }
 0x72c   : > { %v1057_v5 = vpop.f32.mrb[4].mxu1 }
 0x72d   : > { %v1061_v7 = vadd.f32 %v1057_v5, %v819_v4  ;;  %v1968_v9 = vpop.f32.mrb[5].mxu1  ;;  %v1670_v4 = vld [vmem:[%s2421_s10 + $0x20] sm:$0xff]  ;;  %v1671_v5 = vld [vmem:[%s2421_s10 + $0x28] sm:$0xff] }
 0x72e   : > { %v1672_v9 = vld [vmem:[%s2421_s10 + $0x30] sm:$0xff] }
 0x78d   : > { %v1150_v10 = vpop.xlane.xlu0 %1149 }
 0x78e   : > { %2085 = vrcp.f32 %v1150_v10  ;;  %v1673_v10 = vld [vmem:[%s2421_s10 + $0x38] sm:$0xff] }
 0x798   : > { %v2086_v12 = vpop.eup %2085 }
 0x799   : > { %v1152_v14 = vmul.f32 %v2086_v12, %v2084_v0  ;;  %v1668_v0 = vld [vmem:[%s2421_s10 + $0x10] sm:$0xff]  ;;  %v2051_v12 = vpack.c.bf16 %v1673_v10, %v1672_v9 }
 0x79a   : > { %v2045_v2 = vpack.c.bf16 %v1669_v1, %v1668_v0 }
 0x79b   : > { %1977 = vmatmul.mubr.msk.f32.vlgmr.msra.gmra.mrb[6].mxu1 %vm575_vm2, %v1152_v14 }
 0x79c   : > { %1985 = vmatpush3.xpose.msk.msra.mxu1 %vm575_vm2, %v1307_v13  ;;  %1986 = vmatprep.mubr.msk.f32.mxu1 %vm2106_vm0, %v2107_v6  ;;  %v1877_v13 = vld [vmem:[%s2420_s9] ss:$0 sm:$0xff] }
 0x79d   : > { %1994 = vmatprep.subr.mxu1 %v2107_v6 }
 0x79f   : > { %1987 = vmatmul.mubr.msk.f32.vlgmr.msra.gmra.mrb[8].mxu1 %vm575_vm2, %v1305_v15 }
 0x7a0   : > { %1996 = vmatprep.mubr.msk.f32.mxu1 %vm2106_vm0, %v2107_v6  ;;  %1995 = vmatpush3.msra.mxu1 %v1471_v30 }
 0x7a1   : > { %2041 = vmatprep.subr.bf16.mxu1 %v2105_v3 }
 0x86e   : > { %v1225_v18 = vpop.f32.mrb[6].mxu1 }
 0x86f   : > { %v1978_v19 = vpop.f32.mrb[7].mxu1  ;;  %1982 = vmatmul.mubr.msk.f32.vlgmr.msra.gmra.mrb[10].mxu0 %vm575_vm2, %v1225_v18 }
 0x870   : > { %1991 = vmatprep.mubr.msk.f32.mxu0 %vm2106_vm0, %v2107_v6 }
 0x872   : > { %v1378_v20 = vpop.f32.mrb[8].mxu1 }
 0x873   : > { %v1382_v21 = vmul.f32 0.35355338, %v1378_v20  ;;  %v1988_v22 = vpop.f32.mrb[9].mxu1 }
 0x874   : > { %v1879_v22 = vld [vmem:[%s2422_s11] ss:$0 sm:$0xff] }
 0x875   : > { %v1383_v23 = vadd.f32 %v2255_v16, %v1382_v21 }
 0x877   : > { %v1384_v24 = vsel %vm575_vm2, %v1383_v23, -inf }
 0x878   : > { %1385 = vmax.xlane.f32.xlu1 %v1384_v24 }
 0x905   : > { %v1386_v25 = vpop.xlane.xlu1 %1385 }
 0x906   : > { %v1387_v26 = vsub.f32 %v1383_v23, %v1386_v25 }
 0x908   : > { %v1388_v27 = vmul.f32 1.442695, %v1387_v26 }
 0x90a   : > { %2087 = vpow2.f32 %v1388_v27 }
 0x914   : > { %v2088_v28 = vpop.eup %2087 }
 0x915   : > { %v1390_v29 = vsel %vm575_vm2, %v2088_v28, 0.0 }
 0x916   : > { %1391 = vadd.xlane.f32.xlu0 %v1390_v29 }
 0x92c   : > { %1395 = vrot.lane.b32.xlu0 %v2239_v11, %s2118_s24 }
 0x942   : > { %v1299_v16 = vpop.f32.mrb[10].mxu0 }
 0x943   : > { %v1303_v31 = vadd.f32 %v1299_v16, %v1061_v7  ;;  %v1983_v32 = vpop.f32.mrb[11].mxu0  ;;  %v2048_v7 = vpack.c.bf16 %v1671_v5, %v1670_v4 }
 0x9a3   : > { %v1392_v33 = vpop.xlane.xlu0 %1391 }
 0x9a4   : > { %2089 = vrcp.f32 %v1392_v33 }
 0x9a7   : > { %v1396_v34 = vpop.permute.xlu0 %1395 }
 0x9a8   : > { %1990 = vmatpush3.msra.mxu0 %v1396_v34 }
 0x9a9   : > { %2035 = vmatprep.subr.bf16.mxu0 %v2105_v3 }
 0x9ae   : > { %v2090_v35 = vpop.eup %2089 }
 0x9af   : > { %v1394_v36 = vmul.f32 %v2090_v35, %v2088_v28 }
 0x9b1   : > { %1992 = vmatmul.mubr.msk.f32.vlgmr.msra.gmra.mrb[12].mxu0 %vm575_vm2, %v1394_v36  ;;  %v1881_v36 = vld [vmem:[%s2423_s12] ss:$0 sm:$0xff] }
 0x9b2   : > { %2007 = vmatprep.mubr.msk.f32.mxu0 %vm2106_vm0, %v2107_v6 }
 0xa84   : > { %v1467_v11 = vpop.f32.mrb[12].mxu0 }
 0xa85   : > { %v1993_v37 = vpop.f32.mrb[13].mxu0  ;;  %1997 = vmatmul.mubr.msk.f32.vlgmr.msra.gmra.mrb[10].mxu1 %vm575_vm2, %v1467_v11 }
 0xa86   : > { %2026 = vmatprep.mubr.msk.f32.mxu1 %vm2106_vm0, %v2107_v6  ;;  %v1578_v6 = vld [vmem:[%s2419_s8 + $0x8] sm:$0xff]  ;;  %2043 = vmatpush3.bf16.msra.mxu1 %v2042_v63  ;;  %v1882_v37 = vld [vmem:[%s2424_s13] ss:$0 sm:$0xff] }
 0xa87   : > { %v2036_v49 = vpack.c.bf16 %v1578_v6, %v1577_v48  ;;  %2044 = vmatprep.subr.bf16.mxu1 %v2105_v3 }
 0xa89   : > { %2037 = vmatpush3.bf16.msra.mxu0 %v2036_v49 }
 0xa8a   : > { %2038 = vmatprep.subr.bf16.mxu0 %v2105_v3  ;;  %2046 = vmatpush3.bf16.msra.mxu1 %v2045_v2 }
 0xa8b   : > { %2047 = vmatprep.subr.bf16.mxu1 %v2105_v3 }
 0xa8e   : > { %2049 = vmatpush3.bf16.msra.mxu1 %v2048_v7 }
 0xa8f   : > { %2050 = vmatprep.subr.bf16.mxu1 %v2105_v3 }
 0xa92   : > { %2052 = vmatpush3.bf16.msra.mxu1 %v2051_v12 }
 0xb58   : > { %v1541_v38 = vpop.f32.mrb[10].mxu1 }
 0xb59   : > { %v1545_v39 = vadd.f32 %v1541_v38, %v1303_v31  ;;  %v1998_v40 = vpop.f32.mrb[11].mxu1 }
 0xb5b   : > { %v1546_v41 = vadd.f32 %v1545_v39, %v2229_v8  ;;  %v1579_v8 = vld [vmem:[%s2419_s8 + $0x10] sm:$0xff] }
 0xb5c   : > { %v2039_v51 = vpack.c.bf16 %v1580_v50, %v1579_v8 }
 0xb5d   : > { %v1547_v42 = vsel %vm490_vm1, %v1546_v41, 0.0 }
 0xb5e   : > { %1548 = vadd.xlane.f32.xlu0 %v1547_v42  ;;  %2040 = vmatpush3.bf16.msra.mxu0 %v2039_v51 }
 0xbeb   : > { %v1549_v43 = vpop.xlane.xlu0 %1548 }
 0xbec   : > { %v1551_v44 = vmul.f32 0.03125, %v1549_v43 }
 0xbee   : > { %v1552_v45 = vsub.f32 %v1546_v41, %v1551_v44 }
 0xbf0   : > { %v1553_v46 = vmul.f32 %v1552_v45, %v1552_v45 }
 0xbf2   : > { %v1554_v47 = vsel %vm490_vm1, %v1553_v46, 0.0 }
 0xbf3   : > { %1555 = vadd.xlane.f32.xlu1 %v1554_v47 }
 0xc80   : > { %v1556_v52 = vpop.xlane.xlu1 %1555 }
 0xc81   : > { %v1557_v53 = vmul.f32 0.03125, %v1556_v52 }
 0xc83   : > { %v1558_v54 = vadd.f32 1e-12, %v1557_v53 }
 0xc85   : > { %2091 = vrsqrt.f32 %v1558_v54 }
 0xc8f   : > { %v2092_v55 = vpop.eup %2091 }
 0xc90   : > { %v1560_v57 = vmul.f32 %v2092_v55, %v1552_v45 }
 0xc92   : > { %v1568_v59 = vmul.f32 %v1875_v56, %v1560_v57 }
 0xc94   : > { %v1576_v60 = vadd.f32 %v1876_v58, %v1568_v59 }
 0xc96   : > { %2008 = vmatmul.mubr.msk.f32.vlgmr.msra.gmra.mrb[14].mxu0 %vm490_vm1, %v1576_v60 }
 0xd69   : > { %v1657_v14 = vpop.f32.mrb[14].mxu0 }
 0xd6a   : > { %v1658_v15 = vadd.f32 %v1877_v13, %v1657_v14  ;;  %v2009_v17 = vpop.f32.mrb[15].mxu0 }
 0xd6c   : > { %v1662_v18 = vmul.f32 0.70710677, %v1658_v15  ;;  %v1661_v19 = vmul.f32 0.5, %v1658_v15 }
 0xd6e   : > { %2093 = verf.f32 %v1662_v18 }
 0xd78   : > { %v2094_v3 = vpop.eup %2093 }
 0xd79   : > { %v1664_v20 = vadd.f32 1.0, %v2094_v3 }
 0xd7b   : > { %v1665_v21 = vmul.f32 %v1664_v20, %v1661_v19 }
 0xd7d   : > { %2027 = vmatmul.mubr.msk.f32.vlgmr.msra.gmra.mrb[12].mxu1 %vm1681_vm3, %v1665_v21 }
 0xe50   : > { %v1751_v23 = vpop.f32.mrb[12].mxu1 }
 0xe51   : > { %v1752_v24 = vadd.f32 %v1879_v22, %v1751_v23  ;;  %v2028_v25 = vpop.f32.mrb[13].mxu1 }
 0xe53   : > { %v1755_v26 = vadd.f32 %v1752_v24, %v1576_v60 }
 0xe55   : > { %v1756_v27 = vsel %vm490_vm1, %v1755_v26, 0.0 }
 0xe56   : > { %1757 = vadd.xlane.f32.xlu1 %v1756_v27 }
 0xee3   : > { %v1758_v28 = vpop.xlane.xlu1 %1757 }
 0xee4   : > { %v1759_v29 = vmul.f32 0.03125, %v1758_v28 }
 0xee6   : > { %v1760_v30 = vsub.f32 %v1755_v26, %v1759_v29 }
 0xee8   : > { %v1761_v16 = vmul.f32 %v1760_v30, %v1760_v30 }
 0xeea   : > { %v1762_v31 = vsel %vm490_vm1, %v1761_v16, 0.0 }
 0xeeb   : > { %1763 = vadd.xlane.f32.xlu1 %v1762_v31 }
 0xf78   : > { %v1764_v32 = vpop.xlane.xlu1 %1763 }
 0xf79   : > { %v1765_v33 = vmul.f32 0.03125, %v1764_v32 }
 0xf7b   : > { %v1766_v34 = vadd.f32 1e-12, %v1765_v33 }
 0xf7d   : > { %2095 = vrsqrt.f32 %v1766_v34 }
 0xf87   : > { %v2096_v35 = vpop.eup %2095 }
 0xf88   : > { %v1768_v11 = vmul.f32 %v2096_v35, %v1760_v30 }
 0xf8a   : > { %v1776_v38 = vmul.f32 %v1881_v36, %v1768_v11 }
 0xf8c   : > { %v1784_v39 = vadd.f32 %v1882_v37, %v1776_v38 }
 0xf8e   : > { %1785 = vst.msk [vmem:[%s476_s26] sm:$0xff] %vm490_vm1, %v1784_v39 }
 0xf8f PF: > { %s24_s29 = sadd.s32 1, %s2103_s29  }
 0xf90   : > { %p21_p4 = scmp.ge.s32.totalorder %s24_s29, 4  }
 0xf92   :  { %23 = sbr.rel (!%p21_p4) target bundleno = 1 (0x1), region = 109 }

// kernel: bert_encoder_forward.5
= control target key start
LH: loop header
LB: loop body
LE: loop exit
PB: predicated region body
PF: predicated region fallthrough
CT: control target
= control target key end

     0   :  { %s2599_s0 = inlined_call_operand.vmem [shape: f32[2,8,32], index: 0, kind: input, shape index: {}]   ;;  %s2600_s1 = inlined_call_operand.vmem [shape: f32[2,1,8], index: 1, kind: input, shape index: {}]   ;;  %s2601_s2 = inlined_call_operand.vmem [shape: f32[32,96], index: 2, kind: input, shape index: {}]   ;;  %s2602_s3 = inlined_call_operand.vmem [shape: f32[1,96], index: 3, kind: input, shape index: {}]   ;;  %s2603_s4 = inlined_call_operand.vmem [shape: f32[32,32], index: 4, kind: input, shape index: {}]   ;;  %s2604_s5 = inlined_call_operand.vmem [shape: f32[1,32], index: 5, kind: input, shape index: {}]   ;;  %s2605_s6 = inlined_call_operand.vmem [shape: f32[1,32], index: 6, kind: input, shape index: {}]   ;;  %s2606_s7 = inlined_call_operand.vmem [shape: f32[1,32], index: 7, kind: input, shape index: {}]   ;;  %s2607_s8 = inlined_call_operand.vmem [shape: f32[32,64], index: 8, kind: input, shape index: {}]   ;;  %s2608_s9 = inlined_call_operand.vmem [shape: f32[1,64], index: 9, kind: input, shape index: {}]   ;;  %s2609_s10 = inlined_call_operand.vmem [shape: f32[64,32], index: 10, kind: input, shape index: {}]   ;;  %s2610_s11 = inlined_call_operand.vmem [shape: f32[1,32], index: 11, kind: input, shape index: {}]   ;;  %s2611_s12 = inlined_call_operand.vmem [shape: f32[1,32], index: 12, kind: input, shape index: {}]   ;;  %s2612_s13 = inlined_call_operand.vmem [shape: f32[1,32], index: 13, kind: input, shape index: {}]   ;;  %s2613_s14 = inlined_call_operand.hbm [shape: f32[2,8,32], index: 14, kind: output, shape index: {}]  }
   0x1   :  { %2614 = sst [smem:[#allocation6_spill]] %s2599_s0 }
   0x2   :  { %2615 = sst [smem:[#allocation7_spill]] %s2600_s1 }
   0x3   :  { %2616 = sst [smem:[#allocation8_spill]] %s2601_s2 }
   0x4   :  { %2617 = sst [smem:[#allocation9_spill]] %s2602_s3 }
   0x5   :  { %19 = vsyncpa [#allocation3], 0 }
   0x6   :  { %21 = vsyncpa [#allocation3 + $0x1], 0  ;;  %s2303_s29 = smov 0   ;;  %s2305_s30 = smov 0  }
   0x7   :  { %s2307_s15 = smov 0   ;;  %s2309_s16 = smov 0  }
   0x8 LB: > { %s2324_s17 = sadd.s32 4294967295, %s2211_s16   ;;  %s1868_s18 = sadd.s32 4294967294, %s2211_s16   ;;  %s2211_s16 = sphi %s2309_s16, %s2629_s16   ;;  %s2207_s15 = sphi %s2307_s15, %s2628_s15   ;;  %s2203_s30 = sphi %s2305_s30, %s2627_s30   ;;  %s2199_s29 = sphi %s2303_s29, %s2626_s29  }
   0x9   : > { %s2328_s19 = sadd.s32 1, %s2211_s16   ;;  %s338_s20 = sadd.s32 1, %s2207_s15 }
   0xa   : > { %s335_s21 = ssub.s32 %s2211_s16, %s2328_s19  ;;  %p348_p0 = scmp.ne.s32.totalorder %s2207_s15, %s2203_s30 }
   0xb   : > { %p336_p1 = scmp.eq.s32.totalorder %s335_s21, 0  ;;  %p349_p2 = scmp.eq.s32.totalorder %s2324_s17, 1 }
   0xc   : > { %p354_p3 = scmp.ne.s32.totalorder %s2203_s30, %s2199_s29  ;;  %p355_p4 = scmp.eq.s32.totalorder %s1868_s18, 1 }
   0xd   : > { %s2339_s22 = scalar_select %p336_p1, %s2207_s15, %s338_s20  }
   0xe   : > { %p2341_p5 = por %p349_p2, %p348_p0  ;;  %p2345_p6 = por %p355_p4, %p354_p3 }
   0xf   : > { %2618 = sst [smem:[#allocation5_spill]] %s2339_s22  ;;  %p1871_p7 = scmp.ge.s32.totalorder %s2211_s16, 1 }
  0x10   : > { %p422_p8 = scmp.lt.s32.totalorder %s2211_s16, 3 }
  0x12   : > { %p423_p9 = pnand %p1871_p7, %p422_p8 }
  0x13   : > { %s2621_s2 = sld [smem:[#allocation8_spill]] (!%p423_p9)  ;;  %v2213_v3 = vmov (!%p423_p9), 0.0|0.0   ;;  %vm2214_vm0 = vmmov (!%p423_p9), 0   ;;  %v2215_v6 = vmov (!%p423_p9), 0.0   ;;  %p470_p10 = scmp.lt.s32.totalorder (!%p423_p9), %s2324_s17, 1  ;;  %vm490_vm1 = vcmask (!%p423_p9), 261120  }
  0x14   : > { %426 = sbr.rel (%p423_p9) target bundleno = 4014 (0xfae), region = 76  ;;  %2050 = vmatprep.subr.bf16.mxu0 (!%p423_p9), %v2213_v3  ;;  %1957 = vmatprep.mubr.msk.f32.mxu0 (!%p423_p9), %vm2214_vm0, %v2215_v6  ;;  %s2622_s0 = sld [smem:[#allocation6_spill]] (!%p423_p9)  ;;  %vm575_vm2 = vcmask (!%p423_p9), 64512   ;;  %v745_v26 = vld [vmem:[%s2603_s4] sm:$0xff] (!%p423_p9)  ;;  %v987_v52 = vld [vmem:[%s2603_s4 + $0x8] sm:$0xff] (!%p423_p9)  ;;  %vm1681_vm3 = vcmask (!%p423_p9), 523264  }
  0x15   : > { %1965 = vmatprep.subr.mxu1 (!%p423_p9), %v2215_v6  ;;  %1967 = vmatprep.mubr.msk.f32.mxu1 (!%p423_p9), %vm2214_vm0, %v2215_v6  ;;  %s2623_s3 = sld [smem:[#allocation9_spill]] (!%p423_p9)  ;;  %s2216_s21 = smov (!%p423_p9), 64  }
  0x16   : > { %s2218_s26 = smov (!%p423_p9), 88   ;;  %s2624_s1 = sld [smem:[#allocation7_spill]] (!%p423_p9) }
  0x17   : > { %s2219_s20 = smov (!%p423_p9), 56   ;;  %s2222_s27 = smov (!%p423_p9), 112  }
  0x19   : > { %v479_v0 = vld [vmem:[%s2621_s2] sm:$0xff] (!%p423_p9)  ;;  %v480_v1 = vld [vmem:[%s2621_s2 + $0x8] sm:$0xff] (!%p423_p9)  ;;  %v481_v2 = vld [vmem:[%s2621_s2 + $0x10] sm:$0xff] (!%p423_p9) }
  0x1a   : > { %v2051_v4 = vpack.c.bf16 (!%p423_p9), %v480_v1, %v479_v0  ;;  %v482_v5 = vld [vmem:[%s2621_s2 + $0x18] sm:$0xff] (!%p423_p9) }
  0x1b   : > { %v2054_v7 = vpack.c.bf16 %v482_v5, %v481_v2  ;;  %s2371_s25 = scalar_select %p470_p10, %s2324_s17, 1  ;;  %v1874_v9 = vld [vmem:[%s2623_s3] ss:$0 sm:$0xff] }
  0x1c   : > { %2052 = vmatpush3.bf16.msra.mxu0 %v2051_v4  ;;  %v1876_v2 = vld [vmem:[%s2604_s5] ss:$0 sm:$0xff] }
  0x1d   : > { %2053 = vmatprep.subr.bf16.mxu0 %v2213_v3  ;;  %s1873_s22 = sshll.u32 %s2371_s25, 3  ;;  %s476_s18 = scalar_lea.vmem %s2624_s1, %s2371_s25 }
  0x1e   : > { %s473_s28 = scalar_lea.vmem %s2622_s0, %s1873_s22  ;;  %s2217_s22 = smov 96   ;;  %v2404_v16 = vld [vmem:[%s476_s18] ss:$0 sm:$0xff] }
  0x1f   : > { %v2378_v8 = vld [vmem:[%s473_s28] sm:$0xff]  ;;  %s2221_s25 = smov 120   ;;  %s2226_s18 = smov 40  }
  0x20   : > { %2055 = vmatpush3.bf16.msra.mxu0 %v2054_v7 }
  0x21   : > { %1960 = vmatprep.subr.mxu0 %v2215_v6 }
  0x23   : > { %1958 = vmatmul.mubr.msk.f32.vlgmr.msra.gmra.mrb[0].mxu0 %vm490_vm1, %v2378_v8 }
  0x24   : > { %1962 = vmatprep.mubr.msk.f32.mxu0 %vm2214_vm0, %v2215_v6 }
  0xf6   : > { %v560_v10 = vpop.f32.mrb[0].mxu0 }
  0xf7   : > { %v2388_v11 = vadd.f32 %v1874_v9, %v560_v10  ;;  %v1959_v12 = vpop.f32.mrb[1].mxu0 }
  0xf9   : > { %669 = vrot.lane.b32.xlu1 %v2388_v11, %s2216_s21  ;;  %573 = vrot.lane.b32.xlu0 %v2388_v11, %s2217_s22  ;;  %s2220_s21 = smov 80  }
  0xfd   : > { %822 = vrot.lane.b32.xlu1 %v2388_v11, %s2218_s26 }
 0x16b   : > { %v670_v13 = vpop.permute.xlu1 %669  ;;  %v574_v14 = vpop.permute.xlu0 %573 }
 0x16c   : > { %1961 = vmatpush3.xpose.msk.msra.mxu0 %vm575_vm2, %v574_v14  ;;  %1966 = vmatpush3.msra.mxu1 %v670_v13 }
 0x16d   : > { %1975 = vmatprep.subr.mxu1 %v2215_v6  ;;  %1970 = vmatprep.subr.mxu0 %v2215_v6 }
 0x16f   : > { %1963 = vmatmul.mubr.msk.f32.vlgmr.msra.gmra.mrb[2].mxu0 %vm575_vm2, %v2388_v11  ;;  %v823_v27 = vpop.permute.xlu1 %822 }
 0x170   : > { %1972 = vmatprep.mubr.msk.f32.mxu0 %vm2214_vm0, %v2215_v6  ;;  %1971 = vmatpush3.msra.mxu0 %v745_v26 }
 0x171   : > { %1980 = vmatprep.subr.mxu0 %v2215_v6 }
 0x242   : > { %v646_v15 = vpop.f32.mrb[2].mxu0 }
 0x243   : > { %v650_v17 = vmul.f32 0.35355338, %v646_v15  ;;  %v1964_v18 = vpop.f32.mrb[3].mxu0 }
 0x245   : > { %v657_v19 = vadd.f32 %v2404_v16, %v650_v17  ;;  %v1229_v17 = vld [vmem:[%s2603_s4 + $0x10] sm:$0xff] }
 0x247   : > { %v658_v20 = vsel %vm575_vm2, %v657_v19, -inf }
 0x248   : > { %659 = vmax.xlane.f32.xlu0 %v658_v20 }
 0x25e   : > { %911 = vrot.lane.b32.xlu0 %v2388_v11, %s2219_s20  ;;  %s2223_s20 = smov 48  }
 0x262   : > { %1064 = vrot.lane.b32.xlu0 %v2388_v11, %s2220_s21  ;;  %s2224_s21 = smov 72  }
 0x2d5   : > { %v660_v21 = vpop.xlane.xlu0 %659 }
 0x2d6   : > { %v661_v22 = vsub.f32 %v657_v19, %v660_v21 }
 0x2d8   : > { %v662_v23 = vmul.f32 1.442695, %v661_v22 }
 0x2d9   : > { %v912_v33 = vpop.permute.xlu0 %911 }
 0x2da   : > { %2127 = vpow2.f32 %v662_v23 }
 0x2dd   : > { %v1065_v47 = vpop.permute.xlu0 %1064 }
 0x2e4   : > { %v2128_v24 = vpop.eup %2127 }
 0x2e5   : > { %v664_v25 = vsel %vm575_vm2, %v2128_v24, 0.0 }
 0x2e6   : > { %665 = vadd.xlane.f32.xlu1 %v664_v25 }
 0x2f7   : > { %820 = vrot.lane.b32.xlu1 %v2388_v11, %s2221_s25  ;;  %s2225_s25 = smov 104  }
 0x373   : > { %v666_v28 = vpop.xlane.xlu1 %665 }
 0x374   : > { %2129 = vrcp.f32 %v666_v28 }
 0x377   : > { %v821_v31 = vpop.permute.xlu1 %820 }
 0x37e   : > { %v2130_v29 = vpop.eup %2129 }
 0x37f   : > { %v668_v30 = vmul.f32 %v2130_v29, %v2128_v24 }
 0x381   : > { %1968 = vmatmul.mubr.msk.f32.vlgmr.msra.gmra.mrb[0].mxu1 %vm575_vm2, %v668_v30  ;;  %v1471_v30 = vld [vmem:[%s2603_s4 + $0x18] sm:$0xff] }
 0x382   : > { %1976 = vmatpush3.xpose.msk.msra.mxu1 %vm575_vm2, %v823_v27  ;;  %1977 = vmatprep.mubr.msk.f32.mxu1 %vm2214_vm0, %v2215_v6 }
 0x383   : > { %1985 = vmatprep.subr.mxu1 %v2215_v6 }
 0x385   : > { %1978 = vmatmul.mubr.msk.f32.vlgmr.msra.gmra.mrb[2].mxu1 %vm575_vm2, %v821_v31 }
 0x386   : > { %1987 = vmatprep.mubr.msk.f32.mxu1 %vm2214_vm0, %v2215_v6  ;;  %1986 = vmatpush3.msra.mxu1 %v987_v52 }
 0x387   : > { %1995 = vmatprep.subr.mxu1 %v2215_v6 }
 0x454   : > { %v741_v32 = vpop.f32.mrb[0].mxu1 }
 0x455   : > { %v1969_v34 = vpop.f32.mrb[1].mxu1  ;;  %1973 = vmatmul.mubr.msk.f32.vlgmr.msra.gmra.mrb[4].mxu0 %vm575_vm2, %v741_v32 }
 0x456   : > { %1981 = vmatpush3.msra.mxu0 %v912_v33  ;;  %1982 = vmatprep.mubr.msk.f32.mxu0 %vm2214_vm0, %v2215_v6 }
 0x457   : > { %1990 = vmatprep.subr.mxu0 %v2215_v6 }
 0x458   : > { %v894_v35 = vpop.f32.mrb[2].mxu1 }
 0x459   : > { %v898_v36 = vmul.f32 0.35355338, %v894_v35  ;;  %v1979_v37 = vpop.f32.mrb[3].mxu1 }
 0x45b   : > { %v899_v38 = vadd.f32 %v2404_v16, %v898_v36 }
 0x45d   : > { %v900_v39 = vsel %vm575_vm2, %v899_v38, -inf }
 0x45e   : > { %901 = vmax.xlane.f32.xlu1 %v900_v39 }
 0x4eb   : > { %v902_v40 = vpop.xlane.xlu1 %901 }
 0x4ec   : > { %v903_v41 = vsub.f32 %v899_v38, %v902_v40 }
 0x4ee   : > { %v904_v42 = vmul.f32 1.442695, %v903_v41 }
 0x4f0   : > { %2131 = vpow2.f32 %v904_v42 }
 0x4fa   : > { %v2132_v43 = vpop.eup %2131 }
 0x4fb   : > { %v906_v44 = vsel %vm575_vm2, %v2132_v43, 0.0 }
 0x4fc   : > { %907 = vadd.xlane.f32.xlu0 %v906_v44 }
 0x512   : > { %1062 = vrot.lane.b32.xlu0 %v2388_v11, %s2222_s27 }
 0x528   : > { %v815_v45 = vpop.f32.mrb[4].mxu0 }
 0x529   : > { %v1974_v46 = vpop.f32.mrb[5].mxu0  ;;  %v819_v4 = vadd.f32 %v1876_v2, %v815_v45 }
 0x589   : > { %v908_v48 = vpop.xlane.xlu0 %907 }
 0x58a   : > { %2133 = vrcp.f32 %v908_v48  ;;  %v1577_v48 = vld [vmem:[%s2607_s8] sm:$0xff] }
 0x58d   : > { %v1063_v51 = vpop.permute.xlu0 %1062 }
 0x594   : > { %v2134_v49 = vpop.eup %2133 }
 0x595   : > { %v910_v50 = vmul.f32 %v2134_v49, %v2132_v43 }
 0x597   : > { %1983 = vmatmul.mubr.msk.f32.vlgmr.msra.gmra.mrb[6].mxu0 %vm575_vm2, %v910_v50  ;;  %v1580_v50 = vld [vmem:[%s2607_s8 + $0x18] sm:$0xff] }
 0x598   : > { %1991 = vmatpush3.xpose.msk.msra.mxu0 %vm575_vm2, %v1065_v47  ;;  %1992 = vmatprep.mubr.msk.f32.mxu0 %vm2214_vm0, %v2215_v6 }
 0x599   : > { %2000 = vmatprep.subr.mxu0 %v2215_v6 }
 0x59b   : > { %1993 = vmatmul.mubr.msk.f32.vlgmr.msra.gmra.mrb[8].mxu0 %vm575_vm2, %v1063_v51 }
 0x59c   : > { %2002 = vmatprep.mubr.msk.f32.mxu0 %vm2214_vm0, %v2215_v6  ;;  %2001 = vmatpush3.msra.mxu0 %v1229_v17 }
 0x59d   : > { %2010 = vmatprep.subr.mxu0 %v2215_v6 }
 0x66a   : > { %v983_v53 = vpop.f32.mrb[6].mxu0 }
 0x66b   : > { %v1984_v54 = vpop.f32.mrb[7].mxu0  ;;  %1988 = vmatmul.mubr.msk.f32.vlgmr.msra.gmra.mrb[4].mxu1 %vm575_vm2, %v983_v53 }
 0x66c   : > { %1997 = vmatprep.mubr.msk.f32.mxu1 %vm2214_vm0, %v2215_v6 }
 0x66e   : > { %v1136_v55 = vpop.f32.mrb[8].mxu0 }
 0x66f   : > { %v1140_v56 = vmul.f32 0.35355338, %v1136_v55  ;;  %v1994_v57 = vpop.f32.mrb[9].mxu0 }
 0x671   : > { %v1141_v58 = vadd.f32 %v2404_v16, %v1140_v56  ;;  %v1894_v56 = vld [vmem:[%s2605_s6] ss:$0 sm:$0xff] }
 0x673   : > { %v1142_v59 = vsel %vm575_vm2, %v1141_v58, -inf }
 0x674   : > { %1143 = vmax.xlane.f32.xlu1 %v1142_v59 }
 0x685   : > { %1153 = vrot.lane.b32.xlu1 %v2388_v11, %s2223_s20  ;;  %s1903_s20 = sshll.u32 %s2324_s17, 7  ;;  %s2227_s17 = smov [#allocation2]  }
 0x686   : > { %s2556_s3 = scalar_lea.hbm %s2613_s14, %s1903_s20 }
 0x689   : > { %1306 = vrot.lane.b32.xlu1 %v2388_v11, %s2224_s21 }
 0x68d   : > { %1304 = vrot.lane.b32.xlu1 %v2388_v11, %s2225_s25  ;;  %s467_s25 = sand.u32 1, %s2203_s30  }
 0x68e   : > { %s1872_s22 = sshll.u32 %s467_s25, 3  ;;  %s1787_s26 = scalar_lea.sflag [#allocation3], %s467_s25 }
 0x68f   : > { %s469_s21 = scalar_lea.vmem [#allocation2], %s1872_s22  ;;  %s2153_s22 = sshll.u32 %s2227_s17, 4  ;;  %s2154_s22 = int_to_ptr.vmem [resolvable:$false] %s2153_s22 }
 0x690   : > { %s1800_s0 = sshll.u32 %s469_s21, 4  ;;  %s2155_s28 = scalar_lea.vmem %s2154_s22, 256  ;;  %s2558_s0 = int_to_ptr.vmem [resolvable:$true] %s1800_s0 }
 0x691   : > { %s2149_s27 = scalar_lea.vmem %s2558_s0, 128  ;;  %p2156_p0 = scmp.lt.s32.totalorder %s2558_s0, %s2154_s22 }
 0x692   : > { %p2150_p11 = scmp.ne.s32.totalorder %s2558_s0, %s2149_s27  ;;  %p2157_p1 = scmp.lt.s32.totalorder %s2155_s28, %s2149_s27 }
 0x694   : > { %p2151_p12 = pnand %p2150_p11, %p2341_p5  ;;  %p2158_p2 = por %p2157_p1, %p2156_p0 }
 0x696   : > { %p2152_p13 = pneg %p2151_p12 }
 0x698   : > { %p2159_p3 = pnand %p2158_p2, %p2152_p13 }
 0x701   : > { %v1144_v60 = vpop.xlane.xlu1 %1143 }
 0x702   : > { %v1145_v61 = vsub.f32 %v1141_v58, %v1144_v60  ;;  %v1895_v58 = vld [vmem:[%s2606_s7] ss:$0 sm:$0xff] }
 0x704   : > { %v1146_v62 = vmul.f32 1.442695, %v1145_v61  ;;  %v1666_v61 = vld [vmem:[%s2609_s10] sm:$0xff] }
 0x705   : > { %v1154_v63 = vpop.permute.xlu1 %1153 }
 0x706   : > { %2135 = vpow2.f32 %v1146_v62  ;;  %1996 = vmatpush3.msra.mxu1 %v1154_v63  ;;  %v1667_v62 = vld [vmem:[%s2609_s10 + $0x8] sm:$0xff] }
 0x707   : > { %2005 = vmatprep.subr.mxu1 %v2215_v6  ;;  %v2063_v63 = vpack.c.bf16 %v1667_v62, %v1666_v61 }
 0x709   : > { %v1307_v13 = vpop.permute.xlu1 %1306 }
 0x70d   : > { %v1305_v15 = vpop.permute.xlu1 %1304 }
 0x710   : > { %v2136_v0 = vpop.eup %2135 }
 0x711   : > { %v1148_v1 = vsel %vm575_vm2, %v2136_v0, 0.0 }
 0x712   : > { %1149 = vadd.xlane.f32.xlu0 %v1148_v1  ;;  %v1669_v1 = vld [vmem:[%s2609_s10 + $0x18] sm:$0xff] }
 0x73e   : > { %v1057_v5 = vpop.f32.mrb[4].mxu1 }
 0x73f   : > { %v1061_v7 = vadd.f32 %v1057_v5, %v819_v4  ;;  %v1989_v9 = vpop.f32.mrb[5].mxu1  ;;  %v1670_v4 = vld [vmem:[%s2609_s10 + $0x20] sm:$0xff]  ;;  %v1671_v5 = vld [vmem:[%s2609_s10 + $0x28] sm:$0xff] }
 0x740   : > { %v1672_v9 = vld [vmem:[%s2609_s10 + $0x30] sm:$0xff] }
 0x79f   : > { %v1150_v10 = vpop.xlane.xlu0 %1149 }
 0x7a0   : > { %2137 = vrcp.f32 %v1150_v10  ;;  %v1673_v10 = vld [vmem:[%s2609_s10 + $0x38] sm:$0xff] }
 0x7aa   : > { %v2138_v12 = vpop.eup %2137 }
 0x7ab   : > { %v1152_v14 = vmul.f32 %v2138_v12, %v2136_v0  ;;  %v1668_v0 = vld [vmem:[%s2609_s10 + $0x10] sm:$0xff]  ;;  %v2072_v12 = vpack.c.bf16 %v1673_v10, %v1672_v9 }
 0x7ac   : > { %v2066_v2 = vpack.c.bf16 %v1669_v1, %v1668_v0 }
 0x7ad   : > { %1998 = vmatmul.mubr.msk.f32.vlgmr.msra.gmra.mrb[6].mxu1 %vm575_vm2, %v1152_v14 }
 0x7ae   : > { %2006 = vmatpush3.xpose.msk.msra.mxu1 %vm575_vm2, %v1307_v13  ;;  %2007 = vmatprep.mubr.msk.f32.mxu1 %vm2214_vm0, %v2215_v6  ;;  %v1896_v13 = vld [vmem:[%s2608_s9] ss:$0 sm:$0xff] }
 0x7af   : > { %2015 = vmatprep.subr.mxu1 %v2215_v6 }
 0x7b1   : > { %2008 = vmatmul.mubr.msk.f32.vlgmr.msra.gmra.mrb[8].mxu1 %vm575_vm2, %v1305_v15 }
 0x7b2   : > { %2017 = vmatprep.mubr.msk.f32.mxu1 %vm2214_vm0, %v2215_v6  ;;  %2016 = vmatpush3.msra.mxu1 %v1471_v30 }
 0x7b3   : > { %2062 = vmatprep.subr.bf16.mxu1 %v2213_v3 }
 0x880   : > { %v1225_v18 = vpop.f32.mrb[6].mxu1 }
 0x881   : > { %v1999_v19 = vpop.f32.mrb[7].mxu1  ;;  %2003 = vmatmul.mubr.msk.f32.vlgmr.msra.gmra.mrb[10].mxu0 %vm575_vm2, %v1225_v18 }
 0x882   : > { %2012 = vmatprep.mubr.msk.f32.mxu0 %vm2214_vm0, %v2215_v6 }
 0x884   : > { %v1378_v20 = vpop.f32.mrb[8].mxu1 }
 0x885   : > { %v1382_v21 = vmul.f32 0.35355338, %v1378_v20  ;;  %v2009_v22 = vpop.f32.mrb[9].mxu1 }
 0x886   : > { %v1898_v22 = vld [vmem:[%s2610_s11] ss:$0 sm:$0xff] }
 0x887   : > { %v1383_v23 = vadd.f32 %v2404_v16, %v1382_v21 }
 0x889   : > { %v1384_v24 = vsel %vm575_vm2, %v1383_v23, -inf }
 0x88a   : > { %1385 = vmax.xlane.f32.xlu1 %v1384_v24 }
 0x917   : > { %v1386_v25 = vpop.xlane.xlu1 %1385 }
 0x918   : > { %v1387_v26 = vsub.f32 %v1383_v23, %v1386_v25 }
 0x91a   : > { %v1388_v27 = vmul.f32 1.442695, %v1387_v26 }
 0x91c   : > { %2139 = vpow2.f32 %v1388_v27 }
 0x926   : > { %v2140_v28 = vpop.eup %2139 }
 0x927   : > { %v1390_v29 = vsel %vm575_vm2, %v2140_v28, 0.0 }
 0x928   : > { %1391 = vadd.xlane.f32.xlu0 %v1390_v29 }
 0x93e   : > { %1395 = vrot.lane.b32.xlu0 %v2388_v11, %s2226_s18 }
 0x954   : > { %v1299_v16 = vpop.f32.mrb[10].mxu0 }
 0x955   : > { %v1303_v31 = vadd.f32 %v1299_v16, %v1061_v7  ;;  %v2004_v32 = vpop.f32.mrb[11].mxu0  ;;  %v2069_v7 = vpack.c.bf16 %v1671_v5, %v1670_v4 }
 0x9b5   : > { %v1392_v33 = vpop.xlane.xlu0 %1391 }
 0x9b6   : > { %2141 = vrcp.f32 %v1392_v33 }
 0x9b9   : > { %v1396_v34 = vpop.permute.xlu0 %1395 }
 0x9ba   : > { %2011 = vmatpush3.msra.mxu0 %v1396_v34 }
 0x9bb   : > { %2056 = vmatprep.subr.bf16.mxu0 %v2213_v3 }
 0x9c0   : > { %v2142_v35 = vpop.eup %2141 }
 0x9c1   : > { %v1394_v36 = vmul.f32 %v2142_v35, %v2140_v28 }
 0x9c3   : > { %2013 = vmatmul.mubr.msk.f32.vlgmr.msra.gmra.mrb[12].mxu0 %vm575_vm2, %v1394_v36  ;;  %v1900_v36 = vld [vmem:[%s2611_s12] ss:$0 sm:$0xff] }
 0x9c4   : > { %2028 = vmatprep.mubr.msk.f32.mxu0 %vm2214_vm0, %v2215_v6 }
 0xa96   : > { %v1467_v11 = vpop.f32.mrb[12].mxu0 }
 0xa97   : > { %v2014_v37 = vpop.f32.mrb[13].mxu0  ;;  %2018 = vmatmul.mubr.msk.f32.vlgmr.msra.gmra.mrb[10].mxu1 %vm575_vm2, %v1467_v11 }
 0xa98   : > { %2047 = vmatprep.mubr.msk.f32.mxu1 %vm2214_vm0, %v2215_v6  ;;  %v1578_v6 = vld [vmem:[%s2607_s8 + $0x8] sm:$0xff]  ;;  %2064 = vmatpush3.bf16.msra.mxu1 %v2063_v63  ;;  %v1901_v37 = vld [vmem:[%s2612_s13] ss:$0 sm:$0xff] }
 0xa99   : > { %v2057_v49 = vpack.c.bf16 %v1578_v6, %v1577_v48  ;;  %2065 = vmatprep.subr.bf16.mxu1 %v2213_v3 }
 0xa9b   : > { %2058 = vmatpush3.bf16.msra.mxu0 %v2057_v49 }
 0xa9c   : > { %2059 = vmatprep.subr.bf16.mxu0 %v2213_v3  ;;  %2067 = vmatpush3.bf16.msra.mxu1 %v2066_v2 }
 0xa9d   : > { %2068 = vmatprep.subr.bf16.mxu1 %v2213_v3 }
 0xaa0   : > { %2070 = vmatpush3.bf16.msra.mxu1 %v2069_v7 }
 0xaa1   : > { %2071 = vmatprep.subr.bf16.mxu1 %v2213_v3 }
 0xaa4   : > { %2073 = vmatpush3.bf16.msra.mxu1 %v2072_v12 }
 0xb6a   : > { %v1541_v38 = vpop.f32.mrb[10].mxu1 }
 0xb6b   : > { %v1545_v39 = vadd.f32 %v1541_v38, %v1303_v31  ;;  %v2019_v40 = vpop.f32.mrb[11].mxu1 }
 0xb6d   : > { %v1546_v41 = vadd.f32 %v1545_v39, %v2378_v8  ;;  %v1579_v8 = vld [vmem:[%s2607_s8 + $0x10] sm:$0xff] }
 0xb6e   : > { %v2060_v51 = vpack.c.bf16 %v1580_v50, %v1579_v8 }
 0xb6f   : > { %v1547_v42 = vsel %vm490_vm1, %v1546_v41, 0.0 }
 0xb70   : > { %1548 = vadd.xlane.f32.xlu0 %v1547_v42  ;;  %2061 = vmatpush3.bf16.msra.mxu0 %v2060_v51 }
 0xbfd   : > { %v1549_v43 = vpop.xlane.xlu0 %1548 }
 0xbfe   : > { %v1551_v44 = vmul.f32 0.03125, %v1549_v43 }
 0xc00   : > { %v1552_v45 = vsub.f32 %v1546_v41, %v1551_v44 }
 0xc02   : > { %v1553_v46 = vmul.f32 %v1552_v45, %v1552_v45 }
 0xc04   : > { %v1554_v47 = vsel %vm490_vm1, %v1553_v46, 0.0 }
 0xc05   : > { %1555 = vadd.xlane.f32.xlu1 %v1554_v47 }
 0xc92   : > { %v1556_v52 = vpop.xlane.xlu1 %1555 }
 0xc93   : > { %v1557_v53 = vmul.f32 0.03125, %v1556_v52 }
 0xc95   : > { %v1558_v54 = vadd.f32 1e-12, %v1557_v53 }
 0xc97   : > { %2143 = vrsqrt.f32 %v1558_v54 }
 0xca1   : > { %v2144_v55 = vpop.eup %2143 }
 0xca2   : > { %v1560_v57 = vmul.f32 %v2144_v55, %v1552_v45 }
 0xca4   : > { %v1568_v59 = vmul.f32 %v1894_v56, %v1560_v57 }
 0xca6   : > { %v1576_v60 = vadd.f32 %v1895_v58, %v1568_v59 }
 0xca8   : > { %2029 = vmatmul.mubr.msk.f32.vlgmr.msra.gmra.mrb[14].mxu0 %vm490_vm1, %v1576_v60 }
 0xd7b   : > { %v1657_v14 = vpop.f32.mrb[14].mxu0 }
 0xd7c   : > { %v1658_v15 = vadd.f32 %v1896_v13, %v1657_v14  ;;  %v2030_v17 = vpop.f32.mrb[15].mxu0 }
 0xd7e   : > { %v1662_v18 = vmul.f32 0.70710677, %v1658_v15  ;;  %v1661_v19 = vmul.f32 0.5, %v1658_v15 }
 0xd80   : > { %2145 = verf.f32 %v1662_v18 }
 0xd8a   : > { %v2146_v3 = vpop.eup %2145 }
 0xd8b   : > { %v1664_v20 = vadd.f32 1.0, %v2146_v3 }
 0xd8d   : > { %v1665_v21 = vmul.f32 %v1664_v20, %v1661_v19 }
 0xd8f   : > { %2048 = vmatmul.mubr.msk.f32.vlgmr.msra.gmra.mrb[12].mxu1 %vm1681_vm3, %v1665_v21 }
 0xe62   : > { %v1751_v23 = vpop.f32.mrb[12].mxu1 }
 0xe63   : > { %v1752_v24 = vadd.f32 %v1898_v22, %v1751_v23  ;;  %v2049_v25 = vpop.f32.mrb[13].mxu1 }
 0xe65   : > { %v1755_v26 = vadd.f32 %v1752_v24, %v1576_v60 }
 0xe67   : > { %v1756_v27 = vsel %vm490_vm1, %v1755_v26, 0.0 }
 0xe68   : > { %1757 = vadd.xlane.f32.xlu1 %v1756_v27 }
 0xef5   : > { %v1758_v28 = vpop.xlane.xlu1 %1757 }
 0xef6   : > { %v1759_v29 = vmul.f32 0.03125, %v1758_v28 }
 0xef8   : > { %v1760_v30 = vsub.f32 %v1755_v26, %v1759_v29 }
 0xefa   : > { %v1761_v16 = vmul.f32 %v1760_v30, %v1760_v30 }
 0xefc   : > { %v1762_v31 = vsel %vm490_vm1, %v1761_v16, 0.0 }
 0xefd   : > { %1763 = vadd.xlane.f32.xlu1 %v1762_v31 }
 0xf8a   : > { %v1764_v32 = vpop.xlane.xlu1 %1763 }
 0xf8b   : > { %v1765_v33 = vmul.f32 0.03125, %v1764_v32 }
 0xf8d   : > { %v1766_v34 = vadd.f32 1e-12, %v1765_v33 }
 0xf8f   : > { %2147 = vrsqrt.f32 %v1766_v34 }
 0xf99   : > { %v2148_v35 = vpop.eup %2147 }
 0xf9a   : > { %v1768_v11 = vmul.f32 %v2148_v35, %v1760_v30 }
 0xf9c   : > { %v1776_v38 = vmul.f32 %v1900_v36, %v1768_v11 }
 0xf9e   : > { %v1784_v39 = vadd.f32 %v1901_v37, %v1776_v38 }
 0xfa0   : > { %1785 = vst.msk [vmem:[%s469_s21] sm:$0xff] %vm490_vm1, %v1784_v39 }
 0xfa1   : > { %2162 = shalt.err (!%p2159_p3)
}
 0xfa2   : > { %s2163_s1 = scalar_lea.hbm %s2556_s3, 128  ;;  %s2167_s18 = scalar_lea.hbm %s2613_s14, 256 }
 0xfa3   : > { %p2164_p4 = scmp.ne.s32.totalorder %s2556_s3, %s2163_s1  ;;  %p2168_p9 = scmp.lt.u32.totalorder %s2556_s3, %s2613_s14 }
 0xfa4   : > { %p2169_p10 = scmp.lt.u32.totalorder %s2167_s18, %s2163_s1  ;;  %p2171_p12 = scmp.lt.u32.totalorder %s2163_s1, %s2556_s3 }
 0xfa5   : > { %p2165_p7 = pnand %p2164_p4, %p2341_p5 }
 0xfa6   : > { %p2170_p11 = por %p2169_p10, %p2168_p9 }
 0xfa7   : > { %p2166_p8 = pneg %p2165_p7 }
 0xfa8   : > { %p2172_p13 = por %p2171_p12, %p2170_p11 }
 0xfaa   : > { %p2173_p0 = pnand %p2172_p13, %p2166_p8 }
 0xfac   : > { %2176 = shalt.err (!%p2173_p0)
}
 0xfad   : > { %2074 = dma.vmem_to_hbm [thread:$0]  (%p2341_p5), %s2558_s0, 128, %s2556_s3, %s1787_s26  }
 0xfae PF: > { %p2080_p1 = scmp.ge.s32.totalorder %s2211_s16, 2  ;;  %s1812_s27 = sand.u32 1, %s2199_s29  }
 0xfaf   : > { %s1813_s17 = scalar_lea.sflag [#allocation3], %s1812_s27 }
 0xfb0   : > { %p2077_p2 = pnand %p2080_p1, %p2345_p6 }
 0xfb2   : > { %2194 = dma.done.wait (!%p2077_p2), %s1813_s17, 128  }
 0xfb3   : > { %2196 = vsyncadd (!%p2077_p2), %s1813_s17, 4294967168  ;;  %s2625_s22 = sld [smem:[#allocation5_spill]]  ;;  %p24_p3 = scmp.ge.s32.totalorder %s2328_s19, 4  }
 0xfb4   : > { %s2626_s29 = smov %s2203_s30  ;;  %s2627_s30 = smov %s2207_s15 }
 0xfb5   : > { %s2629_s16 = smov %s2328_s19  ;;  %26 = sbr.rel (!%p24_p3) target bundleno = 8 (0x8), region = 114 }
 0xfb9   : > { %s2628_s15 = smov %s2625_s22 }
 0xfbc   :  { %1818 = vsyncpa [#allocation3], 1 }
 0xfbd   :  { %1820 = vsyncpa [#allocation3 + $0x1], 1 }

</bundles_post_ra>
